<compile_context>
chip_gen: v5e
topology: v5e:2x2
jax: 0.10.0
libtpu: 0.0.40
codegen_flags: <defaults>
</compile_context>

<pallas_src>
import numpy as np
import jax
import jax.numpy as jnp
from jax import lax
from jax.experimental import pallas as pl
from jax.experimental.pallas import tpu as pltpu

EPS = 1e-5
HIGH = lax.Precision.HIGHEST


# ----------------------------- small shared helpers -----------------------------

def _silu(x):
    return x * jax.nn.sigmoid(x)


def _round_up(v, m):
    return ((v + m - 1) // m) * m


def _bilinear_up_matrix(n):
    """(2n, n) matrix matching nn.Upsample(scale_factor=2, mode='bilinear'), align_corners=False."""
    m = np.zeros((2 * n, n), np.float32)
    for o in range(2 * n):
        src = max((o + 0.5) / 2.0 - 0.5, 0.0)
        i0 = int(np.floor(src))
        i1 = min(i0 + 1, n - 1)
        lam = src - i0
        m[o, i0] += 1.0 - lam
        m[o, i1] += lam
    return m


def _upsample_scatter_block(nbatch, h, w, lanes):
    """(N*H*W, LANES): bilinear x2 upsample AND scatter into the padded-flat, batch-in-lane frame."""
    h2, w2 = 2 * h, 2 * w
    hp, wp = h2 + 2, w2 + 2
    lp = hp * wp
    uh = _bilinear_up_matrix(h)                               # (2H, H)
    uw = _bilinear_up_matrix(w)                               # (2W, W)
    u2 = np.einsum('yi,xj->yxij', uh, uw)                     # (2H, 2W, H, W)
    full = np.zeros((hp, wp, h, w), np.float32)
    full[1:1 + h2, 1:1 + w2] = u2
    per = np.ascontiguousarray(full.reshape(lp, h * w).T)     # (H*W, LP)
    blk = np.zeros((nbatch * h * w, lanes), np.float32)
    for b in range(nbatch):
        blk[b * h * w:(b + 1) * h * w, b * lp:(b + 1) * lp] = per
    return blk


def _interior_mask(nbatch, h2, w2, cpad, lanes):
    """(CPAD, LANES) mask: 1 on valid image positions, 0 on pad borders and dead lanes."""
    hp, wp = h2 + 2, w2 + 2
    lp = hp * wp
    m = np.zeros((hp, wp), np.float32)
    m[1:1 + h2, 1:1 + w2] = 1.0
    flat = np.zeros((lanes,), np.float32)
    for b in range(nbatch):
        flat[b * lp:(b + 1) * lp] = m.reshape(-1)
    return np.ascontiguousarray(np.broadcast_to(flat[None, :], (cpad, lanes)))


def _pack_conv(w, cpad):
    """(Cout, Cin, 3, 3) conv weight -> (CPAD, 9*CPAD): row = out-channel (zero-padded),
    column = tap*CPAD + in-channel, matching the 8-sublane-aligned im2col patch rows."""
    cout, cin = w.shape[0], w.shape[1]
    wt = jnp.transpose(w, (0, 2, 3, 1)).reshape(cout, 9, cin)
    wt = jnp.pad(wt, ((0, cpad - cout), (0, 0), (0, cpad - cin)))
    return wt.reshape(cpad, 9 * cpad)


def _pack_col(v, cpad):
    """(L, C) -> (L, CPAD, 1) channel-in-sublane column (lane-only broadcasts in the kernel)."""
    return jnp.pad(v, ((0, 0), (0, cpad - v.shape[1])))[..., None]


# --------------------------------- fused kernel ----------------------------------

def _build_decoder_kernel(n_layers, cpad, lanes, wp, count):
    shifts = [(dy - 1) * wp + (dx - 1) for dy in range(3) for dx in range(3)]
    inv_count = 1.0 / count

    def kernel(x_ref, u_ref, mask_ref, upwt_ref, upb_ref,
               w1_ref, w2_ref, cvec_ref, adapt_ref,
               o_ref, pat_ref):
        mask = mask_ref[...]                                   # (CPAD, LANES)

        def conv3x3(y, w_t, bias):
            """3x3 same-padding conv for the whole batch in one MXU push.
            y: (CPAD, LANES) with border/dead lanes == 0; w_t: (CPAD, 9*CPAD); bias: (CPAD, 1)."""
            for tap, sh in enumerate(shifts):
                rolled = y if sh == 0 else pltpu.roll(y, shift=(-sh) % lanes, axis=1)
                pat_ref[tap * cpad:(tap + 1) * cpad, :] = rolled    # 8-sublane aligned store
            out = jnp.dot(w_t, pat_ref[...], preferred_element_type=jnp.float32)
            return out + bias                                       # lane-only broadcast

        def bn_silu(x, gamma, beta):
            """SiLU -> training-mode BatchNorm2d, returning the already-masked result."""
            a = x * jax.nn.sigmoid(x)
            am = a * mask
            s1 = jnp.sum(am, axis=1, keepdims=True)                 # (CPAD, 1)
            s2 = jnp.sum(am * am, axis=1, keepdims=True)
            mean = s1 * inv_count
            var = s2 * inv_count - mean * mean                      # biased variance
            scale = gamma * lax.rsqrt(var + EPS)
            shift = beta - mean * scale
            return am * scale + shift * mask                        # masked conv-ready output

        # --- bilinear x2 upsample fused with the scatter into the padded-flat frame ---
        feat = jnp.dot(x_ref[...], u_ref[...],
                       preferred_element_type=jnp.float32)          # (CPAD, LANES), border=0

        # --- up-conv: Conv2d(Cin -> Cout, 3x3, pad=1) ---
        feat = conv3x3(feat, upwt_ref[...], upb_ref[...])

        # --- residual layers (static unroll) ---
        for l in range(n_layers):
            res = feat
            cv = cvec_ref[l]                                        # (CPAD, 6)

            # block1: SiLU -> BatchNorm2d -> Conv2d
            x1 = bn_silu(feat, cv[:, 0:1], cv[:, 1:2])
            x1 = conv3x3(x1, w1_ref[l], cv[:, 2:3])

            # time / y adapter add (precomputed & pre-broadcast in the wrapper)
            x1 = x1 + adapt_ref[l]

            # block2: SiLU -> BatchNorm2d -> Conv2d, then residual add
            x2 = bn_silu(x1, cv[:, 3:4], cv[:, 4:5])
            x2 = conv3x3(x2, w2_ref[l], cv[:, 5:6])

            feat = x2 + res

        o_ref[...] = feat                                           # full-tile lane-dense store

    return kernel


# ----------------------------------- wrapper -------------------------------------

def decoder_forward_pallas(nat, x_nchw, t_embed, y_embed):
    n, cin, h, w = x_nchw.shape
    cout = nat['up_b'].shape[0]
    n_layers = nat['w1'].shape[0]
    h2, w2 = 2 * h, 2 * w
    hp, wp = h2 + 2, w2 + 2
    lp = hp * wp
    cpad = max(_round_up(cin, 8), _round_up(cout, 8))
    lanes = _round_up(n * lp, 128)
    count = float(n * h2 * w2)

    # ----- constants (numpy, folded at trace time) -----
    u_blk = jnp.asarray(_upsample_scatter_block(n, h, w, lanes))     # (N*H*W, LANES)
    mask = jnp.asarray(_interior_mask(n, h2, w2, cpad, lanes))       # (CPAD, LANES)

    # ----- weight packing (tiny XLA ops) -----
    up_wt = _pack_conv(nat['up_w'], cpad)                            # (CPAD, 9*CPAD)
    up_b = jnp.pad(nat['up_b'], (0, cpad - cout))[:, None]           # (CPAD, 1)
    w1p = jnp.stack([_pack_conv(nat['w1'][l], cpad) for l in range(n_layers)], 0)
    w2p = jnp.stack([_pack_conv(nat['w2'][l], cpad) for l in range(n_layers)], 0)
    cvec = jnp.concatenate([_pack_col(nat['g1'], cpad), _pack_col(nat['be1'], cpad),
                            _pack_col(nat['b1'], cpad), _pack_col(nat['g2'], cpad),
                            _pack_col(nat['be2'], cpad), _pack_col(nat['b2'], cpad)],
                           axis=2)                                   # (L, CPAD, 6)

    # ----- adapter MLPs hoisted off the kernel critical path (feat-independent) -----
    tt = _silu(jnp.einsum('nd,lde->lne', t_embed, nat['wt1'], precision=HIGH)
               + nat['bt1'][:, None, :])
    tt = jnp.einsum('lne,lec->lnc', tt, nat['wt2'], precision=HIGH) + nat['bt2'][:, None, :]
    yy = _silu(jnp.einsum('nd,lde->lne', y_embed, nat['wy1'], precision=HIGH)
               + nat['by1'][:, None, :])
    yy = jnp.einsum('lne,lec->lnc', yy, nat['wy2'], precision=HIGH) + nat['by2'][:, None, :]
    add = jnp.pad(tt + yy, ((0, 0), (0, 0), (0, cpad - cout)))       # (L, N, CPAD)
    add = jnp.transpose(add, (0, 2, 1))                              # (L, CPAD, N)
    adapt = jnp.broadcast_to(add[..., None], (n_layers, cpad, n, lp)).reshape(
        n_layers, cpad, n * lp)
    adapt = jnp.pad(adapt, ((0, 0), (0, 0), (0, lanes - n * lp)))    # (L, CPAD, LANES)

    # ----- input: (N, Cin, H, W) -> (CPAD, N*H*W) (channel in sublane, batch in lanes) -----
    x2 = jnp.transpose(x_nchw, (1, 0, 2, 3)).reshape(cin, n * h * w)
    x2 = jnp.pad(x2, ((0, cpad - cin), (0, 0)))

    kernel = _build_decoder_kernel(n_layers, cpad, lanes, wp, count)
    vmem = pl.BlockSpec(memory_space=pltpu.MemorySpace.VMEM)

    out_pad = pl.pallas_call(
        kernel,
        out_shape=jax.ShapeDtypeStruct((cpad, lanes), jnp.float32),
        in_specs=[vmem] * 9,
        out_specs=vmem,
        scratch_shapes=[pltpu.VMEM((9 * cpad, lanes), jnp.float32)],  # im2col patch matrix
    )(x2, u_blk, mask, up_wt, up_b, w1p, w2p, cvec, adapt)

    # extract valid channels + interior lanes -> NCHW (cheap XLA slice of a ~24 KB array)
    out = out_pad[:cout, :n * lp].reshape(cout, n, hp, wp)
    return jnp.transpose(out, (1, 0, 2, 3))[:, :, 1:1 + h2, 1:1 + w2]


# -------------------------------- parameter init ---------------------------------

def init_params(key, cin, cout, n_layers, td, yd):
    ks = jax.random.split(key, 18)

    def nrm(k, shape, s=0.1):
        return s * jax.random.normal(k, shape, jnp.float32)

    return {
        'up_w': nrm(ks[0], (cout, cin, 3, 3)), 'up_b': nrm(ks[1], (cout,)),
        'w1': nrm(ks[2], (n_layers, cout, cout, 3, 3)), 'b1': nrm(ks[3], (n_layers, cout)),
        'g1': 1.0 + nrm(ks[4], (n_layers, cout)), 'be1': nrm(ks[5], (n_layers, cout)),
        'w2': nrm(ks[6], (n_layers, cout, cout, 3, 3)), 'b2': nrm(ks[7], (n_layers, cout)),
        'g2': 1.0 + nrm(ks[8], (n_layers, cout)), 'be2': nrm(ks[9], (n_layers, cout)),
        'wt1': nrm(ks[10], (n_layers, td, td)), 'bt1': nrm(ks[11], (n_layers, td)),
        'wt2': nrm(ks[12], (n_layers, td, cout)), 'bt2': nrm(ks[13], (n_layers, cout)),
        'wy1': nrm(ks[14], (n_layers, yd, yd)), 'by1': nrm(ks[15], (n_layers, yd)),
        'wy2': nrm(ks[16], (n_layers, yd, cout)), 'by2': nrm(ks[17], (n_layers, cout)),
    }


# ---------------------------- pure-JAX (XLA) reference ----------------------------

def reference_forward(nat, x, t_embed, y_embed):
    n, cin, h, w = x.shape
    n_layers = nat['w1'].shape[0]
    dn = ('NCHW', 'OIHW', 'NCHW')
    uh = jnp.asarray(_bilinear_up_matrix(h))
    uw = jnp.asarray(_bilinear_up_matrix(w))
    xu = jnp.einsum('yi,nciw->ncyw', uh, x, precision=HIGH)
    xu = jnp.einsum('xj,ncyj->ncyx', uw, xu, precision=HIGH)
    feat = lax.conv_general_dilated(xu, nat['up_w'], (1, 1), 'SAME',
                                    dimension_numbers=dn, precision=HIGH)
    feat = feat + nat['up_b'][None, :, None, None]

    def bn(z, g, b):
        mean = jnp.mean(z, axis=(0, 2, 3), keepdims=True)
        var = jnp.mean((z - mean) ** 2, axis=(0, 2, 3), keepdims=True)
        return ((z - mean) * lax.rsqrt(var + EPS) * g[None, :, None, None]
                + b[None, :, None, None])

    for l in range(n_layers):
        res = feat
        z = bn(_silu(feat), nat['g1'][l], nat['be1'][l])
        z = lax.conv_general_dilated(z, nat['w1'][l], (1, 1), 'SAME',
                                     dimension_numbers=dn, precision=HIGH)
        z = z + nat['b1'][l][None, :, None, None]
        tt = jnp.dot(_silu(jnp.dot(t_embed, nat['wt1'][l], precision=HIGH) + nat['bt1'][l]),
                     nat['wt2'][l], precision=HIGH) + nat['bt2'][l]
        yy = jnp.dot(_silu(jnp.dot(y_embed, nat['wy1'][l], precision=HIGH) + nat['by1'][l]),
                     nat['wy2'][l], precision=HIGH) + nat['by2'][l]
        z = z + tt[:, :, None, None] + yy[:, :, None, None]
        z = bn(_silu(z), nat['g2'][l], nat['be2'][l])
        z = lax.conv_general_dilated(z, nat['w2'][l], (1, 1), 'SAME',
                                     dimension_numbers=dn, precision=HIGH)
        z = z + nat['b2'][l][None, :, None, None]
        feat = z + res
    return feat


# ------------------------------------- main ---------------------------------------

if __name__ == "__main__":
    key = jax.random.PRNGKey(0)
    kx, kt, ky, kp = jax.random.split(key, 4)

    # Decoder(channels_in=8, channels_out=4, num_residual_layers=2, t_embed_dim=32, y_embed_dim=16)
    N, CIN, COUT, H, W = 2, 8, 4, 8, 8
    TD, YD, NLAYERS = 32, 16, 2

    x = jax.random.normal(kx, (N, CIN, H, W), jnp.float32)
    t_embed = jax.random.normal(kt, (N, TD), jnp.float32)
    y_embed = jax.random.normal(ky, (N, YD), jnp.float32)
    nat = init_params(kp, CIN, COUT, NLAYERS, TD, YD)

    out = jax.jit(decoder_forward_pallas)(nat, x, t_embed, y_embed)
    out = jax.block_until_ready(out)
    assert out.shape == (N, COUT, 2 * H, 2 * W), out.shape
    assert np.all(np.isfinite(np.asarray(out)))

    # sanity-check the fused Pallas kernel against a pure-XLA implementation of the same math
    ref = jax.block_until_ready(reference_forward(nat, x, t_embed, y_embed))
    np.testing.assert_allclose(np.asarray(out), np.asarray(ref), rtol=1e-3, atol=1e-3)

    print("KERNEL_OK")
</pallas_src>

<mosaic_0001>
module attributes {stable_mosaic.version = 11 : i64} {
  func.func @kernel(%arg0: memref<8x128xf32, #tpu.memory_space<vmem>>, %arg1: memref<128x768xf32, #tpu.memory_space<vmem>>, %arg2: memref<8x768xf32, #tpu.memory_space<vmem>>, %arg3: memref<8x72xf32, #tpu.memory_space<vmem>>, %arg4: memref<8x1xf32, #tpu.memory_space<vmem>>, %arg5: memref<2x8x72xf32, #tpu.memory_space<vmem>>, %arg6: memref<2x8x72xf32, #tpu.memory_space<vmem>>, %arg7: memref<2x8x6xf32, #tpu.memory_space<vmem>>, %arg8: memref<2x8x768xf32, #tpu.memory_space<vmem>>, %arg9: memref<8x768xf32, #tpu.memory_space<vmem>>, %arg10: memref<72x768xf32, #tpu.memory_space<vmem>>) attributes {dimension_semantics = [], scalar_prefetch = 0 : i64, scratch_operands = 1 : i64, tpu.core_type = #tpu.core_type<tc>} {
    %c0 = arith.constant 0 : index
    %c0_0 = arith.constant 0 : index
    %0 = vector.load %arg2[%c0, %c0_0] : memref<8x768xf32, #tpu.memory_space<vmem>>, vector<8x768xf32>
    %c0_1 = arith.constant 0 : index
    %c0_2 = arith.constant 0 : index
    %1 = vector.load %arg0[%c0_1, %c0_2] : memref<8x128xf32, #tpu.memory_space<vmem>>, vector<8x128xf32>
    %c0_3 = arith.constant 0 : index
    %c0_4 = arith.constant 0 : index
    %2 = vector.load %arg1[%c0_3, %c0_4] : memref<128x768xf32, #tpu.memory_space<vmem>>, vector<128x768xf32>
    %cst = arith.constant dense<0.000000e+00> : vector<8x768xf32>
    %3 = tpu.matmul %1, %2, %cst {dimension_numbers = #tpu.dot_dimension_numbers<[1], [0], [0], [1], [0, 0, 1, 1], [], []>} : vector<8x128xf32>, vector<128x768xf32>, vector<8x768xf32> -> vector<8x768xf32>
    %c0_5 = arith.constant 0 : index
    %c0_6 = arith.constant 0 : index
    %4 = vector.load %arg3[%c0_5, %c0_6] : memref<8x72xf32, #tpu.memory_space<vmem>>, vector<8x72xf32>
    %c0_7 = arith.constant 0 : index
    %c0_8 = arith.constant 0 : index
    %5 = vector.load %arg4[%c0_7, %c0_8] : memref<8x1xf32, #tpu.memory_space<vmem>>, vector<8x1xf32>
    %c19_i32 = arith.constant 19 : i32
    %6 = tpu.dynamic_rotate %3 by %c19_i32 dim 1 : vector<8x768xf32>, i32 -> vector<8x768xf32>
    %c0_9 = arith.constant 0 : index
    %c0_10 = arith.constant 0 : index
    %7 = vector.load %arg10[%c0_9, %c0_10] : memref<72x768xf32, #tpu.memory_space<vmem>>, vector<8x768xf32>
    tpu.vector_store %arg10[%c0_9, %c0_10], %6 {strides = array<i32>} : memref<72x768xf32, #tpu.memory_space<vmem>>, vector<8x768xf32>,
    %c18_i32 = arith.constant 18 : i32
    %8 = tpu.dynamic_rotate %3 by %c18_i32 dim 1 : vector<8x768xf32>, i32 -> vector<8x768xf32>
    %c8 = arith.constant 8 : index
    %c0_11 = arith.constant 0 : index
    %9 = vector.load %arg10[%c8, %c0_11] : memref<72x768xf32, #tpu.memory_space<vmem>>, vector<8x768xf32>
    tpu.vector_store %arg10[%c8, %c0_11], %8 {strides = array<i32>} : memref<72x768xf32, #tpu.memory_space<vmem>>, vector<8x768xf32>,
    %c17_i32 = arith.constant 17 : i32
    %10 = tpu.dynamic_rotate %3 by %c17_i32 dim 1 : vector<8x768xf32>, i32 -> vector<8x768xf32>
    %c16 = arith.constant 16 : index
    %c0_12 = arith.constant 0 : index
    %11 = vector.load %arg10[%c16, %c0_12] : memref<72x768xf32, #tpu.memory_space<vmem>>, vector<8x768xf32>
    tpu.vector_store %arg10[%c16, %c0_12], %10 {strides = array<i32>} : memref<72x768xf32, #tpu.memory_space<vmem>>, vector<8x768xf32>,
    %c1_i32 = arith.constant 1 : i32
    %12 = tpu.dynamic_rotate %3 by %c1_i32 dim 1 : vector<8x768xf32>, i32 -> vector<8x768xf32>
    %c24 = arith.constant 24 : index
    %c0_13 = arith.constant 0 : index
    %13 = vector.load %arg10[%c24, %c0_13] : memref<72x768xf32, #tpu.memory_space<vmem>>, vector<8x768xf32>
    tpu.vector_store %arg10[%c24, %c0_13], %12 {strides = array<i32>} : memref<72x768xf32, #tpu.memory_space<vmem>>, vector<8x768xf32>,
    %c32 = arith.constant 32 : index
    %c0_14 = arith.constant 0 : index
    %14 = vector.load %arg10[%c32, %c0_14] : memref<72x768xf32, #tpu.memory_space<vmem>>, vector<8x768xf32>
    tpu.vector_store %arg10[%c32, %c0_14], %3 {strides = array<i32>} : memref<72x768xf32, #tpu.memory_space<vmem>>, vector<8x768xf32>,
    %c767_i32 = arith.constant 767 : i32
    %15 = tpu.dynamic_rotate %3 by %c767_i32 dim 1 : vector<8x768xf32>, i32 -> vector<8x768xf32>
    %c40 = arith.constant 40 : index
    %c0_15 = arith.constant 0 : index
    %16 = vector.load %arg10[%c40, %c0_15] : memref<72x768xf32, #tpu.memory_space<vmem>>, vector<8x768xf32>
    tpu.vector_store %arg10[%c40, %c0_15], %15 {strides = array<i32>} : memref<72x768xf32, #tpu.memory_space<vmem>>, vector<8x768xf32>,
    %c751_i32 = arith.constant 751 : i32
    %17 = tpu.dynamic_rotate %3 by %c751_i32 dim 1 : vector<8x768xf32>, i32 -> vector<8x768xf32>
    %c48 = arith.constant 48 : index
    %c0_16 = arith.constant 0 : index
    %18 = vector.load %arg10[%c48, %c0_16] : memref<72x768xf32, #tpu.memory_space<vmem>>, vector<8x768xf32>
    tpu.vector_store %arg10[%c48, %c0_16], %17 {strides = array<i32>} : memref<72x768xf32, #tpu.memory_space<vmem>>, vector<8x768xf32>,
    %c750_i32 = arith.constant 750 : i32
    %19 = tpu.dynamic_rotate %3 by %c750_i32 dim 1 : vector<8x768xf32>, i32 -> vector<8x768xf32>
    %c56 = arith.constant 56 : index
    %c0_17 = arith.constant 0 : index
    %20 = vector.load %arg10[%c56, %c0_17] : memref<72x768xf32, #tpu.memory_space<vmem>>, vector<8x768xf32>
    tpu.vector_store %arg10[%c56, %c0_17], %19 {strides = array<i32>} : memref<72x768xf32, #tpu.memory_space<vmem>>, vector<8x768xf32>,
    %c749_i32 = arith.constant 749 : i32
    %21 = tpu.dynamic_rotate %3 by %c749_i32 dim 1 : vector<8x768xf32>, i32 -> vector<8x768xf32>
    %c64 = arith.constant 64 : index
    %c0_18 = arith.constant 0 : index
    %22 = vector.load %arg10[%c64, %c0_18] : memref<72x768xf32, #tpu.memory_space<vmem>>, vector<8x768xf32>
    tpu.vector_store %arg10[%c64, %c0_18], %21 {strides = array<i32>} : memref<72x768xf32, #tpu.memory_space<vmem>>, vector<8x768xf32>,
    %c0_19 = arith.constant 0 : index
    %c0_20 = arith.constant 0 : index
    %23 = vector.load %arg10[%c0_19, %c0_20] : memref<72x768xf32, #tpu.memory_space<vmem>>, vector<72x768xf32>
    %cst_21 = arith.constant dense<0.000000e+00> : vector<8x768xf32>
    %24 = tpu.matmul %4, %23, %cst_21 {dimension_numbers = #tpu.dot_dimension_numbers<[1], [0], [0], [1], [0, 0, 1, 1], [], []>} : vector<8x72xf32>, vector<72x768xf32>, vector<8x768xf32> -> vector<8x768xf32>
    %25 = vector.broadcast %5 : vector<8x1xf32> to vector<8x768xf32>
    %26 = arith.addf %24, %25 : vector<8x768xf32>
    %c0_22 = arith.constant 0 : index
    %c0_23 = arith.constant 0 : index
    %c0_24 = arith.constant 0 : index
    %27 = vector.load %arg7[%c0_22, %c0_23, %c0_24] : memref<2x8x6xf32, #tpu.memory_space<vmem>>, vector<1x8x6xf32>
    %28 = vector.shape_cast %27 : vector<1x8x6xf32> to vector<8x6xf32>
    %29 = vector.extract_strided_slice %28 {offsets = [0, 0], sizes = [8, 1], strides = [1, 1]} : vector<8x6xf32> to vector<8x1xf32>
    %30 = vector.extract_strided_slice %28 {offsets = [0, 1], sizes = [8, 1], strides = [1, 1]} : vector<8x6xf32> to vector<8x1xf32>
    %31 = arith.negf %26 : vector<8x768xf32>
    %32 = math.exp %31 : vector<8x768xf32>
    %cst_25 = arith.constant 1.000000e+00 : f32
    %33 = vector.broadcast %cst_25 : f32 to vector<8x768xf32>
    %34 = arith.addf %33, %32 : vector<8x768xf32>
    %35 = arith.divf %33, %34 : vector<8x768xf32>
    %36 = arith.mulf %26, %35 : vector<8x768xf32>
    %37 = arith.mulf %36, %0 : vector<8x768xf32>
    %cst_26 = arith.constant dense<0.000000e+00> : vector<8xf32>
    %38 = vector.multi_reduction <add>, %37, %cst_26 [1] : vector<8x768xf32> to vector<8xf32>
    %39 = vector.shape_cast %38 : vector<8xf32> to vector<8x1xf32>
    %40 = arith.mulf %37, %37 : vector<8x768xf32>
    %cst_27 = arith.constant dense<0.000000e+00> : vector<8xf32>
    %41 = vector.multi_reduction <add>, %40, %cst_27 [1] : vector<8x768xf32> to vector<8xf32>
    %42 = vector.shape_cast %41 : vector<8xf32> to vector<8x1xf32>
    %cst_28 = arith.constant 0.001953125 : f32
    %43 = vector.broadcast %cst_28 : f32 to vector<8x1xf32>
    %44 = arith.mulf %39, %43 : vector<8x1xf32>
    %cst_29 = arith.constant 0.001953125 : f32
    %45 = vector.broadcast %cst_29 : f32 to vector<8x1xf32>
    %46 = arith.mulf %42, %45 : vector<8x1xf32>
    %47 = arith.mulf %44, %44 : vector<8x1xf32>
    %48 = arith.subf %46, %47 : vector<8x1xf32>
    %cst_30 = arith.constant 9.99999974E-6 : f32
    %49 = vector.broadcast %cst_30 : f32 to vector<8x1xf32>
    %50 = arith.addf %48, %49 : vector<8x1xf32>
    %51 = math.rsqrt %50 : vector<8x1xf32>
    %52 = arith.mulf %29, %51 : vector<8x1xf32>
    %53 = arith.mulf %44, %52 : vector<8x1xf32>
    %54 = arith.subf %30, %53 : vector<8x1xf32>
    %55 = vector.broadcast %52 : vector<8x1xf32> to vector<8x768xf32>
    %56 = arith.mulf %37, %55 : vector<8x768xf32>
    %57 = vector.broadcast %54 : vector<8x1xf32> to vector<8x768xf32>
    %58 = arith.mulf %57, %0 : vector<8x768xf32>
    %59 = arith.addf %56, %58 : vector<8x768xf32>
    %c0_31 = arith.constant 0 : index
    %c0_32 = arith.constant 0 : index
    %c0_33 = arith.constant 0 : index
    %60 = vector.load %arg5[%c0_31, %c0_32, %c0_33] : memref<2x8x72xf32, #tpu.memory_space<vmem>>, vector<1x8x72xf32>
    %61 = vector.shape_cast %60 : vector<1x8x72xf32> to vector<8x72xf32>
    %62 = vector.extract_strided_slice %28 {offsets = [0, 2], sizes = [8, 1], strides = [1, 1]} : vector<8x6xf32> to vector<8x1xf32>
    %c19_i32_34 = arith.constant 19 : i32
    %63 = tpu.dynamic_rotate %59 by %c19_i32_34 dim 1 : vector<8x768xf32>, i32 -> vector<8x768xf32>
    %c0_35 = arith.constant 0 : index
    %c0_36 = arith.constant 0 : index
    %64 = vector.load %arg10[%c0_35, %c0_36] : memref<72x768xf32, #tpu.memory_space<vmem>>, vector<8x768xf32>
    tpu.vector_store %arg10[%c0_35, %c0_36], %63 {strides = array<i32>} : memref<72x768xf32, #tpu.memory_space<vmem>>, vector<8x768xf32>,
    %c18_i32_37 = arith.constant 18 : i32
    %65 = tpu.dynamic_rotate %59 by %c18_i32_37 dim 1 : vector<8x768xf32>, i32 -> vector<8x768xf32>
    %c8_38 = arith.constant 8 : index
    %c0_39 = arith.constant 0 : index
    %66 = vector.load %arg10[%c8_38, %c0_39] : memref<72x768xf32, #tpu.memory_space<vmem>>, vector<8x768xf32>
    tpu.vector_store %arg10[%c8_38, %c0_39], %65 {strides = array<i32>} : memref<72x768xf32, #tpu.memory_space<vmem>>, vector<8x768xf32>,
    %c17_i32_40 = arith.constant 17 : i32
    %67 = tpu.dynamic_rotate %59 by %c17_i32_40 dim 1 : vector<8x768xf32>, i32 -> vector<8x768xf32>
    %c16_41 = arith.constant 16 : index
    %c0_42 = arith.constant 0 : index
    %68 = vector.load %arg10[%c16_41, %c0_42] : memref<72x768xf32, #tpu.memory_space<vmem>>, vector<8x768xf32>
    tpu.vector_store %arg10[%c16_41, %c0_42], %67 {strides = array<i32>} : memref<72x768xf32, #tpu.memory_space<vmem>>, vector<8x768xf32>,
    %c1_i32_43 = arith.constant 1 : i32
    %69 = tpu.dynamic_rotate %59 by %c1_i32_43 dim 1 : vector<8x768xf32>, i32 -> vector<8x768xf32>
    %c24_44 = arith.constant 24 : index
    %c0_45 = arith.constant 0 : index
    %70 = vector.load %arg10[%c24_44, %c0_45] : memref<72x768xf32, #tpu.memory_space<vmem>>, vector<8x768xf32>
    tpu.vector_store %arg10[%c24_44, %c0_45], %69 {strides = array<i32>} : memref<72x768xf32, #tpu.memory_space<vmem>>, vector<8x768xf32>,
    %c32_46 = arith.constant 32 : index
    %c0_47 = arith.constant 0 : index
    %71 = vector.load %arg10[%c32_46, %c0_47] : memref<72x768xf32, #tpu.memory_space<vmem>>, vector<8x768xf32>
    tpu.vector_store %arg10[%c32_46, %c0_47], %59 {strides = array<i32>} : memref<72x768xf32, #tpu.memory_space<vmem>>, vector<8x768xf32>,
    %c767_i32_48 = arith.constant 767 : i32
    %72 = tpu.dynamic_rotate %59 by %c767_i32_48 dim 1 : vector<8x768xf32>, i32 -> vector<8x768xf32>
    %c40_49 = arith.constant 40 : index
    %c0_50 = arith.constant 0 : index
    %73 = vector.load %arg10[%c40_49, %c0_50] : memref<72x768xf32, #tpu.memory_space<vmem>>, vector<8x768xf32>
    tpu.vector_store %arg10[%c40_49, %c0_50], %72 {strides = array<i32>} : memref<72x768xf32, #tpu.memory_space<vmem>>, vector<8x768xf32>,
    %c751_i32_51 = arith.constant 751 : i32
    %74 = tpu.dynamic_rotate %59 by %c751_i32_51 dim 1 : vector<8x768xf32>, i32 -> vector<8x768xf32>
    %c48_52 = arith.constant 48 : index
    %c0_53 = arith.constant 0 : index
    %75 = vector.load %arg10[%c48_52, %c0_53] : memref<72x768xf32, #tpu.memory_space<vmem>>, vector<8x768xf32>
    tpu.vector_store %arg10[%c48_52, %c0_53], %74 {strides = array<i32>} : memref<72x768xf32, #tpu.memory_space<vmem>>, vector<8x768xf32>,
    %c750_i32_54 = arith.constant 750 : i32
    %76 = tpu.dynamic_rotate %59 by %c750_i32_54 dim 1 : vector<8x768xf32>, i32 -> vector<8x768xf32>
    %c56_55 = arith.constant 56 : index
    %c0_56 = arith.constant 0 : index
    %77 = vector.load %arg10[%c56_55, %c0_56] : memref<72x768xf32, #tpu.memory_space<vmem>>, vector<8x768xf32>
    tpu.vector_store %arg10[%c56_55, %c0_56], %76 {strides = array<i32>} : memref<72x768xf32, #tpu.memory_space<vmem>>, vector<8x768xf32>,
    %c749_i32_57 = arith.constant 749 : i32
    %78 = tpu.dynamic_rotate %59 by %c749_i32_57 dim 1 : vector<8x768xf32>, i32 -> vector<8x768xf32>
    %c64_58 = arith.constant 64 : index
    %c0_59 = arith.constant 0 : index
    %79 = vector.load %arg10[%c64_58, %c0_59] : memref<72x768xf32, #tpu.memory_space<vmem>>, vector<8x768xf32>
    tpu.vector_store %arg10[%c64_58, %c0_59], %78 {strides = array<i32>} : memref<72x768xf32, #tpu.memory_space<vmem>>, vector<8x768xf32>,
    %c0_60 = arith.constant 0 : index
    %c0_61 = arith.constant 0 : index
    %80 = vector.load %arg10[%c0_60, %c0_61] : memref<72x768xf32, #tpu.memory_space<vmem>>, vector<72x768xf32>
    %cst_62 = arith.constant dense<0.000000e+00> : vector<8x768xf32>
    %81 = tpu.matmul %61, %80, %cst_62 {dimension_numbers = #tpu.dot_dimension_numbers<[1], [0], [0], [1], [0, 0, 1, 1], [], []>} : vector<8x72xf32>, vector<72x768xf32>, vector<8x768xf32> -> vector<8x768xf32>
    %82 = vector.broadcast %62 : vector<8x1xf32> to vector<8x768xf32>
    %83 = arith.addf %81, %82 : vector<8x768xf32>
    %c0_63 = arith.constant 0 : index
    %c0_64 = arith.constant 0 : index
    %c0_65 = arith.constant 0 : index
    %84 = vector.load %arg8[%c0_63, %c0_64, %c0_65] : memref<2x8x768xf32, #tpu.memory_space<vmem>>, vector<1x8x768xf32>
    %85 = vector.shape_cast %84 : vector<1x8x768xf32> to vector<8x768xf32>
    %86 = arith.addf %83, %85 : vector<8x768xf32>
    %87 = vector.extract_strided_slice %28 {offsets = [0, 3], sizes = [8, 1], strides = [1, 1]} : vector<8x6xf32> to vector<8x1xf32>
    %88 = vector.extract_strided_slice %28 {offsets = [0, 4], sizes = [8, 1], strides = [1, 1]} : vector<8x6xf32> to vector<8x1xf32>
    %89 = arith.negf %86 : vector<8x768xf32>
    %90 = math.exp %89 : vector<8x768xf32>
    %cst_66 = arith.constant 1.000000e+00 : f32
    %91 = vector.broadcast %cst_66 : f32 to vector<8x768xf32>
    %92 = arith.addf %91, %90 : vector<8x768xf32>
    %93 = arith.divf %91, %92 : vector<8x768xf32>
    %94 = arith.mulf %86, %93 : vector<8x768xf32>
    %95 = arith.mulf %94, %0 : vector<8x768xf32>
    %cst_67 = arith.constant dense<0.000000e+00> : vector<8xf32>
    %96 = vector.multi_reduction <add>, %95, %cst_67 [1] : vector<8x768xf32> to vector<8xf32>
    %97 = vector.shape_cast %96 : vector<8xf32> to vector<8x1xf32>
    %98 = arith.mulf %95, %95 : vector<8x768xf32>
    %cst_68 = arith.constant dense<0.000000e+00> : vector<8xf32>
    %99 = vector.multi_reduction <add>, %98, %cst_68 [1] : vector<8x768xf32> to vector<8xf32>
    %100 = vector.shape_cast %99 : vector<8xf32> to vector<8x1xf32>
    %cst_69 = arith.constant 0.001953125 : f32
    %101 = vector.broadcast %cst_69 : f32 to vector<8x1xf32>
    %102 = arith.mulf %97, %101 : vector<8x1xf32>
    %cst_70 = arith.constant 0.001953125 : f32
    %103 = vector.broadcast %cst_70 : f32 to vector<8x1xf32>
    %104 = arith.mulf %100, %103 : vector<8x1xf32>
    %105 = arith.mulf %102, %102 : vector<8x1xf32>
    %106 = arith.subf %104, %105 : vector<8x1xf32>
    %cst_71 = arith.constant 9.99999974E-6 : f32
    %107 = vector.broadcast %cst_71 : f32 to vector<8x1xf32>
    %108 = arith.addf %106, %107 : vector<8x1xf32>
    %109 = math.rsqrt %108 : vector<8x1xf32>
    %110 = arith.mulf %87, %109 : vector<8x1xf32>
    %111 = arith.mulf %102, %110 : vector<8x1xf32>
    %112 = arith.subf %88, %111 : vector<8x1xf32>
    %113 = vector.broadcast %110 : vector<8x1xf32> to vector<8x768xf32>
    %114 = arith.mulf %95, %113 : vector<8x768xf32>
    %115 = vector.broadcast %112 : vector<8x1xf32> to vector<8x768xf32>
    %116 = arith.mulf %115, %0 : vector<8x768xf32>
    %117 = arith.addf %114, %116 : vector<8x768xf32>
    %c0_72 = arith.constant 0 : index
    %c0_73 = arith.constant 0 : index
    %c0_74 = arith.constant 0 : index
    %118 = vector.load %arg6[%c0_72, %c0_73, %c0_74] : memref<2x8x72xf32, #tpu.memory_space<vmem>>, vector<1x8x72xf32>
    %119 = vector.shape_cast %118 : vector<1x8x72xf32> to vector<8x72xf32>
    %120 = vector.extract_strided_slice %28 {offsets = [0, 5], sizes = [8, 1], strides = [1, 1]} : vector<8x6xf32> to vector<8x1xf32>
    %c19_i32_75 = arith.constant 19 : i32
    %121 = tpu.dynamic_rotate %117 by %c19_i32_75 dim 1 : vector<8x768xf32>, i32 -> vector<8x768xf32>
    %c0_76 = arith.constant 0 : index
    %c0_77 = arith.constant 0 : index
    %122 = vector.load %arg10[%c0_76, %c0_77] : memref<72x768xf32, #tpu.memory_space<vmem>>, vector<8x768xf32>
    tpu.vector_store %arg10[%c0_76, %c0_77], %121 {strides = array<i32>} : memref<72x768xf32, #tpu.memory_space<vmem>>, vector<8x768xf32>,
    %c18_i32_78 = arith.constant 18 : i32
    %123 = tpu.dynamic_rotate %117 by %c18_i32_78 dim 1 : vector<8x768xf32>, i32 -> vector<8x768xf32>
    %c8_79 = arith.constant 8 : index
    %c0_80 = arith.constant 0 : index
    %124 = vector.load %arg10[%c8_79, %c0_80] : memref<72x768xf32, #tpu.memory_space<vmem>>, vector<8x768xf32>
    tpu.vector_store %arg10[%c8_79, %c0_80], %123 {strides = array<i32>} : memref<72x768xf32, #tpu.memory_space<vmem>>, vector<8x768xf32>,
    %c17_i32_81 = arith.constant 17 : i32
    %125 = tpu.dynamic_rotate %117 by %c17_i32_81 dim 1 : vector<8x768xf32>, i32 -> vector<8x768xf32>
    %c16_82 = arith.constant 16 : index
    %c0_83 = arith.constant 0 : index
    %126 = vector.load %arg10[%c16_82, %c0_83] : memref<72x768xf32, #tpu.memory_space<vmem>>, vector<8x768xf32>
    tpu.vector_store %arg10[%c16_82, %c0_83], %125 {strides = array<i32>} : memref<72x768xf32, #tpu.memory_space<vmem>>, vector<8x768xf32>,
    %c1_i32_84 = arith.constant 1 : i32
    %127 = tpu.dynamic_rotate %117 by %c1_i32_84 dim 1 : vector<8x768xf32>, i32 -> vector<8x768xf32>
    %c24_85 = arith.constant 24 : index
    %c0_86 = arith.constant 0 : index
    %128 = vector.load %arg10[%c24_85, %c0_86] : memref<72x768xf32, #tpu.memory_space<vmem>>, vector<8x768xf32>
    tpu.vector_store %arg10[%c24_85, %c0_86], %127 {strides = array<i32>} : memref<72x768xf32, #tpu.memory_space<vmem>>, vector<8x768xf32>,
    %c32_87 = arith.constant 32 : index
    %c0_88 = arith.constant 0 : index
    %129 = vector.load %arg10[%c32_87, %c0_88] : memref<72x768xf32, #tpu.memory_space<vmem>>, vector<8x768xf32>
    tpu.vector_store %arg10[%c32_87, %c0_88], %117 {strides = array<i32>} : memref<72x768xf32, #tpu.memory_space<vmem>>, vector<8x768xf32>,
    %c767_i32_89 = arith.constant 767 : i32
    %130 = tpu.dynamic_rotate %117 by %c767_i32_89 dim 1 : vector<8x768xf32>, i32 -> vector<8x768xf32>
    %c40_90 = arith.constant 40 : index
    %c0_91 = arith.constant 0 : index
    %131 = vector.load %arg10[%c40_90, %c0_91] : memref<72x768xf32, #tpu.memory_space<vmem>>, vector<8x768xf32>
    tpu.vector_store %arg10[%c40_90, %c0_91], %130 {strides = array<i32>} : memref<72x768xf32, #tpu.memory_space<vmem>>, vector<8x768xf32>,
    %c751_i32_92 = arith.constant 751 : i32
    %132 = tpu.dynamic_rotate %117 by %c751_i32_92 dim 1 : vector<8x768xf32>, i32 -> vector<8x768xf32>
    %c48_93 = arith.constant 48 : index
    %c0_94 = arith.constant 0 : index
    %133 = vector.load %arg10[%c48_93, %c0_94] : memref<72x768xf32, #tpu.memory_space<vmem>>, vector<8x768xf32>
    tpu.vector_store %arg10[%c48_93, %c0_94], %132 {strides = array<i32>} : memref<72x768xf32, #tpu.memory_space<vmem>>, vector<8x768xf32>,
    %c750_i32_95 = arith.constant 750 : i32
    %134 = tpu.dynamic_rotate %117 by %c750_i32_95 dim 1 : vector<8x768xf32>, i32 -> vector<8x768xf32>
    %c56_96 = arith.constant 56 : index
    %c0_97 = arith.constant 0 : index
    %135 = vector.load %arg10[%c56_96, %c0_97] : memref<72x768xf32, #tpu.memory_space<vmem>>, vector<8x768xf32>
    tpu.vector_store %arg10[%c56_96, %c0_97], %134 {strides = array<i32>} : memref<72x768xf32, #tpu.memory_space<vmem>>, vector<8x768xf32>,
    %c749_i32_98 = arith.constant 749 : i32
    %136 = tpu.dynamic_rotate %117 by %c749_i32_98 dim 1 : vector<8x768xf32>, i32 -> vector<8x768xf32>
    %c64_99 = arith.constant 64 : index
    %c0_100 = arith.constant 0 : index
    %137 = vector.load %arg10[%c64_99, %c0_100] : memref<72x768xf32, #tpu.memory_space<vmem>>, vector<8x768xf32>
    tpu.vector_store %arg10[%c64_99, %c0_100], %136 {strides = array<i32>} : memref<72x768xf32, #tpu.memory_space<vmem>>, vector<8x768xf32>,
    %c0_101 = arith.constant 0 : index
    %c0_102 = arith.constant 0 : index
    %138 = vector.load %arg10[%c0_101, %c0_102] : memref<72x768xf32, #tpu.memory_space<vmem>>, vector<72x768xf32>
    %cst_103 = arith.constant dense<0.000000e+00> : vector<8x768xf32>
    %139 = tpu.matmul %119, %138, %cst_103 {dimension_numbers = #tpu.dot_dimension_numbers<[1], [0], [0], [1], [0, 0, 1, 1], [], []>} : vector<8x72xf32>, vector<72x768xf32>, vector<8x768xf32> -> vector<8x768xf32>
    %140 = vector.broadcast %120 : vector<8x1xf32> to vector<8x768xf32>
    %141 = arith.addf %139, %140 : vector<8x768xf32>
    %142 = arith.addf %141, %26 : vector<8x768xf32>
    %c1 = arith.constant 1 : index
    %c0_104 = arith.constant 0 : index
    %c0_105 = arith.constant 0 : index
    %143 = vector.load %arg7[%c1, %c0_104, %c0_105] : memref<2x8x6xf32, #tpu.memory_space<vmem>>, vector<1x8x6xf32>
    %144 = vector.shape_cast %143 : vector<1x8x6xf32> to vector<8x6xf32>
    %145 = vector.extract_strided_slice %144 {offsets = [0, 0], sizes = [8, 1], strides = [1, 1]} : vector<8x6xf32> to vector<8x1xf32>
    %146 = vector.extract_strided_slice %144 {offsets = [0, 1], sizes = [8, 1], strides = [1, 1]} : vector<8x6xf32> to vector<8x1xf32>
    %147 = arith.negf %142 : vector<8x768xf32>
    %148 = math.exp %147 : vector<8x768xf32>
    %cst_106 = arith.constant 1.000000e+00 : f32
    %149 = vector.broadcast %cst_106 : f32 to vector<8x768xf32>
    %150 = arith.addf %149, %148 : vector<8x768xf32>
    %151 = arith.divf %149, %150 : vector<8x768xf32>
    %152 = arith.mulf %142, %151 : vector<8x768xf32>
    %153 = arith.mulf %152, %0 : vector<8x768xf32>
    %cst_107 = arith.constant dense<0.000000e+00> : vector<8xf32>
    %154 = vector.multi_reduction <add>, %153, %cst_107 [1] : vector<8x768xf32> to vector<8xf32>
    %155 = vector.shape_cast %154 : vector<8xf32> to vector<8x1xf32>
    %156 = arith.mulf %153, %153 : vector<8x768xf32>
    %cst_108 = arith.constant dense<0.000000e+00> : vector<8xf32>
    %157 = vector.multi_reduction <add>, %156, %cst_108 [1] : vector<8x768xf32> to vector<8xf32>
    %158 = vector.shape_cast %157 : vector<8xf32> to vector<8x1xf32>
    %cst_109 = arith.constant 0.001953125 : f32
    %159 = vector.broadcast %cst_109 : f32 to vector<8x1xf32>
    %160 = arith.mulf %155, %159 : vector<8x1xf32>
    %cst_110 = arith.constant 0.001953125 : f32
    %161 = vector.broadcast %cst_110 : f32 to vector<8x1xf32>
    %162 = arith.mulf %158, %161 : vector<8x1xf32>
    %163 = arith.mulf %160, %160 : vector<8x1xf32>
    %164 = arith.subf %162, %163 : vector<8x1xf32>
    %cst_111 = arith.constant 9.99999974E-6 : f32
    %165 = vector.broadcast %cst_111 : f32 to vector<8x1xf32>
    %166 = arith.addf %164, %165 : vector<8x1xf32>
    %167 = math.rsqrt %166 : vector<8x1xf32>
    %168 = arith.mulf %145, %167 : vector<8x1xf32>
    %169 = arith.mulf %160, %168 : vector<8x1xf32>
    %170 = arith.subf %146, %169 : vector<8x1xf32>
    %171 = vector.broadcast %168 : vector<8x1xf32> to vector<8x768xf32>
    %172 = arith.mulf %153, %171 : vector<8x768xf32>
    %173 = vector.broadcast %170 : vector<8x1xf32> to vector<8x768xf32>
    %174 = arith.mulf %173, %0 : vector<8x768xf32>
    %175 = arith.addf %172, %174 : vector<8x768xf32>
    %c1_112 = arith.constant 1 : index
    %c0_113 = arith.constant 0 : index
    %c0_114 = arith.constant 0 : index
    %176 = vector.load %arg5[%c1_112, %c0_113, %c0_114] : memref<2x8x72xf32, #tpu.memory_space<vmem>>, vector<1x8x72xf32>
    %177 = vector.shape_cast %176 : vector<1x8x72xf32> to vector<8x72xf32>
    %178 = vector.extract_strided_slice %144 {offsets = [0, 2], sizes = [8, 1], strides = [1, 1]} : vector<8x6xf32> to vector<8x1xf32>
    %c19_i32_115 = arith.constant 19 : i32
    %179 = tpu.dynamic_rotate %175 by %c19_i32_115 dim 1 : vector<8x768xf32>, i32 -> vector<8x768xf32>
    %c0_116 = arith.constant 0 : index
    %c0_117 = arith.constant 0 : index
    %180 = vector.load %arg10[%c0_116, %c0_117] : memref<72x768xf32, #tpu.memory_space<vmem>>, vector<8x768xf32>
    tpu.vector_store %arg10[%c0_116, %c0_117], %179 {strides = array<i32>} : memref<72x768xf32, #tpu.memory_space<vmem>>, vector<8x768xf32>,
    %c18_i32_118 = arith.constant 18 : i32
    %181 = tpu.dynamic_rotate %175 by %c18_i32_118 dim 1 : vector<8x768xf32>, i32 -> vector<8x768xf32>
    %c8_119 = arith.constant 8 : index
    %c0_120 = arith.constant 0 : index
    %182 = vector.load %arg10[%c8_119, %c0_120] : memref<72x768xf32, #tpu.memory_space<vmem>>, vector<8x768xf32>
    tpu.vector_store %arg10[%c8_119, %c0_120], %181 {strides = array<i32>} : memref<72x768xf32, #tpu.memory_space<vmem>>, vector<8x768xf32>,
    %c17_i32_121 = arith.constant 17 : i32
    %183 = tpu.dynamic_rotate %175 by %c17_i32_121 dim 1 : vector<8x768xf32>, i32 -> vector<8x768xf32>
    %c16_122 = arith.constant 16 : index
    %c0_123 = arith.constant 0 : index
    %184 = vector.load %arg10[%c16_122, %c0_123] : memref<72x768xf32, #tpu.memory_space<vmem>>, vector<8x768xf32>
    tpu.vector_store %arg10[%c16_122, %c0_123], %183 {strides = array<i32>} : memref<72x768xf32, #tpu.memory_space<vmem>>, vector<8x768xf32>,
    %c1_i32_124 = arith.constant 1 : i32
    %185 = tpu.dynamic_rotate %175 by %c1_i32_124 dim 1 : vector<8x768xf32>, i32 -> vector<8x768xf32>
    %c24_125 = arith.constant 24 : index
    %c0_126 = arith.constant 0 : index
    %186 = vector.load %arg10[%c24_125, %c0_126] : memref<72x768xf32, #tpu.memory_space<vmem>>, vector<8x768xf32>
    tpu.vector_store %arg10[%c24_125, %c0_126], %185 {strides = array<i32>} : memref<72x768xf32, #tpu.memory_space<vmem>>, vector<8x768xf32>,
    %c32_127 = arith.constant 32 : index
    %c0_128 = arith.constant 0 : index
    %187 = vector.load %arg10[%c32_127, %c0_128] : memref<72x768xf32, #tpu.memory_space<vmem>>, vector<8x768xf32>
    tpu.vector_store %arg10[%c32_127, %c0_128], %175 {strides = array<i32>} : memref<72x768xf32, #tpu.memory_space<vmem>>, vector<8x768xf32>,
    %c767_i32_129 = arith.constant 767 : i32
    %188 = tpu.dynamic_rotate %175 by %c767_i32_129 dim 1 : vector<8x768xf32>, i32 -> vector<8x768xf32>
    %c40_130 = arith.constant 40 : index
    %c0_131 = arith.constant 0 : index
    %189 = vector.load %arg10[%c40_130, %c0_131] : memref<72x768xf32, #tpu.memory_space<vmem>>, vector<8x768xf32>
    tpu.vector_store %arg10[%c40_130, %c0_131], %188 {strides = array<i32>} : memref<72x768xf32, #tpu.memory_space<vmem>>, vector<8x768xf32>,
    %c751_i32_132 = arith.constant 751 : i32
    %190 = tpu.dynamic_rotate %175 by %c751_i32_132 dim 1 : vector<8x768xf32>, i32 -> vector<8x768xf32>
    %c48_133 = arith.constant 48 : index
    %c0_134 = arith.constant 0 : index
    %191 = vector.load %arg10[%c48_133, %c0_134] : memref<72x768xf32, #tpu.memory_space<vmem>>, vector<8x768xf32>
    tpu.vector_store %arg10[%c48_133, %c0_134], %190 {strides = array<i32>} : memref<72x768xf32, #tpu.memory_space<vmem>>, vector<8x768xf32>,
    %c750_i32_135 = arith.constant 750 : i32
    %192 = tpu.dynamic_rotate %175 by %c750_i32_135 dim 1 : vector<8x768xf32>, i32 -> vector<8x768xf32>
    %c56_136 = arith.constant 56 : index
    %c0_137 = arith.constant 0 : index
    %193 = vector.load %arg10[%c56_136, %c0_137] : memref<72x768xf32, #tpu.memory_space<vmem>>, vector<8x768xf32>
    tpu.vector_store %arg10[%c56_136, %c0_137], %192 {strides = array<i32>} : memref<72x768xf32, #tpu.memory_space<vmem>>, vector<8x768xf32>,
    %c749_i32_138 = arith.constant 749 : i32
    %194 = tpu.dynamic_rotate %175 by %c749_i32_138 dim 1 : vector<8x768xf32>, i32 -> vector<8x768xf32>
    %c64_139 = arith.constant 64 : index
    %c0_140 = arith.constant 0 : index
    %195 = vector.load %arg10[%c64_139, %c0_140] : memref<72x768xf32, #tpu.memory_space<vmem>>, vector<8x768xf32>
    tpu.vector_store %arg10[%c64_139, %c0_140], %194 {strides = array<i32>} : memref<72x768xf32, #tpu.memory_space<vmem>>, vector<8x768xf32>,
    %c0_141 = arith.constant 0 : index
    %c0_142 = arith.constant 0 : index
    %196 = vector.load %arg10[%c0_141, %c0_142] : memref<72x768xf32, #tpu.memory_space<vmem>>, vector<72x768xf32>
    %cst_143 = arith.constant dense<0.000000e+00> : vector<8x768xf32>
    %197 = tpu.matmul %177, %196, %cst_143 {dimension_numbers = #tpu.dot_dimension_numbers<[1], [0], [0], [1], [0, 0, 1, 1], [], []>} : vector<8x72xf32>, vector<72x768xf32>, vector<8x768xf32> -> vector<8x768xf32>
    %198 = vector.broadcast %178 : vector<8x1xf32> to vector<8x768xf32>
    %199 = arith.addf %197, %198 : vector<8x768xf32>
    %c1_144 = arith.constant 1 : index
    %c0_145 = arith.constant 0 : index
    %c0_146 = arith.constant 0 : index
    %200 = vector.load %arg8[%c1_144, %c0_145, %c0_146] : memref<2x8x768xf32, #tpu.memory_space<vmem>>, vector<1x8x768xf32>
    %201 = vector.shape_cast %200 : vector<1x8x768xf32> to vector<8x768xf32>
    %202 = arith.addf %199, %201 : vector<8x768xf32>
    %203 = vector.extract_strided_slice %144 {offsets = [0, 3], sizes = [8, 1], strides = [1, 1]} : vector<8x6xf32> to vector<8x1xf32>
    %204 = vector.extract_strided_slice %144 {offsets = [0, 4], sizes = [8, 1], strides = [1, 1]} : vector<8x6xf32> to vector<8x1xf32>
    %205 = arith.negf %202 : vector<8x768xf32>
    %206 = math.exp %205 : vector<8x768xf32>
    %cst_147 = arith.constant 1.000000e+00 : f32
    %207 = vector.broadcast %cst_147 : f32 to vector<8x768xf32>
    %208 = arith.addf %207, %206 : vector<8x768xf32>
    %209 = arith.divf %207, %208 : vector<8x768xf32>
    %210 = arith.mulf %202, %209 : vector<8x768xf32>
    %211 = arith.mulf %210, %0 : vector<8x768xf32>
    %cst_148 = arith.constant dense<0.000000e+00> : vector<8xf32>
    %212 = vector.multi_reduction <add>, %211, %cst_148 [1] : vector<8x768xf32> to vector<8xf32>
    %213 = vector.shape_cast %212 : vector<8xf32> to vector<8x1xf32>
    %214 = arith.mulf %211, %211 : vector<8x768xf32>
    %cst_149 = arith.constant dense<0.000000e+00> : vector<8xf32>
    %215 = vector.multi_reduction <add>, %214, %cst_149 [1] : vector<8x768xf32> to vector<8xf32>
    %216 = vector.shape_cast %215 : vector<8xf32> to vector<8x1xf32>
    %cst_150 = arith.constant 0.001953125 : f32
    %217 = vector.broadcast %cst_150 : f32 to vector<8x1xf32>
    %218 = arith.mulf %213, %217 : vector<8x1xf32>
    %cst_151 = arith.constant 0.001953125 : f32
    %219 = vector.broadcast %cst_151 : f32 to vector<8x1xf32>
    %220 = arith.mulf %216, %219 : vector<8x1xf32>
    %221 = arith.mulf %218, %218 : vector<8x1xf32>
    %222 = arith.subf %220, %221 : vector<8x1xf32>
    %cst_152 = arith.constant 9.99999974E-6 : f32
    %223 = vector.broadcast %cst_152 : f32 to vector<8x1xf32>
    %224 = arith.addf %222, %223 : vector<8x1xf32>
    %225 = math.rsqrt %224 : vector<8x1xf32>
    %226 = arith.mulf %203, %225 : vector<8x1xf32>
    %227 = arith.mulf %218, %226 : vector<8x1xf32>
    %228 = arith.subf %204, %227 : vector<8x1xf32>
    %229 = vector.broadcast %226 : vector<8x1xf32> to vector<8x768xf32>
    %230 = arith.mulf %211, %229 : vector<8x768xf32>
    %231 = vector.broadcast %228 : vector<8x1xf32> to vector<8x768xf32>
    %232 = arith.mulf %231, %0 : vector<8x768xf32>
    %233 = arith.addf %230, %232 : vector<8x768xf32>
    %c1_153 = arith.constant 1 : index
    %c0_154 = arith.constant 0 : index
    %c0_155 = arith.constant 0 : index
    %234 = vector.load %arg6[%c1_153, %c0_154, %c0_155] : memref<2x8x72xf32, #tpu.memory_space<vmem>>, vector<1x8x72xf32>
    %235 = vector.shape_cast %234 : vector<1x8x72xf32> to vector<8x72xf32>
    %236 = vector.extract_strided_slice %144 {offsets = [0, 5], sizes = [8, 1], strides = [1, 1]} : vector<8x6xf32> to vector<8x1xf32>
    %c19_i32_156 = arith.constant 19 : i32
    %237 = tpu.dynamic_rotate %233 by %c19_i32_156 dim 1 : vector<8x768xf32>, i32 -> vector<8x768xf32>
    %c0_157 = arith.constant 0 : index
    %c0_158 = arith.constant 0 : index
    %238 = vector.load %arg10[%c0_157, %c0_158] : memref<72x768xf32, #tpu.memory_space<vmem>>, vector<8x768xf32>
    tpu.vector_store %arg10[%c0_157, %c0_158], %237 {strides = array<i32>} : memref<72x768xf32, #tpu.memory_space<vmem>>, vector<8x768xf32>,
    %c18_i32_159 = arith.constant 18 : i32
    %239 = tpu.dynamic_rotate %233 by %c18_i32_159 dim 1 : vector<8x768xf32>, i32 -> vector<8x768xf32>
    %c8_160 = arith.constant 8 : index
    %c0_161 = arith.constant 0 : index
    %240 = vector.load %arg10[%c8_160, %c0_161] : memref<72x768xf32, #tpu.memory_space<vmem>>, vector<8x768xf32>
    tpu.vector_store %arg10[%c8_160, %c0_161], %239 {strides = array<i32>} : memref<72x768xf32, #tpu.memory_space<vmem>>, vector<8x768xf32>,
    %c17_i32_162 = arith.constant 17 : i32
    %241 = tpu.dynamic_rotate %233 by %c17_i32_162 dim 1 : vector<8x768xf32>, i32 -> vector<8x768xf32>
    %c16_163 = arith.constant 16 : index
    %c0_164 = arith.constant 0 : index
    %242 = vector.load %arg10[%c16_163, %c0_164] : memref<72x768xf32, #tpu.memory_space<vmem>>, vector<8x768xf32>
    tpu.vector_store %arg10[%c16_163, %c0_164], %241 {strides = array<i32>} : memref<72x768xf32, #tpu.memory_space<vmem>>, vector<8x768xf32>,
    %c1_i32_165 = arith.constant 1 : i32
    %243 = tpu.dynamic_rotate %233 by %c1_i32_165 dim 1 : vector<8x768xf32>, i32 -> vector<8x768xf32>
    %c24_166 = arith.constant 24 : index
    %c0_167 = arith.constant 0 : index
    %244 = vector.load %arg10[%c24_166, %c0_167] : memref<72x768xf32, #tpu.memory_space<vmem>>, vector<8x768xf32>
    tpu.vector_store %arg10[%c24_166, %c0_167], %243 {strides = array<i32>} : memref<72x768xf32, #tpu.memory_space<vmem>>, vector<8x768xf32>,
    %c32_168 = arith.constant 32 : index
    %c0_169 = arith.constant 0 : index
    %245 = vector.load %arg10[%c32_168, %c0_169] : memref<72x768xf32, #tpu.memory_space<vmem>>, vector<8x768xf32>
    tpu.vector_store %arg10[%c32_168, %c0_169], %233 {strides = array<i32>} : memref<72x768xf32, #tpu.memory_space<vmem>>, vector<8x768xf32>,
    %c767_i32_170 = arith.constant 767 : i32
    %246 = tpu.dynamic_rotate %233 by %c767_i32_170 dim 1 : vector<8x768xf32>, i32 -> vector<8x768xf32>
    %c40_171 = arith.constant 40 : index
    %c0_172 = arith.constant 0 : index
    %247 = vector.load %arg10[%c40_171, %c0_172] : memref<72x768xf32, #tpu.memory_space<vmem>>, vector<8x768xf32>
    tpu.vector_store %arg10[%c40_171, %c0_172], %246 {strides = array<i32>} : memref<72x768xf32, #tpu.memory_space<vmem>>, vector<8x768xf32>,
    %c751_i32_173 = arith.constant 751 : i32
    %248 = tpu.dynamic_rotate %233 by %c751_i32_173 dim 1 : vector<8x768xf32>, i32 -> vector<8x768xf32>
    %c48_174 = arith.constant 48 : index
    %c0_175 = arith.constant 0 : index
    %249 = vector.load %arg10[%c48_174, %c0_175] : memref<72x768xf32, #tpu.memory_space<vmem>>, vector<8x768xf32>
    tpu.vector_store %arg10[%c48_174, %c0_175], %248 {strides = array<i32>} : memref<72x768xf32, #tpu.memory_space<vmem>>, vector<8x768xf32>,
    %c750_i32_176 = arith.constant 750 : i32
    %250 = tpu.dynamic_rotate %233 by %c750_i32_176 dim 1 : vector<8x768xf32>, i32 -> vector<8x768xf32>
    %c56_177 = arith.constant 56 : index
    %c0_178 = arith.constant 0 : index
    %251 = vector.load %arg10[%c56_177, %c0_178] : memref<72x768xf32, #tpu.memory_space<vmem>>, vector<8x768xf32>
    tpu.vector_store %arg10[%c56_177, %c0_178], %250 {strides = array<i32>} : memref<72x768xf32, #tpu.memory_space<vmem>>, vector<8x768xf32>,
    %c749_i32_179 = arith.constant 749 : i32
    %252 = tpu.dynamic_rotate %233 by %c749_i32_179 dim 1 : vector<8x768xf32>, i32 -> vector<8x768xf32>
    %c64_180 = arith.constant 64 : index
    %c0_181 = arith.constant 0 : index
    %253 = vector.load %arg10[%c64_180, %c0_181] : memref<72x768xf32, #tpu.memory_space<vmem>>, vector<8x768xf32>
    tpu.vector_store %arg10[%c64_180, %c0_181], %252 {strides = array<i32>} : memref<72x768xf32, #tpu.memory_space<vmem>>, vector<8x768xf32>,
    %c0_182 = arith.constant 0 : index
    %c0_183 = arith.constant 0 : index
    %254 = vector.load %arg10[%c0_182, %c0_183] : memref<72x768xf32, #tpu.memory_space<vmem>>, vector<72x768xf32>
    %cst_184 = arith.constant dense<0.000000e+00> : vector<8x768xf32>
    %255 = tpu.matmul %235, %254, %cst_184 {dimension_numbers = #tpu.dot_dimension_numbers<[1], [0], [0], [1], [0, 0, 1, 1], [], []>} : vector<8x72xf32>, vector<72x768xf32>, vector<8x768xf32> -> vector<8x768xf32>
    %256 = vector.broadcast %236 : vector<8x1xf32> to vector<8x768xf32>
    %257 = arith.addf %255, %256 : vector<8x768xf32>
    %258 = arith.addf %257, %142 : vector<8x768xf32>
    %c0_185 = arith.constant 0 : index
    %c0_186 = arith.constant 0 : index
    %259 = vector.load %arg9[%c0_185, %c0_186] : memref<8x768xf32, #tpu.memory_space<vmem>>, vector<8x768xf32>
    tpu.vector_store %arg9[%c0_185, %c0_186], %258 {strides = array<i32>} : memref<8x768xf32, #tpu.memory_space<vmem>>, vector<8x768xf32>,
    return
  }
}

</mosaic_0001>

<bundles_post_ra>
// kernel: decoder_forward_pallas.1
= control target key start
LH: loop header
LB: loop body
LE: loop exit
PB: predicated region body
PF: predicated region fallthrough
CT: control target
= control target key end

     0   :  { %s3748_s11 = smov 127   ;;  %s3749_s12 = smov 111   ;;  %vm6129_vm8 = vcmask 588800   ;;  %s6119_s1 = inlined_call_operand.vmem [shape: f32[128,768], index: 1, kind: input, shape index: {}]   ;;  %s6120_s0 = inlined_call_operand.vmem [shape: f32[8,128], index: 0, kind: input, shape index: {}]   ;;  %s6121_s4 = inlined_call_operand.vmem [shape: f32[8,1], index: 4, kind: input, shape index: {}]   ;;  %s6122_s3 = inlined_call_operand.vmem [shape: f32[8,72], index: 3, kind: input, shape index: {}]   ;;  %s6123_s2 = inlined_call_operand.vmem [shape: f32[8,768], index: 2, kind: input, shape index: {}]   ;;  %s6124_s7 = inlined_call_operand.vmem [shape: f32[2,8,6], index: 7, kind: input, shape index: {}]   ;;  %s6125_s5 = inlined_call_operand.vmem [shape: f32[2,8,72], index: 5, kind: input, shape index: {}]   ;;  %s6126_s8 = inlined_call_operand.vmem [shape: f32[2,8,768], index: 8, kind: input, shape index: {}]   ;;  %s6127_s6 = inlined_call_operand.vmem [shape: f32[2,8,72], index: 6, kind: input, shape index: {}]   ;;  %s6128_s9 = inlined_call_operand.vmem [shape: f32[8,768], index: 9, kind: output, shape index: {}]  }
   0x1   :  { %v129_v0 = vld [vmem:[%s6119_s1 + $0x2d0] sm:$0xff]  ;;  %v130_v1 = vld [vmem:[%s6119_s1 + $0x2d8] sm:$0xff]  ;;  %v131_v2 = vld [vmem:[%s6119_s1 + $0x2e0] sm:$0xff]  ;;  %s3751_s13 = smov 110   ;;  %s3752_s14 = smov 1  }
   0x2   :  { %135 = vmatpush.msra.mxu0 %v129_v0  ;;  %155 = vmatpush.msra.mxu1 %v130_v1  ;;  %v123_v3 = vld [vmem:[%s6119_s1 + $0x2a0] sm:$0xff]  ;;  %v124_v4 = vld [vmem:[%s6119_s1 + $0x2a8] sm:$0xff]  ;;  %v125_v5 = vld [vmem:[%s6119_s1 + $0x2b0] sm:$0xff]  ;;  %s3753_s15 = smov 17   ;;  %s3754_s16 = smov 19  }
   0x3   :  { %175 = vmatpush.msra.mxu2 %v131_v2  ;;  %v132_v6 = vld [vmem:[%s6119_s1 + $0x2e8] sm:$0xff]  ;;  %v117_v7 = vld [vmem:[%s6119_s1 + $0x270] sm:$0xff]  ;;  %v118_v8 = vld [vmem:[%s6119_s1 + $0x278] sm:$0xff] }
   0x4   :  { %136 = vmatpush.msra.mxu0 %v123_v3  ;;  %156 = vmatpush.msra.mxu1 %v124_v4  ;;  %v119_v9 = vld [vmem:[%s6119_s1 + $0x280] sm:$0xff]  ;;  %v126_v10 = vld [vmem:[%s6119_s1 + $0x2b8] sm:$0xff]  ;;  %v112_v12 = vld [vmem:[%s6119_s1 + $0x248] sm:$0xff] }
   0x5   :  { %176 = vmatpush.msra.mxu2 %v125_v5  ;;  %195 = vmatpush.msra.mxu3 %v132_v6  ;;  %v111_v11 = vld [vmem:[%s6119_s1 + $0x240] sm:$0xff]  ;;  %v113_v13 = vld [vmem:[%s6119_s1 + $0x250] sm:$0xff]  ;;  %v120_v14 = vld [vmem:[%s6119_s1 + $0x288] sm:$0xff] }
   0x6   :  { %137 = vmatpush.msra.mxu0 %v117_v7  ;;  %157 = vmatpush.msra.mxu1 %v118_v8  ;;  %v105_v15 = vld [vmem:[%s6119_s1 + $0x210] sm:$0xff]  ;;  %v106_v16 = vld [vmem:[%s6119_s1 + $0x218] sm:$0xff]  ;;  %v107_v17 = vld [vmem:[%s6119_s1 + $0x220] sm:$0xff] }
   0x7   :  { %177 = vmatpush.msra.mxu2 %v119_v9  ;;  %196 = vmatpush.msra.mxu3 %v126_v10  ;;  %v114_v18 = vld [vmem:[%s6119_s1 + $0x258] sm:$0xff]  ;;  %v99_v19 = vld [vmem:[%s6119_s1 + $0x1e0] sm:$0xff]  ;;  %v100_v20 = vld [vmem:[%s6119_s1 + $0x1e8] sm:$0xff] }
   0x8   :  { %138 = vmatpush.msra.mxu0 %v111_v11  ;;  %158 = vmatpush.msra.mxu1 %v112_v12  ;;  %v101_v21 = vld [vmem:[%s6119_s1 + $0x1f0] sm:$0xff]  ;;  %v108_v22 = vld [vmem:[%s6119_s1 + $0x228] sm:$0xff]  ;;  %v94_v24 = vld [vmem:[%s6119_s1 + $0x1b8] sm:$0xff] }
   0x9   :  { %178 = vmatpush.msra.mxu2 %v113_v13  ;;  %197 = vmatpush.msra.mxu3 %v120_v14  ;;  %v93_v23 = vld [vmem:[%s6119_s1 + $0x1b0] sm:$0xff]  ;;  %v95_v25 = vld [vmem:[%s6119_s1 + $0x1c0] sm:$0xff]  ;;  %v102_v26 = vld [vmem:[%s6119_s1 + $0x1f8] sm:$0xff] }
   0xa   :  { %139 = vmatpush.msra.mxu0 %v105_v15  ;;  %159 = vmatpush.msra.mxu1 %v106_v16  ;;  %v87_v27 = vld [vmem:[%s6119_s1 + $0x180] sm:$0xff]  ;;  %v88_v28 = vld [vmem:[%s6119_s1 + $0x188] sm:$0xff]  ;;  %v89_v29 = vld [vmem:[%s6119_s1 + $0x190] sm:$0xff] }
   0xb   :  { %179 = vmatpush.msra.mxu2 %v107_v17  ;;  %198 = vmatpush.msra.mxu3 %v114_v18  ;;  %v96_v30 = vld [vmem:[%s6119_s1 + $0x1c8] sm:$0xff]  ;;  %v81_v31 = vld [vmem:[%s6119_s1 + $0x150] sm:$0xff]  ;;  %v82_v32 = vld [vmem:[%s6119_s1 + $0x158] sm:$0xff] }
   0xc   :  { %140 = vmatpush.msra.mxu0 %v99_v19  ;;  %160 = vmatpush.msra.mxu1 %v100_v20  ;;  %v83_v33 = vld [vmem:[%s6119_s1 + $0x160] sm:$0xff]  ;;  %v90_v34 = vld [vmem:[%s6119_s1 + $0x198] sm:$0xff]  ;;  %v76_v36 = vld [vmem:[%s6119_s1 + $0x128] sm:$0xff] }
   0xd   :  { %180 = vmatpush.msra.mxu2 %v101_v21  ;;  %199 = vmatpush.msra.mxu3 %v108_v22  ;;  %v75_v35 = vld [vmem:[%s6119_s1 + $0x120] sm:$0xff]  ;;  %v77_v37 = vld [vmem:[%s6119_s1 + $0x130] sm:$0xff]  ;;  %v84_v38 = vld [vmem:[%s6119_s1 + $0x168] sm:$0xff] }
   0xe   :  { %141 = vmatpush.msra.mxu0 %v93_v23  ;;  %161 = vmatpush.msra.mxu1 %v94_v24  ;;  %v69_v39 = vld [vmem:[%s6119_s1 + $0xf0] sm:$0xff]  ;;  %v70_v40 = vld [vmem:[%s6119_s1 + $0xf8] sm:$0xff]  ;;  %v71_v41 = vld [vmem:[%s6119_s1 + $0x100] sm:$0xff] }
   0xf   :  { %181 = vmatpush.msra.mxu2 %v95_v25  ;;  %200 = vmatpush.msra.mxu3 %v102_v26  ;;  %v78_v42 = vld [vmem:[%s6119_s1 + $0x138] sm:$0xff]  ;;  %v63_v43 = vld [vmem:[%s6119_s1 + $0xc0] sm:$0xff]  ;;  %v64_v44 = vld [vmem:[%s6119_s1 + $0xc8] sm:$0xff] }
  0x10   :  { %142 = vmatpush.msra.mxu0 %v87_v27  ;;  %162 = vmatpush.msra.mxu1 %v88_v28  ;;  %v65_v45 = vld [vmem:[%s6119_s1 + $0xd0] sm:$0xff]  ;;  %v72_v46 = vld [vmem:[%s6119_s1 + $0x108] sm:$0xff]  ;;  %v58_v48 = vld [vmem:[%s6119_s1 + $0x98] sm:$0xff] }
  0x11   :  { %182 = vmatpush.msra.mxu2 %v89_v29  ;;  %201 = vmatpush.msra.mxu3 %v96_v30  ;;  %v57_v47 = vld [vmem:[%s6119_s1 + $0x90] sm:$0xff]  ;;  %v59_v49 = vld [vmem:[%s6119_s1 + $0xa0] sm:$0xff]  ;;  %v66_v50 = vld [vmem:[%s6119_s1 + $0xd8] sm:$0xff] }
  0x12   :  { %143 = vmatpush.msra.mxu0 %v81_v31  ;;  %163 = vmatpush.msra.mxu1 %v82_v32  ;;  %v51_v51 = vld [vmem:[%s6119_s1 + $0x60] sm:$0xff]  ;;  %v52_v52 = vld [vmem:[%s6119_s1 + $0x68] sm:$0xff]  ;;  %v53_v53 = vld [vmem:[%s6119_s1 + $0x70] sm:$0xff] }
  0x13   :  { %183 = vmatpush.msra.mxu2 %v83_v33  ;;  %202 = vmatpush.msra.mxu3 %v90_v34  ;;  %v60_v54 = vld [vmem:[%s6119_s1 + $0xa8] sm:$0xff]  ;;  %v45_v55 = vld [vmem:[%s6119_s1 + $0x30] sm:$0xff]  ;;  %v46_v56 = vld [vmem:[%s6119_s1 + $0x38] sm:$0xff] }
  0x14   :  { %144 = vmatpush.msra.mxu0 %v75_v35  ;;  %164 = vmatpush.msra.mxu1 %v76_v36  ;;  %v47_v57 = vld [vmem:[%s6119_s1 + $0x40] sm:$0xff]  ;;  %v54_v58 = vld [vmem:[%s6119_s1 + $0x78] sm:$0xff]  ;;  %v40_v60 = vld [vmem:[%s6119_s1 + $0x8] sm:$0xff] }
  0x15   :  { %184 = vmatpush.msra.mxu2 %v77_v37  ;;  %203 = vmatpush.msra.mxu3 %v84_v38  ;;  %v39_v59 = vld [vmem:[%s6119_s1] sm:$0xff]  ;;  %v41_v61 = vld [vmem:[%s6119_s1 + $0x10] sm:$0xff]  ;;  %v48_v62 = vld [vmem:[%s6119_s1 + $0x48] sm:$0xff] }
  0x16   :  { %145 = vmatpush.msra.mxu0 %v69_v39  ;;  %165 = vmatpush.msra.mxu1 %v70_v40  ;;  %v4004_v63 = vld [vmem:[%s6120_s0] sm:$0xff]  ;;  %v134_v0 = vld [vmem:[%s6119_s1 + $0x2f8] sm:$0xff]  ;;  %v133_v2 = vld [vmem:[%s6119_s1 + $0x2f0] sm:$0xff]  ;;  %s3755_s0 = smov 18  }
  0x17   :  { %185 = vmatpush.msra.mxu2 %v71_v41  ;;  %204 = vmatpush.msra.mxu3 %v78_v42  ;;  %v42_v1 = vld [vmem:[%s6119_s1 + $0x18] sm:$0xff]  ;;  %v128_v3 = vld [vmem:[%s6119_s1 + $0x2c8] sm:$0xff]  ;;  %v127_v4 = vld [vmem:[%s6119_s1 + $0x2c0] sm:$0xff] }
  0x18   :  { %146 = vmatpush.msra.mxu0 %v63_v43  ;;  %166 = vmatpush.msra.mxu1 %v64_v44  ;;  %v122_v5 = vld [vmem:[%s6119_s1 + $0x298] sm:$0xff]  ;;  %v121_v6 = vld [vmem:[%s6119_s1 + $0x290] sm:$0xff]  ;;  %v116_v7 = vld [vmem:[%s6119_s1 + $0x268] sm:$0xff] }
  0x19   :  { %186 = vmatpush.msra.mxu2 %v65_v45  ;;  %205 = vmatpush.msra.mxu3 %v72_v46  ;;  %v115_v8 = vld [vmem:[%s6119_s1 + $0x260] sm:$0xff]  ;;  %v110_v9 = vld [vmem:[%s6119_s1 + $0x238] sm:$0xff]  ;;  %v109_v10 = vld [vmem:[%s6119_s1 + $0x230] sm:$0xff] }
  0x1a   :  { %147 = vmatpush.msra.mxu0 %v57_v47  ;;  %167 = vmatpush.msra.mxu1 %v58_v48  ;;  %v104_v11 = vld [vmem:[%s6119_s1 + $0x208] sm:$0xff]  ;;  %v103_v12 = vld [vmem:[%s6119_s1 + $0x200] sm:$0xff]  ;;  %v98_v13 = vld [vmem:[%s6119_s1 + $0x1d8] sm:$0xff]  ;;  %v269_v47 = vlaneseq }
  0x1b   :  { %187 = vmatpush.msra.mxu2 %v59_v49  ;;  %206 = vmatpush.msra.mxu3 %v66_v50  ;;  %v97_v14 = vld [vmem:[%s6119_s1 + $0x1d0] sm:$0xff]  ;;  %v92_v15 = vld [vmem:[%s6119_s1 + $0x1a8] sm:$0xff]  ;;  %v91_v16 = vld [vmem:[%s6119_s1 + $0x1a0] sm:$0xff] }
  0x1c   :  { %148 = vmatpush.msra.mxu0 %v51_v51  ;;  %168 = vmatpush.msra.mxu1 %v52_v52  ;;  %v86_v17 = vld [vmem:[%s6119_s1 + $0x178] sm:$0xff]  ;;  %v85_v18 = vld [vmem:[%s6119_s1 + $0x170] sm:$0xff]  ;;  %v80_v19 = vld [vmem:[%s6119_s1 + $0x148] sm:$0xff]  ;;  %v4178_v48 = vand.u32 127, %v269_v47 }
  0x1d   :  { %188 = vmatpush.msra.mxu2 %v53_v53  ;;  %207 = vmatpush.msra.mxu3 %v60_v54  ;;  %v79_v20 = vld [vmem:[%s6119_s1 + $0x140] sm:$0xff]  ;;  %v74_v21 = vld [vmem:[%s6119_s1 + $0x118] sm:$0xff]  ;;  %v73_v22 = vld [vmem:[%s6119_s1 + $0x110] sm:$0xff] }
  0x1e   :  { %149 = vmatpush.msra.mxu0 %v45_v55  ;;  %169 = vmatpush.msra.mxu1 %v46_v56  ;;  %v68_v23 = vld [vmem:[%s6119_s1 + $0xe8] sm:$0xff]  ;;  %v67_v24 = vld [vmem:[%s6119_s1 + $0xe0] sm:$0xff]  ;;  %v62_v25 = vld [vmem:[%s6119_s1 + $0xb8] sm:$0xff]  ;;  %vm452_vm0 = vcmp.lt.s32.totalorder %v4178_v48, 109  ;;  %vm427_vm1 = vcmp.lt.s32.totalorder %v4178_v48, 110  ;;  %vm402_vm2 = vcmp.lt.s32.totalorder %v4178_v48, 111 }
  0x1f   :  { %189 = vmatpush.msra.mxu2 %v47_v57  ;;  %208 = vmatpush.msra.mxu3 %v54_v58  ;;  %v61_v26 = vld [vmem:[%s6119_s1 + $0xb0] sm:$0xff]  ;;  %v56_v27 = vld [vmem:[%s6119_s1 + $0x88] sm:$0xff]  ;;  %v55_v28 = vld [vmem:[%s6119_s1 + $0x80] sm:$0xff]  ;;  %vm377_vm3 = vcmp.lt.s32.totalorder %v4178_v48, 127  ;;  %vm346_vm4 = vcmp.lt.s32.totalorder %v4178_v48, 1  ;;  %vm6132_vm5 = vcmp.lt.s32.totalorder %v4178_v48, 17 }
  0x20   :  { %150 = vmatpush.msra.mxu0 %v39_v59  ;;  %170 = vmatpush.msra.mxu1 %v40_v60  ;;  %v50_v29 = vld [vmem:[%s6119_s1 + $0x58] sm:$0xff]  ;;  %v49_v30 = vld [vmem:[%s6119_s1 + $0x50] sm:$0xff]  ;;  %v44_v31 = vld [vmem:[%s6119_s1 + $0x28] sm:$0xff]  ;;  %vm6131_vm6 = vcmp.lt.s32.totalorder %v4178_v48, 18  ;;  %vm6130_vm7 = vcmp.lt.s32.totalorder %v4178_v48, 19 }
  0x21   :  { %190 = vmatpush.msra.mxu2 %v41_v61  ;;  %209 = vmatpush.msra.mxu3 %v48_v62  ;;  %v43_v32 = vld [vmem:[%s6119_s1 + $0x20] sm:$0xff]  ;;  %s3750_s1 = smov 109  }
  0x22   :  { %151 = vmatmul.f32.vlgmr.msra.gmra.mxu0 %v4004_v63  ;;  %171 = vmatmul.f32.vlgmr.msra.gmra.mxu1 %v4004_v63 }
  0x23   :  { %191 = vmatmul.f32.vlgmr.msra.gmra.mxu2 %v4004_v63  ;;  %235 = vmatpush.msrb.mxu1 %v134_v0 }
  0x24   :  { %210 = vmatpush.msra.mxu3 %v42_v1  ;;  %215 = vmatpush.msrb.mxu0 %v133_v2 }
  0x25   :  { %211 = vmatmul.f32.vlgmr.msra.gmra.mxu3 %v4004_v63  ;;  %236 = vmatpush.msrb.mxu1 %v128_v3 }
  0x26   :  { %216 = vmatpush.msrb.mxu0 %v127_v4 }
  0x27   :  { %237 = vmatpush.msrb.mxu1 %v122_v5 }
  0x28   :  { %217 = vmatpush.msrb.mxu0 %v121_v6 }
  0x29   :  { %238 = vmatpush.msrb.mxu1 %v116_v7 }
  0x2a   :  { %218 = vmatpush.msrb.mxu0 %v115_v8 }
  0x2b   :  { %239 = vmatpush.msrb.mxu1 %v110_v9 }
  0x2c   :  { %219 = vmatpush.msrb.mxu0 %v109_v10 }
  0x2d   :  { %240 = vmatpush.msrb.mxu1 %v104_v11 }
  0x2e   :  { %220 = vmatpush.msrb.mxu0 %v103_v12 }
  0x2f   :  { %241 = vmatpush.msrb.mxu1 %v98_v13 }
  0x30   :  { %221 = vmatpush.msrb.mxu0 %v97_v14 }
  0x31   :  { %242 = vmatpush.msrb.mxu1 %v92_v15 }
  0x32   :  { %222 = vmatpush.msrb.mxu0 %v91_v16 }
  0x33   :  { %243 = vmatpush.msrb.mxu1 %v86_v17 }
  0x34   :  { %223 = vmatpush.msrb.mxu0 %v85_v18 }
  0x35   :  { %244 = vmatpush.msrb.mxu1 %v80_v19 }
  0x36   :  { %224 = vmatpush.msrb.mxu0 %v79_v20 }
  0x37   :  { %245 = vmatpush.msrb.mxu1 %v74_v21 }
  0x38   :  { %225 = vmatpush.msrb.mxu0 %v73_v22 }
  0x39   :  { %246 = vmatpush.msrb.mxu1 %v68_v23 }
  0x3a   :  { %226 = vmatpush.msrb.mxu0 %v67_v24 }
  0x3b   :  { %247 = vmatpush.msrb.mxu1 %v62_v25 }
  0x3c   :  { %227 = vmatpush.msrb.mxu0 %v61_v26 }
  0x3d   :  { %248 = vmatpush.msrb.mxu1 %v56_v27 }
  0x3e   :  { %228 = vmatpush.msrb.mxu0 %v55_v28 }
  0x3f   :  { %249 = vmatpush.msrb.mxu1 %v50_v29 }
  0x40   :  { %229 = vmatpush.msrb.mxu0 %v49_v30 }
  0x41   :  { %250 = vmatpush.msrb.mxu1 %v44_v31 }
  0x42   :  { %230 = vmatpush.msrb.mxu0 %v43_v32  ;;  %251 = vmatmul.f32.vlgmr.msrb.gmra.mxu1 %v4004_v63 }
  0x43   :  { %231 = vmatmul.f32.vlgmr.msrb.gmra.mxu0 %v4004_v63 }
  0x9f   :  { %v4111_v33 = vpop.f32.mrf.mxu0  ;;  %v4113_v34 = vpop.f32.mrf.mxu1 }
  0xa0   :  { %v3098_v35 = vpack.i.bf16 %v4113_v34, %v4111_v33 }
  0xa2   :  { %3099 = vrot.lane.b32.xlu2 %v3098_v35, %s3748_s11  ;;  %3094 = vrot.lane.b32.xlu1 %v3098_v35, %s3749_s12 }
  0xa3   :  { %3084 = vrot.lane.b32.xlu0 %v3098_v35, %s3750_s1 }
  0xa6   :  { %v4120_v36 = vpop.f32.mrf.mxu2 }
  0xa7   :  { %v3123_v39 = vpack.i.bf16 %v4120_v36, %v4113_v34 }
  0xa8   :  { %v4122_v37 = vpop.f32.mrf.mxu3 }
  0xa9   :  { %v3108_v38 = vpack.i.bf16 %v4122_v37, %v4120_v36 }
  0xab   :  { %3109 = vrot.lane.b32.xlu2 %v3108_v38, %s3751_s13  ;;  %3104 = vrot.lane.b32.xlu1 %v3108_v38, %s3750_s1 }
  0xac   :  { %3089 = vrot.lane.b32.xlu0 %v3098_v35, %s3751_s13 }
  0xb3   :  { %3124 = vrot.lane.b32.xlu2 %v3123_v39, %s3752_s14  ;;  %3119 = vrot.lane.b32.xlu1 %v3108_v38, %s3748_s11 }
  0xb4   :  { %3114 = vrot.lane.b32.xlu0 %v3108_v38, %s3749_s12 }
  0xbb   :  { %3129 = vrot.lane.b32.xlu2 %v3123_v39, %s3753_s15  ;;  %3139 = vrot.lane.b32.xlu1 %v3123_v39, %s3754_s16 }
  0xbc   :  { %315 = vrot.lane.b32.xlu0 %v4122_v37, %s3753_s15 }
  0xbf   :  { %v4138_v40 = vpop.f32.mrf.mxu1 }
  0xc0   :  { %v4140_v41 = vpop.f32.mrf.mxu0  ;;  %v3153_v42 = vpack.i.bf16 %v4138_v40, %v4111_v33 }
  0xc1   :  { %v3148_v43 = vpack.i.bf16 %v4138_v40, %v4140_v41 }
  0xc3   :  { %3134 = vrot.lane.b32.xlu2 %v3123_v39, %s3755_s0  ;;  %3154 = vrot.lane.b32.xlu1 %v3153_v42, %s3753_s15 }
  0xc4   :  { %3149 = vrot.lane.b32.xlu0 %v3148_v43, %s3750_s1 }
  0xcb   :  { %3144 = vrot.lane.b32.xlu2 %v3153_v42, %s3752_s14  ;;  %3164 = vrot.lane.b32.xlu1 %v3153_v42, %s3755_s0 }
  0xcc   :  { %3159 = vrot.lane.b32.xlu0 %v3148_v43, %s3751_s13 }
  0xd3   :  { %340 = vrot.lane.b32.xlu2 %v4122_v37, %s3752_s14  ;;  %3174 = vrot.lane.b32.xlu1 %v3153_v42, %s3754_s16 }
  0xd4   :  { %3169 = vrot.lane.b32.xlu0 %v3148_v43, %s3749_s12 }
  0xdb   :  { %375 = vrot.lane.b32.xlu2 %v4138_v40, %s3748_s11  ;;  %290 = vrot.lane.b32.xlu1 %v4122_v37, %s3755_s0 }
  0xdc   :  { %373 = vrot.lane.b32.xlu0 %v4140_v41, %s3748_s11 }
  0xe3   :  { %317 = vrot.lane.b32.xlu2 %v4140_v41, %s3753_s15  ;;  %342 = vrot.lane.b32.xlu1 %v4140_v41, %s3752_s14 }
  0xe4   :  { %263 = vrot.lane.b32.xlu0 %v4122_v37, %s3754_s16 }
  0xeb   :  { %265 = vrot.lane.b32.xlu1 %v4140_v41, %s3754_s16 }
  0xec   :  { %292 = vrot.lane.b32.xlu0 %v4140_v41, %s3755_s0 }
  0xfc   :  { %v4172_v44 = vpop.permute.xlu2 %3099 }
  0xfd   :  { %v3102_v1 = vunpack.i.h.bf16 %v4172_v44  ;;  %v3101_v2 = vunpack.i.l.bf16 %v4172_v44 }
  0xff   :  { %v382_v8 = vsel %vm377_vm3, %v3101_v2, %v3102_v1 }
 0x105   :  { %v4174_v45 = vpop.permute.xlu2 %3109 }
 0x106   :  { %v3111_v63 = vunpack.i.l.bf16 %v4174_v45 }
 0x10d   :  { %v4176_v46 = vpop.permute.xlu2 %3124 }
 0x10e   :  { %v3126_v17 = vunpack.i.l.bf16 %v4176_v46 }
 0x114   :  { %v4180_v49 = vpop.permute.xlu1 %3094 }
 0x115   :  { %v4182_v50 = vpop.permute.xlu2 %3129  ;;  %v4184_v51 = vpop.permute.xlu0 %3084  ;;  %v3097_v59 = vunpack.i.h.bf16 %v4180_v49  ;;  %v3096_v60 = vunpack.i.l.bf16 %v4180_v49 }
 0x116   :  { %v3087_v52 = vunpack.i.h.bf16 %v4184_v51  ;;  %v3086_v53 = vunpack.i.l.bf16 %v4184_v51  ;;  %v3131_v22 = vunpack.i.l.bf16 %v4182_v50 }
 0x117   :  { %v407_v5 = vsel %vm402_vm2, %v3096_v60, %v3097_v59 }
 0x118   :  { %v457_v54 = vsel %vm452_vm0, %v3086_v53, %v3087_v52 }
 0x119   :  { %535 = vmatpush.msrb.mxu2 %v457_v54  ;;  %v256_v54 = vld [vmem:[%s6121_s4] sm:$0xff] }
 0x11d   :  { %v4191_v55 = vpop.permute.xlu2 %3134  ;;  %v4193_v56 = vpop.permute.xlu1 %3104 }
 0x11e   :  { %v3106_v57 = vunpack.i.l.bf16 %v4193_v56  ;;  %v4196_v58 = vpop.permute.xlu0 %3089 }
 0x11f   :  { %v3092_v61 = vunpack.i.h.bf16 %v4196_v58  ;;  %v3091_v62 = vunpack.i.l.bf16 %v4196_v58 }
 0x120   :  { %v456_v0 = vsel %vm452_vm0, %v3087_v52, %v3106_v57 }
 0x121   :  { %v432_v3 = vsel %vm427_vm1, %v3091_v62, %v3092_v61  ;;  %555 = vmatpush.msrb.mxu3 %v456_v0  ;;  %v431_v4 = vsel %vm427_vm1, %v3092_v61, %v3111_v63 }
 0x122   :  { %536 = vmatpush.msrb.mxu2 %v432_v3 }
 0x123   :  { %556 = vmatpush.msrb.mxu3 %v431_v4 }
 0x124   :  { %537 = vmatpush.msrb.mxu2 %v407_v5 }
 0x125   :  { %v4224_v6 = vpop.permute.xlu2 %3144  ;;  %v4226_v7 = vpop.permute.xlu1 %3119 }
 0x126   :  { %v3147_v9 = vunpack.i.h.bf16 %v4224_v6  ;;  %v3146_v10 = vunpack.i.l.bf16 %v4224_v6  ;;  %v4234_v11 = vpop.permute.xlu0 %3114  ;;  %538 = vmatpush.msrb.mxu2 %v382_v8  ;;  %v3121_v12 = vunpack.i.l.bf16 %v4226_v7 }
 0x127   :  { %v3116_v13 = vunpack.i.l.bf16 %v4234_v11 }
 0x128   :  { %539 = vmatpush.msrb.mxu2 %v4111_v33  ;;  %v352_v14 = vsel %vm346_vm4, %v3147_v9, %v3146_v10  ;;  %v381_v16 = vsel %vm377_vm3, %v3102_v1, %v3121_v12  ;;  %v351_v20 = vsel %vm346_vm4, %v3146_v10, %v3126_v17  ;;  %v3136_v33 = vunpack.i.l.bf16 %v4191_v55 }
 0x129   :  { %v406_v15 = vsel %vm402_vm2, %v3097_v59, %v3116_v13  ;;  %v3756_v59 = vmov 0  }
 0x12a   :  { %540 = vmatpush.msrb.mxu2 %v352_v14  ;;  %557 = vmatpush.msrb.mxu3 %v406_v15  ;;  %v4324_v14 = vld [vmem:[%s6122_s3] sm:$0xff]  ;;  %v3112_v15 = vunpack.i.h.bf16 %v4174_v45 }
 0x12b   :  { %3178 = vset.pattern.permute.xlu2 %v3756_v59 }
 0x12c   :  { %558 = vmatpush.msrb.mxu3 %v381_v16  ;;  %521 = vperm.xlu2 %3178, %v256_v54  }
 0x12d   :  { %v4253_v18 = vpop.permute.xlu1 %3139  ;;  %v4285_v39 = vpop.permute.xlu2 %340 }
 0x12e   :  { %v4255_v19 = vpop.permute.xlu0 %315  ;;  %559 = vmatpush.msrb.mxu3 %v4113_v34  ;;  %v3141_v0 = vunpack.i.l.bf16 %v4253_v18 }
 0x130   :  { %560 = vmatpush.msrb.mxu3 %v351_v20 }
 0x135   :  { %v4262_v21 = vpop.permute.xlu1 %3154  ;;  %v376_v16 = vpop.permute.xlu2 %375 }
 0x136   :  { %v3157_v23 = vunpack.i.h.bf16 %v4262_v21  ;;  %v3156_v24 = vunpack.i.l.bf16 %v4262_v21  ;;  %v3150_v25 = vpop.permute.xlu0 %3149 }
 0x137   :  { %v3152_v26 = vunpack.i.h.bf16 %v3150_v25  ;;  %v3151_v27 = vunpack.i.l.bf16 %v3150_v25  ;;  %v3117_v25 = vunpack.i.h.bf16 %v4234_v11  ;;  %v3132_v11 = vunpack.i.h.bf16 %v4182_v50 }
 0x138   :  { %v327_v28 = vsel %vm6132_vm5, %v3157_v23, %v3156_v24  ;;  %v326_v29 = vsel %vm6132_vm5, %v3156_v24, %v3131_v22 }
 0x139   :  { %541 = vmatpush.msrb.mxu2 %v327_v28  ;;  %561 = vmatpush.msrb.mxu3 %v326_v29  ;;  %v453_v30 = vsel %vm452_vm0, %v3151_v27, %v3152_v26  ;;  %v458_v31 = vsel %vm452_vm0, %v3152_v26, %v3086_v53  ;;  %v3122_v28 = vunpack.i.h.bf16 %v4226_v7  ;;  %v405_v44 = vsel %vm402_vm2, %v3116_v13, %v3117_v25 }
 0x13a   :  { %615 = vmatpush.msra.mxu0 %v453_v30  ;;  %635 = vmatpush.msra.mxu1 %v458_v31  ;;  %v3127_v30 = vunpack.i.h.bf16 %v4176_v46  ;;  %v3137_v13 = vunpack.i.h.bf16 %v4191_v55  ;;  %v3142_v46 = vunpack.i.h.bf16 %v4253_v18 }
 0x13c   :  { %v350_v7 = vsel %vm346_vm4, %v3126_v17, %v3127_v30  ;;  %v325_v17 = vsel %vm6132_vm5, %v3131_v22, %v3132_v11 }
 0x13d   :  { %v4280_v32 = vpop.permute.xlu1 %3164  ;;  %v318_v31 = vpop.permute.xlu2 %317 }
 0x13e   :  { %v3167_v34 = vunpack.i.h.bf16 %v4280_v32  ;;  %v3166_v35 = vunpack.i.l.bf16 %v4280_v32  ;;  %v3160_v38 = vpop.permute.xlu0 %3159  ;;  %v323_v6 = vsel %vm6132_vm5, %v4255_v19, %v318_v31  ;;  %v322_v50 = vsel %vm6132_vm5, %v318_v31, %v3157_v23 }
 0x13f   :  { %v3162_v42 = vunpack.i.h.bf16 %v3160_v38  ;;  %v3161_v43 = vunpack.i.l.bf16 %v3160_v38  ;;  %v324_v38 = vsel %vm6132_vm5, %v3132_v11, %v4255_v19  ;;  %v275_v19 = vsel %vm6130_vm7, %v3141_v0, %v3142_v46 }
 0x140   :  { %v302_v47 = vsel %vm6131_vm6, %v3167_v34, %v3166_v35  ;;  %v301_v51 = vsel %vm6131_vm6, %v3166_v35, %v3136_v33 }
 0x141   :  { %542 = vmatpush.msrb.mxu2 %v302_v47  ;;  %562 = vmatpush.msrb.mxu3 %v301_v51  ;;  %v428_v52 = vsel %vm427_vm1, %v3161_v43, %v3162_v42  ;;  %v433_v53 = vsel %vm427_vm1, %v3162_v42, %v3091_v62  ;;  %v3107_v62 = vunpack.i.h.bf16 %v4193_v56  ;;  %v430_v56 = vsel %vm427_vm1, %v3111_v63, %v3112_v15 }
 0x142   :  { %616 = vmatpush.msra.mxu0 %v428_v52  ;;  %636 = vmatpush.msra.mxu1 %v433_v53 }
 0x143   :  { %v455_v26 = vsel %vm452_vm0, %v3106_v57, %v3107_v62  ;;  %v454_v49 = vsel %vm452_vm0, %v3107_v62, %v3151_v27  ;;  %v429_v57 = vsel %vm427_vm1, %v3112_v15, %v3161_v43 }
 0x145   :  { %v4306_v61 = vpop.permute.xlu1 %3174 }
 0x146   :  { %v3177_v1 = vunpack.i.h.bf16 %v4306_v61  ;;  %v3176_v58 = vunpack.i.l.bf16 %v4306_v61  ;;  %v3170_v3 = vpop.permute.xlu0 %3169 }
 0x147   :  { %v3172_v4 = vunpack.i.h.bf16 %v3170_v3  ;;  %v3171_v5 = vunpack.i.l.bf16 %v3170_v3 }
 0x148   :  { %v277_v8 = vsel %vm6130_vm7, %v3177_v1, %v3176_v58  ;;  %v276_v10 = vsel %vm6130_vm7, %v3176_v58, %v3141_v0 }
 0x149   :  { %543 = vmatpush.msrb.mxu2 %v277_v8  ;;  %563 = vmatpush.msrb.mxu3 %v276_v10  ;;  %v403_v20 = vsel %vm402_vm2, %v3171_v5, %v3172_v4  ;;  %v408_v24 = vsel %vm402_vm2, %v3172_v4, %v3096_v60  ;;  %v383_v60 = vsel %vm377_vm3, %v376_v16, %v3101_v2 }
 0x14a   :  { %617 = vmatpush.msra.mxu0 %v403_v20  ;;  %637 = vmatpush.msra.mxu1 %v408_v24  ;;  %v404_v45 = vsel %vm402_vm2, %v3117_v25, %v3171_v5 }
 0x14b   :  { %3006 = vmatmul.msk.f32.vlgmr.msrb.gmra.mxu2 %vm6129_vm8, %v4324_v14  ;;  %3007 = vmatmul.msk.f32.vlgmr.msrb.gmra.mxu3 %vm6129_vm8, %v4324_v14 }
 0x14c   :  { %575 = vmatpush.msra.mxu2 %v455_v26  ;;  %595 = vmatpush.msra.mxu3 %v454_v49 }
 0x14d   :  { %638 = vmatpush.msra.mxu1 %v383_v60  ;;  %v291_v29 = vpop.permute.xlu1 %290 }
 0x14e   :  { %576 = vmatpush.msra.mxu2 %v430_v56  ;;  %596 = vmatpush.msra.mxu3 %v429_v57  ;;  %v374_v27 = vpop.permute.xlu0 %373  ;;  %v299_v22 = vsel %vm6131_vm6, %v3137_v13, %v291_v29 }
 0x14f   :  { %639 = vmatpush.msra.mxu1 %v4138_v40  ;;  %v378_v63 = vsel %vm377_vm3, %v374_v27, %v376_v16  ;;  %v379_v2 = vsel %vm377_vm3, %v3122_v28, %v374_v27  ;;  %v380_v40 = vsel %vm377_vm3, %v3121_v12, %v3122_v28  ;;  %v349_v12 = vsel %vm346_vm4, %v3127_v30, %v4285_v39 }
 0x150   :  { %577 = vmatpush.msra.mxu2 %v405_v44  ;;  %597 = vmatpush.msra.mxu3 %v404_v45 }
 0x151   :  { %618 = vmatpush.msra.mxu0 %v378_v63 }
 0x152   :  { %578 = vmatpush.msra.mxu2 %v380_v40  ;;  %598 = vmatpush.msra.mxu3 %v379_v2 }
 0x153   :  { %619 = vmatpush.msra.mxu0 %v4140_v41 }
 0x154   :  { %579 = vmatpush.msra.mxu2 %v4120_v36  ;;  %599 = vmatpush.msra.mxu3 %v4122_v37 }
 0x155   :  { %v343_v35 = vpop.permute.xlu1 %342 }
 0x156   :  { %580 = vmatpush.msra.mxu2 %v350_v7  ;;  %600 = vmatpush.msra.mxu3 %v349_v12  ;;  %v264_v41 = vpop.permute.xlu0 %263  ;;  %v348_v36 = vsel %vm346_vm4, %v4285_v39, %v343_v35  ;;  %v347_v37 = vsel %vm346_vm4, %v343_v35, %v3147_v9  ;;  %v300_v9 = vsel %vm6131_vm6, %v3136_v33, %v3137_v13 }
 0x157   :  { %620 = vmatpush.msra.mxu0 %v348_v36  ;;  %640 = vmatpush.msra.mxu1 %v347_v37  ;;  %v274_v21 = vsel %vm6130_vm7, %v3142_v46, %v264_v41 }
 0x158   :  { %581 = vmatpush.msra.mxu2 %v325_v17  ;;  %601 = vmatpush.msra.mxu3 %v324_v38 }
 0x159   :  { %621 = vmatpush.msra.mxu0 %v323_v6  ;;  %641 = vmatpush.msra.mxu1 %v322_v50 }
 0x15a   :  { %582 = vmatpush.msra.mxu2 %v300_v9  ;;  %602 = vmatpush.msra.mxu3 %v299_v22 }
 0x15c   :  { %583 = vmatpush.msra.mxu2 %v275_v19  ;;  %603 = vmatpush.msra.mxu3 %v274_v21 }
 0x15d   :  { %3008 = vmatmul.msk.f32.vlgmr.msra.gmra.mxu2 %vm6129_vm8, %v4324_v14  ;;  %3009 = vmatmul.msk.f32.vlgmr.msra.gmra.mxu3 %vm6129_vm8, %v4324_v14  ;;  %v266_v55 = vpop.permute.xlu1 %265 }
 0x15e   :  { %v293_v23 = vpop.permute.xlu0 %292  ;;  %v273_v39 = vsel %vm6130_vm7, %v264_v41, %v266_v55  ;;  %v272_v42 = vsel %vm6130_vm7, %v266_v55, %v3177_v1 }
 0x15f   :  { %v298_v33 = vsel %vm6131_vm6, %v291_v29, %v293_v23  ;;  %v297_v18 = vsel %vm6131_vm6, %v293_v23, %v3167_v34 }
 0x160   :  { %622 = vmatpush.msra.mxu0 %v298_v33  ;;  %642 = vmatpush.msra.mxu1 %v297_v18  ;;  %v4470_v18 = vld [vmem:[%s6123_s2] sm:$0xff] }
 0x162   :  { %623 = vmatpush.msra.mxu0 %v273_v39  ;;  %643 = vmatpush.msra.mxu1 %v272_v42 }
 0x163   :  { %3010 = vmatmul.msk.f32.vlgmr.msra.gmra.mxu0 %vm6129_vm8, %v4324_v14  ;;  %3011 = vmatmul.msk.f32.vlgmr.msra.gmra.mxu1 %vm6129_vm8, %v4324_v14 }
 0x186   :  { %v522_v32 = vpop.permute.xlu2 %521 }
 0x1ce   :  { %v545_v34 = vpop.f32.mrf.mxu2  ;;  %v565_v43 = vpop.f32.mrf.mxu3 }
 0x1cf   :  { %v4437_v47 = vadd.f32 %v545_v34, %v522_v32  ;;  %v4439_v51 = vadd.f32 %v565_v43, %v522_v32  ;;  %v4482_v34 = vld [vmem:[%s6123_s2 + $0x8] sm:$0xff] }
 0x1d1   :  { %v3012_v52 = vmul.f32 -1.442695, %v4437_v47  ;;  %v3013_v53 = vmul.f32 -1.442695, %v4439_v51 }
 0x1d3   :  { %3630 = vpow2.f32 %v3012_v52 }
 0x1d4   :  { %3632 = vpow2.f32 %v3013_v53 }
 0x1d9   :  { %v3631_v54 = vpop.eup %3630 }
 0x1da   :  { %v3633_v61 = vpop.eup %3632  ;;  %v667_v0 = vadd.f32 1.0, %v3631_v54 }
 0x1db   :  { %v668_v1 = vadd.f32 1.0, %v3633_v61 }
 0x1dc   :  { %3634 = vrcp.f32 %v667_v0  ;;  %vm678_vm9 = vweird.f32 %v667_v0  ;;  %v684_v63 = vand.u32 2147483648, %v667_v0  ;;  %v682_v11 = vand.u32 2147483647, %v667_v0 }
 0x1dd   :  { %3636 = vrcp.f32 %v668_v1  ;;  %v699_v44 = vand.u32 2147483648, %v668_v1  ;;  %vm693_vm11 = vweird.f32 %v668_v1  ;;  %v697_v7 = vand.u32 2147483647, %v668_v1 }
 0x1de   :  { %v685_v36 = vor.u32 1.1754944e-38, %v684_v63  ;;  %vm683_vm15 = vcmp.eq.f32.partialorder %v682_v11, 8.507059e+37  ;;  %v4520_v11 = vld [vmem:[%s6123_s2 + $0x18] sm:$0xff] }
 0x1df   :  { %v700_v41 = vor.u32 1.1754944e-38, %v699_v44  ;;  %vm698_vm8 = vcmp.eq.f32.partialorder %v697_v7, 8.507059e+37 }
 0x1e0   :  { %v585_v58 = vpop.f32.mrf.mxu2  ;;  %v605_v3 = vpop.f32.mrf.mxu3 }
 0x1e1   :  { %v4443_v62 = vadd.f32 %v585_v58, %v522_v32  ;;  %v4445_v4 = vadd.f32 %v605_v3, %v522_v32  ;;  %v625_v5 = vpop.f32.mrf.mxu0  ;;  %v645_v8 = vpop.f32.mrf.mxu1 }
 0x1e2   :  { %v3635_v10 = vpop.eup %3634  ;;  %v4447_v14 = vadd.f32 %v625_v5, %v522_v32  ;;  %v4449_v15 = vadd.f32 %v645_v8, %v522_v32 }
 0x1e3   :  { %v3637_v16 = vpop.eup %3636  ;;  %v3014_v20 = vmul.f32 -1.442695, %v4443_v62  ;;  %v3015_v24 = vmul.f32 -1.442695, %v4445_v4  ;;  %v674_v25 = vmul.f32 %v3635_v10, %v667_v0  ;;  %vm679_vm10 = vweird.f32 %v3635_v10 }
 0x1e4   :  { %v3016_v26 = vmul.f32 -1.442695, %v4447_v14  ;;  %v3017_v49 = vmul.f32 -1.442695, %v4449_v15  ;;  %v689_v60 = vmul.f32 %v3637_v16, %v668_v1  ;;  %vm694_vm12 = vweird.f32 %v3637_v16  ;;  %vm680_vm13 = vmor %vm678_vm9, %vm679_vm10 }
 0x1e5   :  { %3638 = vpow2.f32 %v3014_v20  ;;  %v675_v28 = vsub.f32 1.0, %v674_v25  ;;  %vm695_vm14 = vmor %vm693_vm11, %vm694_vm12 }
 0x1e6   :  { %3640 = vpow2.f32 %v3015_v24  ;;  %v690_v56 = vsub.f32 1.0, %v689_v60 }
 0x1e7   :  { %3642 = vpow2.f32 %v3016_v26  ;;  %v676_v57 = vmul.f32 %v3635_v10, %v675_v28 }
 0x1e8   :  { %3644 = vpow2.f32 %v3017_v49  ;;  %v691_v29 = vmul.f32 %v3637_v16, %v690_v56 }
 0x1e9   :  { %v677_v27 = vadd.f32 %v3635_v10, %v676_v57 }
 0x1ea   :  { %v692_v2 = vadd.f32 %v3637_v16, %v691_v29 }
 0x1eb   :  { %v3639_v45 = vpop.eup %3638  ;;  %v681_v35 = vsel %vm680_vm13, %v3635_v10, %v677_v27 }
 0x1ec   :  { %v3641_v30 = vpop.eup %3640  ;;  %v669_v40 = vadd.f32 1.0, %v3639_v45  ;;  %v696_v37 = vsel %vm695_vm14, %v3637_v16, %v692_v2  ;;  %v686_v38 = vsel %vm683_vm15, %v685_v36, %v681_v35  ;;  %v4512_v45 = vld [vmem:[%s6123_s2 + $0x10] sm:$0xff] }
 0x1ed   :  { %v3643_v13 = vpop.eup %3642  ;;  %v4455_v31 = vadd.f32 1.0, %v3641_v30  ;;  %v701_v50 = vsel %vm698_vm8, %v700_v41, %v696_v37  ;;  %v763_v55 = vmul.f32 %v686_v38, %v4437_v47 }
 0x1ee   :  { %v3645_v12 = vpop.eup %3644  ;;  %3646 = vrcp.f32 %v669_v40  ;;  %v4458_v46 = vadd.f32 1.0, %v3643_v13  ;;  %v712_v6 = vand.u32 2147483647, %v669_v40  ;;  %v714_v9 = vand.u32 2147483648, %v669_v40 }
 0x1ef   :  { %3648 = vrcp.f32 %v4455_v31  ;;  %v4460_v17 = vadd.f32 1.0, %v3645_v12  ;;  %v727_v22 = vand.u32 2147483647, %v4455_v31  ;;  %v729_v19 = vand.u32 2147483648, %v4455_v31 }
 0x1f0   :  { %3650 = vrcp.f32 %v4458_v46  ;;  %v764_v39 = vmul.f32 %v701_v50, %v4439_v51  ;;  %vm708_vm8 = vweird.f32 %v669_v40  ;;  %vm4473_vm9 = vcmp.eq.f32.partialorder %v712_v6, 8.507059e+37 }
 0x1f1   :  { %3652 = vrcp.f32 %v4460_v17  ;;  %vm723_vm10 = vweird.f32 %v4455_v31  ;;  %v715_v52 = vor.u32 1.1754944e-38, %v714_v9  ;;  %vm4484_vm11 = vcmp.eq.f32.partialorder %v727_v22, 8.507059e+37 }
 0x1f2   :  { %v730_v54 = vor.u32 1.1754944e-38, %v729_v19  ;;  %vm738_vm12 = vweird.f32 %v4458_v46  ;;  %v742_v1 = vand.u32 2147483647, %v4458_v46  ;;  %v4491_v58 = vmul.f32 %v763_v55, %v4470_v18 }
 0x1f3   :  { %v4495_v10 = vmul.f32 %v764_v39, %v4482_v34  ;;  %v744_v20 = vand.u32 2147483648, %v4458_v46  ;;  %vm753_vm15 = vweird.f32 %v4460_v17  ;;  %v757_v49 = vand.u32 2147483647, %v4460_v17 }
 0x1f4   :  { %v3647_v21 = vpop.eup %3646  ;;  %v759_v56 = vand.u32 2147483648, %v4460_v17  ;;  %v782_v57 = vmul.f32 %v4491_v58, %v4491_v58 }
 0x1f5   :  { %v3649_v23 = vpop.eup %3648  ;;  %v704_v33 = vmul.f32 %v3647_v21, %v669_v40  ;;  %vm709_vm13 = vweird.f32 %v3647_v21  ;;  %v783_v44 = vmul.f32 %v4495_v10, %v4495_v10  ;;  %v745_v12 = vor.u32 1.1754944e-38, %v744_v20 }
 0x1f6   :  { %v719_v32 = vmul.f32 %v3649_v23, %v4455_v31  ;;  %v3651_v61 = vpop.eup %3650  ;;  %vm724_vm14 = vweird.f32 %v3649_v23  ;;  %vm710_vm7 = vmor %vm708_vm8, %vm709_vm13  ;;  %v760_v37 = vor.u32 1.1754944e-38, %v759_v56  ;;  %v775_v38 = vadd.f32 %v4495_v10, %v4491_v58 }
 0x1f7   :  { %v705_v43 = vsub.f32 1.0, %v704_v33  ;;  %v3653_v3 = vpop.eup %3652  ;;  %v734_v8 = vmul.f32 %v3651_v61, %v4458_v46  ;;  %vm725_vm6 = vmor %vm723_vm10, %vm724_vm14  ;;  %vm739_vm5 = vweird.f32 %v3651_v61  ;;  %v4540_v46 = vld [vmem:[%s6123_s2 + $0x20] sm:$0xff]  ;;  %v788_v22 = vadd.f32 %v783_v44, %v782_v57 }
 0x1f8   :  { %v720_v0 = vsub.f32 1.0, %v719_v32  ;;  %v749_v24 = vmul.f32 %v3653_v3, %v4460_v17  ;;  %vm754_vm8 = vweird.f32 %v3653_v3  ;;  %v4546_v17 = vld [vmem:[%s6123_s2 + $0x28] sm:$0xff]  ;;  %vm6137_vm13 = vcmp.lt.s32.totalorder %v4178_v48, 17 }
 0x1f9   :  { %v706_v5 = vmul.f32 %v3647_v21, %v705_v43  ;;  %v735_v26 = vsub.f32 1.0, %v734_v8  ;;  %vm755_vm10 = vmor %vm753_vm15, %vm754_vm8  ;;  %vm6139_vm15 = vcmp.lt.s32.totalorder %v4178_v48, 18 }
 0x1fa   :  { %v721_v16 = vmul.f32 %v3649_v23, %v720_v0  ;;  %v750_v28 = vsub.f32 1.0, %v749_v24  ;;  %vm6138_vm14 = vmmov %vm6137_vm13 }
 0x1fb   :  { %v707_v25 = vadd.f32 %v3647_v21, %v706_v5  ;;  %v736_v27 = vmul.f32 %v3651_v61, %v735_v26  ;;  %vm6140_vm8 = vmmov %vm6139_vm15 }
 0x1fc   :  { %v722_v60 = vadd.f32 %v3649_v23, %v721_v16  ;;  %v751_v30 = vmul.f32 %v3653_v3, %v750_v28 }
 0x1fd   :  { %v711_v29 = vsel %vm710_vm7, %v3647_v21, %v707_v25  ;;  %v737_v31 = vadd.f32 %v3651_v61, %v736_v27  ;;  %vm743_vm7 = vcmp.eq.f32.partialorder %v742_v1, 8.507059e+37  ;;  %v4560_v27 = vld [vmem:[%s6124_s7] sm:$0xff] }
 0x1fe   :  { %v716_v63 = vsel %vm4473_vm9, %v715_v52, %v711_v29  ;;  %v726_v2 = vsel %vm725_vm6, %v3649_v23, %v722_v60  ;;  %vm740_vm9 = vmor %vm738_vm12, %vm739_vm5  ;;  %v752_v35 = vadd.f32 %v3653_v3, %v751_v30  ;;  %vm758_vm6 = vcmp.eq.f32.partialorder %v757_v49, 8.507059e+37 }
 0x1ff   :  { %v765_v40 = vmul.f32 %v716_v63, %v4443_v62  ;;  %v731_v13 = vsel %vm4484_vm11, %v730_v54, %v726_v2  ;;  %v741_v36 = vsel %vm740_vm9, %v3651_v61, %v737_v31 }
 0x200   :  { %v766_v7 = vmul.f32 %v731_v13, %v4445_v4  ;;  %v746_v50 = vsel %vm743_vm7, %v745_v12, %v741_v36  ;;  %v756_v9 = vsel %vm755_vm10, %v3653_v3, %v752_v35  ;;  %vm6141_vm7 = vcmp.lt.s32.totalorder %v4178_v48, 19 }
 0x201   :  { %v4528_v41 = vmul.f32 %v765_v40, %v4512_v45  ;;  %v767_v19 = vmul.f32 %v746_v50, %v4447_v14  ;;  %v761_v21 = vsel %vm758_vm6, %v760_v37, %v756_v9  ;;  %v3757_v40 = vmov 1   ;;  %vm6142_vm9 = vmmov %vm6141_vm7 }
 0x202   :  { %v4535_v6 = vmul.f32 %v766_v7, %v4520_v11  ;;  %v768_v33 = vmul.f32 %v761_v21, %v4449_v15  ;;  %vm6143_vm6 = vcmask 588800  }
 0x203   :  { %v776_v55 = vadd.f32 %v775_v38, %v4528_v41  ;;  %v784_v23 = vmul.f32 %v4528_v41, %v4528_v41  ;;  %v773_v39 = vmul.f32 %v767_v19, %v4540_v46  ;;  %vm6144_vm10 = vmmov %vm6143_vm6 }
 0x204   :  { %v785_v32 = vmul.f32 %v4535_v6, %v4535_v6  ;;  %v774_v52 = vmul.f32 %v768_v33, %v4546_v17 }
 0x205   :  { %v777_v42 = vadd.f32 %v776_v55, %v4535_v6  ;;  %v789_v43 = vadd.f32 %v788_v22, %v784_v23  ;;  %v786_v54 = vmul.f32 %v773_v39, %v773_v39 }
 0x206   :  { %v787_v1 = vmul.f32 %v774_v52, %v774_v52 }
 0x207   :  { %v778_v53 = vadd.f32 %v777_v42, %v773_v39  ;;  %v790_v61 = vadd.f32 %v789_v43, %v785_v32 }
 0x209   :  { %v779_v0 = vadd.f32 %v778_v53, %v774_v52  ;;  %v791_v3 = vadd.f32 %v790_v61, %v786_v54 }
 0x20b   :  { %780 = vadd.xlane.f32.xlu0 %v779_v0  ;;  %v792_v5 = vadd.f32 %v791_v3, %v787_v1 }
 0x20d   :  { %793 = vadd.xlane.f32.xlu1 %v792_v5 }
 0x27e   :  { %v781_v8 = vpop.xlane.xlu0 %780 }
 0x27f   :  { %v795_v16 = vmul.f32 0.001953125, %v781_v8 }
 0x280   :  { %v794_v20 = vpop.xlane.xlu1 %793 }
 0x281   :  { %v797_v24 = vmul.f32 %v795_v16, %v795_v16  ;;  %v796_v25 = vmul.f32 0.001953125, %v794_v20 }
 0x283   :  { %v798_v26 = vsub.f32 %v796_v25, %v797_v24 }
 0x285   :  { %v799_v49 = vadd.f32 1e-05, %v798_v26 }
 0x287   :  { %3654 = vrsqrt.f32 %v799_v49  ;;  %vm806_vm11 = vweird.f32 %v799_v49 }
 0x28d   :  { %v3655_v60 = vpop.eup %3654 }
 0x28e   :  { %v801_v28 = vmul.f32 %v3655_v60, %v799_v49  ;;  %vm807_vm5 = vweird.f32 %v3655_v60 }
 0x28f   :  { %vm808_vm12 = vmor %vm806_vm11, %vm807_vm5 }
 0x290   :  { %v802_v56 = vmul.f32 %v3655_v60, %v801_v28  ;;  %vm6145_vm5 = vmmov %vm6137_vm13 }
 0x291   :  { %vm6146_vm11 = vmmov %vm6145_vm5 }
 0x292   :  { %v803_v57 = vmul.f32 0.5, %v802_v56 }
 0x294   :  { %v804_v29 = vsub.f32 1.5, %v803_v57 }
 0x296   :  { %v805_v44 = vmul.f32 %v3655_v60, %v804_v29 }
 0x298   :  { %v809_v63 = vsel %vm808_vm12, %v3655_v60, %v805_v44  ;;  %vm6147_vm12 = vmmov %vm6140_vm8 }
 0x299   :  { %v810_v2 = vmul.f32 %v809_v63, %v4560_v27 }
 0x29b   :  { %v811_v30 = vmul.f32 %v810_v2, %v795_v16 }
 0x29d   :  { %813 = vrot.lane.b32.xlu2 %v811_v30, %s3752_s14 }
 0x2a5   :  { %819 = vperm.xlu2 %3178, %v810_v2  }
 0x2ad   :  { %3179 = vset.pattern.permute.xlu2 %v3757_v40 }
 0x2f7   :  { %v814_v13 = vpop.permute.xlu2 %813 }
 0x2f8   :  { %v816_v31 = vsub.f32 %v4560_v27, %v814_v13 }
 0x2fa   :  { %830 = vperm.xlu2 %3179, %v816_v31  }
 0x2ff   :  { %v820_v7 = vpop.permute.xlu2 %819 }
 0x300   :  { %v822_v12 = vmul.f32 %v820_v7, %v4491_v58  ;;  %v823_v35 = vmul.f32 %v820_v7, %v4495_v10  ;;  %v824_v37 = vmul.f32 %v820_v7, %v4528_v41  ;;  %v826_v22 = vmul.f32 %v820_v7, %v773_v39 }
 0x301   :  { %v827_v39 = vmul.f32 %v820_v7, %v774_v52  ;;  %v825_v53 = vmul.f32 %v820_v7, %v4535_v6 }
 0x354   :  { %v831_v36 = vpop.permute.xlu2 %830 }
 0x355   :  { %v833_v38 = vmul.f32 %v831_v36, %v4470_v18  ;;  %v834_v50 = vmul.f32 %v831_v36, %v4482_v34  ;;  %v835_v9 = vmul.f32 %v831_v36, %v4512_v45  ;;  %v837_v19 = vmul.f32 %v831_v36, %v4540_v46 }
 0x356   :  { %v838_v41 = vmul.f32 %v831_v36, %v4546_v17  ;;  %v836_v32 = vmul.f32 %v831_v36, %v4520_v11 }
 0x357   :  { %v4573_v21 = vadd.f32 %v833_v38, %v822_v12  ;;  %v4575_v55 = vadd.f32 %v834_v50, %v823_v35  ;;  %v4577_v23 = vadd.f32 %v835_v9, %v824_v37  ;;  %v4579_v58 = vadd.f32 %v837_v19, %v826_v22 }
 0x358   :  { %v4589_v42 = vadd.f32 %v838_v41, %v827_v39  ;;  %v4598_v54 = vadd.f32 %v836_v32, %v825_v53 }
 0x359   :  { %v3195_v10 = vpack.i.bf16 %v4575_v55, %v4573_v21  ;;  %v3200_v33 = vpack.i.bf16 %v4579_v58, %v4577_v23  ;;  %v3285_v6 = vpack.i.bf16 %v4577_v23, %v4579_v58 }
 0x35a   :  { %v3225_v43 = vpack.i.bf16 %v4589_v42, %v4573_v21  ;;  %v3230_v52 = vpack.i.bf16 %v4598_v54, %v4589_v42  ;;  %v3240_v61 = vpack.i.bf16 %v4598_v54, %v4575_v55 }
 0x35b   :  { %3196 = vrot.lane.b32.xlu0 %v3195_v10, %s3749_s12  ;;  %3181 = vrot.lane.b32.xlu2 %v3195_v10, %s3750_s1 }
 0x35c   :  { %3201 = vrot.lane.b32.xlu1 %v3200_v33, %s3751_s13 }
 0x363   :  { %3216 = vrot.lane.b32.xlu0 %v3200_v33, %s3748_s11  ;;  %3186 = vrot.lane.b32.xlu2 %v3195_v10, %s3751_s13 }
 0x364   :  { %3226 = vrot.lane.b32.xlu1 %v3225_v43, %s3752_s14 }
 0x36b   :  { %3231 = vrot.lane.b32.xlu0 %v3230_v52, %s3751_s13  ;;  %3191 = vrot.lane.b32.xlu2 %v3200_v33, %s3750_s1 }
 0x36c   :  { %3241 = vrot.lane.b32.xlu1 %v3240_v61, %s3752_s14 }
 0x373   :  { %3246 = vrot.lane.b32.xlu0 %v3230_v52, %s3749_s12  ;;  %3206 = vrot.lane.b32.xlu2 %v3195_v10, %s3748_s11 }
 0x374   :  { %3256 = vrot.lane.b32.xlu1 %v3240_v61, %s3753_s15 }
 0x37b   :  { %3261 = vrot.lane.b32.xlu0 %v3230_v52, %s3748_s11  ;;  %3211 = vrot.lane.b32.xlu2 %v3200_v33, %s3749_s12 }
 0x37c   :  { %3271 = vrot.lane.b32.xlu1 %v3240_v61, %s3755_s0 }
 0x383   :  { %3276 = vrot.lane.b32.xlu0 %v3240_v61, %s3754_s16  ;;  %3221 = vrot.lane.b32.xlu2 %v3230_v52, %s3750_s1 }
 0x384   :  { %3286 = vrot.lane.b32.xlu1 %v3285_v6, %s3753_s15 }
 0x38b   :  { %3291 = vrot.lane.b32.xlu0 %v3285_v6, %s3755_s0  ;;  %3236 = vrot.lane.b32.xlu2 %v3225_v43, %s3753_s15 }
 0x393   :  { %3251 = vrot.lane.b32.xlu2 %v3225_v43, %s3755_s0 }
 0x39b   :  { %3266 = vrot.lane.b32.xlu2 %v3225_v43, %s3754_s16 }
 0x3a3   :  { %3281 = vrot.lane.b32.xlu2 %v3285_v6, %s3752_s14 }
 0x3ab   :  { %3296 = vrot.lane.b32.xlu2 %v3285_v6, %s3754_s16 }
 0x3b5   :  { %v4624_v0 = vpop.permute.xlu2 %3181 }
 0x3b6   :  { %v3184_v1 = vunpack.i.h.bf16 %v4624_v0  ;;  %v3183_v3 = vunpack.i.l.bf16 %v4624_v0 }
 0x3b8   :  { %v1036_v5 = vsel %vm452_vm0, %v3183_v3, %v3184_v1 }
 0x3b9   :  { %1113 = vmatpush.msrb.mxu2 %v1036_v5 }
 0x3bd   :  { %v4632_v8 = vpop.permute.xlu2 %3186 }
 0x3be   :  { %v3189_v16 = vunpack.i.h.bf16 %v4632_v8  ;;  %v3188_v20 = vunpack.i.l.bf16 %v4632_v8 }
 0x3c0   :  { %v1012_v24 = vsel %vm427_vm1, %v3188_v20, %v3189_v16 }
 0x3c1   :  { %1114 = vmatpush.msrb.mxu2 %v1012_v24 }
 0x3c5   :  { %v4640_v25 = vpop.permute.xlu2 %3191 }
 0x3c6   :  { %v3193_v26 = vunpack.i.l.bf16 %v4640_v25  ;;  %v3194_v41 = vunpack.i.h.bf16 %v4640_v25 }
 0x3c8   :  { %v1035_v49 = vsel %vm452_vm0, %v3184_v1, %v3193_v26 }
 0x3c9   :  { %1133 = vmatpush.msrb.mxu3 %v1035_v49 }
 0x3cd   :  { %v4645_v60 = vpop.permute.xlu0 %3196  ;;  %v4647_v28 = vpop.permute.xlu2 %3206 }
 0x3ce   :  { %v4649_v56 = vpop.permute.xlu1 %3201  ;;  %v3199_v57 = vunpack.i.h.bf16 %v4645_v60  ;;  %v3198_v29 = vunpack.i.l.bf16 %v4645_v60  ;;  %v3209_v44 = vunpack.i.h.bf16 %v4647_v28  ;;  %v3208_v63 = vunpack.i.l.bf16 %v4647_v28 }
 0x3cf   :  { %v3203_v2 = vunpack.i.l.bf16 %v4649_v56  ;;  %v3204_v53 = vunpack.i.h.bf16 %v4649_v56 }
 0x3d0   :  { %v988_v30 = vsel %vm402_vm2, %v3198_v29, %v3199_v57  ;;  %v964_v31 = vsel %vm377_vm3, %v3208_v63, %v3209_v44 }
 0x3d1   :  { %1115 = vmatpush.msrb.mxu2 %v988_v30  ;;  %v1011_v13 = vsel %vm427_vm1, %v3189_v16, %v3203_v2 }
 0x3d2   :  { %1134 = vmatpush.msrb.mxu3 %v1011_v13 }
 0x3d3   :  { %1116 = vmatpush.msrb.mxu2 %v964_v31 }
 0x3d5   :  { %v4666_v7 = vpop.permute.xlu0 %3216  ;;  %v4668_v12 = vpop.permute.xlu2 %3211  ;;  %1117 = vmatpush.msrb.mxu2 %v4573_v21 }
 0x3d6   :  { %v4671_v35 = vpop.permute.xlu1 %3226  ;;  %v3218_v36 = vunpack.i.l.bf16 %v4666_v7  ;;  %v3213_v37 = vunpack.i.l.bf16 %v4668_v12  ;;  %v3214_v24 = vunpack.i.h.bf16 %v4668_v12 }
 0x3d7   :  { %v3229_v38 = vunpack.i.h.bf16 %v4671_v35  ;;  %v3228_v50 = vunpack.i.l.bf16 %v4671_v35 }
 0x3d8   :  { %v987_v9 = vsel %vm402_vm2, %v3199_v57, %v3213_v37  ;;  %v963_v19 = vsel %vm377_vm3, %v3209_v44, %v3218_v36 }
 0x3d9   :  { %v935_v22 = vsel %vm346_vm4, %v3229_v38, %v3228_v50  ;;  %1135 = vmatpush.msrb.mxu3 %v987_v9  ;;  %v3758_v9 = vmov 2  }
 0x3da   :  { %1118 = vmatpush.msrb.mxu2 %v935_v22  ;;  %3300 = vset.pattern.permute.xlu1 %v3758_v9 }
 0x3db   :  { %1136 = vmatpush.msrb.mxu3 %v963_v19  ;;  %1100 = vperm.xlu1 %3300, %v4560_v27   ;;  %v3219_v19 = vunpack.i.h.bf16 %v4666_v7 }
 0x3dd   :  { %v4685_v21 = vpop.permute.xlu0 %3231  ;;  %v4687_v10 = vpop.permute.xlu2 %3221  ;;  %1137 = vmatpush.msrb.mxu3 %v4575_v55 }
 0x3de   :  { %v4691_v33 = vpop.permute.xlu1 %3241  ;;  %v3234_v39 = vunpack.i.h.bf16 %v4685_v21  ;;  %v3224_v32 = vunpack.i.h.bf16 %v4687_v10 }
 0x3df   :  { %v3243_v43 = vunpack.i.l.bf16 %v4691_v33 }
 0x3e0   :  { %v1034_v52 = vsel %vm452_vm0, %v3193_v26, %v3224_v32  ;;  %v1033_v55 = vsel %vm452_vm0, %v3224_v32, %v3194_v41  ;;  %v1010_v6 = vsel %vm427_vm1, %v3203_v2, %v3234_v39  ;;  %v1009_v1 = vsel %vm427_vm1, %v3234_v39, %v3204_v53 }
 0x3e1   :  { %v934_v61 = vsel %vm346_vm4, %v3228_v50, %v3243_v43  ;;  %1153 = vmatpush.msrb.mxu0 %v1034_v52  ;;  %1173 = vmatpush.msrb.mxu1 %v1033_v55 }
 0x3e2   :  { %1138 = vmatpush.msrb.mxu3 %v934_v61 }
 0x3e3   :  { %1154 = vmatpush.msrb.mxu0 %v1010_v6  ;;  %1174 = vmatpush.msrb.mxu1 %v1009_v1 }
 0x3e5   :  { %v4713_v5 = vpop.permute.xlu0 %3246  ;;  %v4715_v16 = vpop.permute.xlu2 %3236 }
 0x3e6   :  { %v4718_v26 = vpop.permute.xlu1 %3256  ;;  %v3249_v49 = vunpack.i.h.bf16 %v4713_v5  ;;  %v3239_v57 = vunpack.i.h.bf16 %v4715_v16  ;;  %v3238_v44 = vunpack.i.l.bf16 %v4715_v16 }
 0x3e7   :  { %v3258_v2 = vunpack.i.l.bf16 %v4718_v26 }
 0x3e8   :  { %v911_v30 = vsel %vm6137_vm13, %v3239_v57, %v3238_v44  ;;  %v986_v13 = vsel %vm402_vm2, %v3213_v37, %v3249_v49  ;;  %v985_v31 = vsel %vm402_vm2, %v3249_v49, %v3214_v24  ;;  %vm6148_vm13 = vmmov %vm6140_vm8 }
 0x3e9   :  { %1119 = vmatpush.msrb.mxu2 %v911_v30  ;;  %v910_v50 = vsel %vm6138_vm14, %v3238_v44, %v3258_v2  ;;  %1155 = vmatpush.msrb.mxu0 %v986_v13  ;;  %vm6149_vm14 = vmmov %vm6145_vm5 }
 0x3ea   :  { %1139 = vmatpush.msrb.mxu3 %v910_v50  ;;  %1175 = vmatpush.msrb.mxu1 %v985_v31 }
 0x3ed   :  { %v3262_v37 = vpop.permute.xlu0 %3261  ;;  %v4740_v22 = vpop.permute.xlu2 %3251 }
 0x3ee   :  { %v4743_v39 = vpop.permute.xlu1 %3271  ;;  %v3264_v32 = vunpack.i.h.bf16 %v3262_v37  ;;  %v3254_v52 = vunpack.i.h.bf16 %v4740_v22  ;;  %v3253_v55 = vunpack.i.l.bf16 %v4740_v22 }
 0x3ef   :  { %v3273_v61 = vunpack.i.l.bf16 %v4743_v39  ;;  %v3274_v28 = vunpack.i.h.bf16 %v4743_v39 }
 0x3f0   :  { %v887_v6 = vsel %vm6139_vm15, %v3254_v52, %v3253_v55  ;;  %v962_v1 = vsel %vm377_vm3, %v3218_v36, %v3264_v32  ;;  %v961_v7 = vsel %vm377_vm3, %v3264_v32, %v3219_v19  ;;  %v3223_v36 = vunpack.i.l.bf16 %v4687_v10  ;;  %v4773_v32 = vld [vmem:[%s6125_s5] sm:$0xff]  ;;  %vm6150_vm15 = vmmov %vm6145_vm5 }
 0x3f1   :  { %1120 = vmatpush.msrb.mxu2 %v887_v6  ;;  %v886_v49 = vsel %vm6140_vm8, %v3253_v55, %v3273_v61  ;;  %1156 = vmatpush.msrb.mxu0 %v962_v1  ;;  %v3248_v55 = vunpack.i.l.bf16 %v4713_v5  ;;  %v3263_v1 = vunpack.i.l.bf16 %v3262_v37 }
 0x3f2   :  { %1140 = vmatpush.msrb.mxu3 %v886_v49  ;;  %1176 = vmatpush.msrb.mxu1 %v961_v7  ;;  %v1037_v6 = vsel %vm452_vm0, %v3223_v36, %v3183_v3 }
 0x3f3   :  { %1157 = vmatpush.msrb.mxu0 %v4577_v23  ;;  %v3233_v23 = vunpack.i.l.bf16 %v4685_v21  ;;  %v1032_v21 = vsel %vm452_vm0, %v3194_v41, %v3223_v36  ;;  %v3244_v41 = vunpack.i.h.bf16 %v4691_v33  ;;  %v984_v56 = vsel %vm402_vm2, %v3214_v24, %v3248_v55 }
 0x3f4   :  { %1177 = vmatpush.msrb.mxu1 %v4598_v54  ;;  %v989_v8 = vsel %vm402_vm2, %v3248_v55, %v3198_v29  ;;  %v965_v12 = vsel %vm377_vm3, %v3263_v1, %v3208_v63  ;;  %v3259_v24 = vunpack.i.h.bf16 %v4718_v26 }
 0x3f5   :  { %v4762_v44 = vpop.permute.xlu0 %3276  ;;  %v4764_v30 = vpop.permute.xlu2 %3266  ;;  %v1008_v7 = vsel %vm427_vm1, %v3204_v53, %v3233_v23  ;;  %v1013_v25 = vsel %vm427_vm1, %v3233_v23, %v3188_v20  ;;  %v960_v20 = vsel %vm377_vm3, %v3219_v19, %v3263_v1 }
 0x3f6   :  { %v3278_v13 = vunpack.i.l.bf16 %v4762_v44  ;;  %v3269_v31 = vunpack.i.h.bf16 %v4764_v30  ;;  %v3268_v50 = vunpack.i.l.bf16 %v4764_v30  ;;  %v3287_v5 = vpop.permute.xlu1 %3286  ;;  %v1226_v30 = vld [vmem:[%s6126_s8] sm:$0xff] }
 0x3f7   :  { %v3289_v53 = vunpack.i.h.bf16 %v3287_v5  ;;  %v3288_v19 = vunpack.i.l.bf16 %v3287_v5 }
 0x3f8   :  { %v863_v54 = vsel %vm6141_vm7, %v3269_v31, %v3268_v50  ;;  %v862_v10 = vsel %vm6142_vm9, %v3268_v50, %v3278_v13  ;;  %vm6151_vm7 = vmmov %vm6140_vm8 }
 0x3f9   :  { %1121 = vmatpush.msrb.mxu2 %v863_v54  ;;  %1141 = vmatpush.msrb.mxu3 %v862_v10  ;;  %v909_v63 = vsel %vm6145_vm5, %v3258_v2, %v3289_v53  ;;  %v908_v33 = vsel %vm6146_vm11, %v3289_v53, %v3259_v24  ;;  %v907_v35 = vsel %vm6149_vm14, %v3259_v24, %v3288_v19  ;;  %vm6155_vm11 = vcmask 588800  }
 0x3fa   :  { %3018 = vmatmul.msk.f32.vlgmr.msrb.gmra.mxu2 %vm6143_vm6, %v4773_v32  ;;  %3019 = vmatmul.msk.f32.vlgmr.msrb.gmra.mxu3 %vm6144_vm10, %v4773_v32  ;;  %vm6152_vm6 = vmmov %vm6142_vm9 }
 0x3fb   :  { %1193 = vmatpush.msra.mxu2 %v1032_v21  ;;  %1213 = vmatpush.msra.mxu3 %v1037_v6  ;;  %vm6153_vm10 = vmmov %vm6152_vm6 }
 0x3fc   :  { %vm6154_vm5 = vmmov %vm6152_vm6 }
 0x3fd   :  { %1194 = vmatpush.msra.mxu2 %v1008_v7  ;;  %1214 = vmatpush.msra.mxu3 %v1013_v25  ;;  %v3282_v0 = vpop.permute.xlu2 %3281  ;;  %v3292_v3 = vpop.permute.xlu0 %3291  ;;  %vm6158_vm14 = vmmov %vm6155_vm11 }
 0x3fe   :  { %v3284_v37 = vunpack.i.h.bf16 %v3282_v0  ;;  %v3283_v49 = vunpack.i.l.bf16 %v3282_v0  ;;  %v3294_v36 = vunpack.i.h.bf16 %v3292_v3  ;;  %v1228_v0 = vld [vmem:[%s6126_s8 + $0x10] sm:$0xff] }
 0x3ff   :  { %1195 = vmatpush.msra.mxu2 %v984_v56  ;;  %1215 = vmatpush.msra.mxu3 %v989_v8 }
 0x400   :  { %v933_v60 = vsel %vm346_vm4, %v3243_v43, %v3284_v37  ;;  %v932_v29 = vsel %vm346_vm4, %v3284_v37, %v3244_v41  ;;  %v3293_v43 = vunpack.i.l.bf16 %v3292_v3  ;;  %v931_v50 = vsel %vm346_vm4, %v3244_v41, %v3283_v49  ;;  %v1229_v3 = vld [vmem:[%s6126_s8 + $0x18] sm:$0xff] }
 0x401   :  { %1196 = vmatpush.msra.mxu2 %v960_v20  ;;  %1216 = vmatpush.msra.mxu3 %v965_v12  ;;  %v885_v2 = vsel %vm6147_vm12, %v3273_v61, %v3294_v36  ;;  %v884_v23 = vsel %vm6148_vm13, %v3294_v36, %v3274_v28  ;;  %vm6156_vm12 = vmmov %vm6155_vm11 }
 0x402   :  { %1158 = vmatpush.msrb.mxu0 %v933_v60  ;;  %1178 = vmatpush.msrb.mxu1 %v932_v29  ;;  %v883_v39 = vsel %vm6140_vm8, %v3274_v28, %v3293_v43  ;;  %v882_v61 = vsel %vm6151_vm7, %v3293_v43, %v3254_v52  ;;  %vm6157_vm13 = vmmov %vm6155_vm11 }
 0x403   :  { %1197 = vmatpush.msra.mxu2 %v4579_v58  ;;  %1217 = vmatpush.msra.mxu3 %v4589_v42  ;;  %v930_v58 = vsel %vm346_vm4, %v3283_v49, %v3229_v38  ;;  %v3279_v42 = vunpack.i.h.bf16 %v4762_v44  ;;  %v906_v38 = vsel %vm6150_vm15, %v3288_v19, %v3239_v57  ;;  %v1230_v19 = vld [vmem:[%s6126_s8 + $0x20] sm:$0xff] }
 0x404   :  { %1159 = vmatpush.msrb.mxu0 %v909_v63  ;;  %1179 = vmatpush.msrb.mxu1 %v908_v33  ;;  %v1231_v63 = vld [vmem:[%s6126_s8 + $0x28] sm:$0xff] }
 0x405   :  { %1198 = vmatpush.msra.mxu2 %v931_v50  ;;  %1218 = vmatpush.msra.mxu3 %v930_v58  ;;  %v3297_v26 = vpop.permute.xlu2 %3296 }
 0x406   :  { %v3299_v54 = vunpack.i.h.bf16 %v3297_v26  ;;  %v3298_v10 = vunpack.i.l.bf16 %v3297_v26  ;;  %1160 = vmatpush.msrb.mxu0 %v885_v2  ;;  %1180 = vmatpush.msrb.mxu1 %v884_v23 }
 0x407   :  { %1199 = vmatpush.msra.mxu2 %v907_v35  ;;  %1219 = vmatpush.msra.mxu3 %v906_v38 }
 0x408   :  { %v861_v55 = vsel %vm6142_vm9, %v3278_v13, %v3299_v54  ;;  %v860_v16 = vsel %vm6152_vm6, %v3299_v54, %v3279_v42  ;;  %v859_v57 = vsel %vm6153_vm10, %v3279_v42, %v3298_v10  ;;  %v858_v22 = vsel %vm6154_vm5, %v3298_v10, %v3269_v31  ;;  %v1227_v31 = vld [vmem:[%s6126_s8 + $0x8] sm:$0xff] }
 0x409   :  { %1200 = vmatpush.msra.mxu2 %v883_v39  ;;  %1220 = vmatpush.msra.mxu3 %v882_v61 }
 0x40a   :  { %1161 = vmatpush.msrb.mxu0 %v861_v55  ;;  %1181 = vmatpush.msrb.mxu1 %v860_v16 }
 0x40b   :  { %3020 = vmatmul.msk.f32.vlgmr.msrb.gmra.mxu0 %vm6155_vm11, %v4773_v32  ;;  %3021 = vmatmul.msk.f32.vlgmr.msrb.gmra.mxu1 %vm6156_vm12, %v4773_v32 }
 0x40c   :  { %1201 = vmatpush.msra.mxu2 %v859_v57  ;;  %1221 = vmatpush.msra.mxu3 %v858_v22 }
 0x40d   :  { %3022 = vmatmul.msk.f32.vlgmr.msra.gmra.mxu2 %vm6157_vm13, %v4773_v32  ;;  %3023 = vmatmul.msk.f32.vlgmr.msra.gmra.mxu3 %vm6158_vm14, %v4773_v32 }
 0x44d   :  { %v1101_v52 = vpop.permute.xlu1 %1100 }
 0x47d   :  { %v1123_v44 = vpop.f32.mrf.mxu2  ;;  %v1143_v13 = vpop.f32.mrf.mxu3 }
 0x47e   :  { %v1124_v21 = vadd.f32 %v1123_v44, %v1101_v52  ;;  %v1144_v6 = vadd.f32 %v1143_v13, %v1101_v52 }
 0x480   :  { %v4887_v1 = vadd.f32 %v1226_v30, %v1124_v21  ;;  %v4889_v5 = vadd.f32 %v1227_v31, %v1144_v6 }
 0x482   :  { %v3024_v7 = vmul.f32 -1.442695, %v4887_v1  ;;  %v3025_v32 = vmul.f32 -1.442695, %v4889_v5 }
 0x484   :  { %3656 = vpow2.f32 %v3024_v7 }
 0x485   :  { %3658 = vpow2.f32 %v3025_v32 }
 0x488   :  { %v1163_v25 = vpop.f32.mrf.mxu0  ;;  %v1183_v41 = vpop.f32.mrf.mxu1 }
 0x489   :  { %v1164_v37 = vadd.f32 %v1163_v25, %v1101_v52  ;;  %v1184_v56 = vadd.f32 %v1183_v41, %v1101_v52 }
 0x48a   :  { %v3657_v8 = vpop.eup %3656 }
 0x48b   :  { %v3659_v53 = vpop.eup %3658  ;;  %v1256_v20 = vadd.f32 1.0, %v3657_v8  ;;  %v4899_v49 = vadd.f32 %v1228_v0, %v1164_v37  ;;  %v4901_v12 = vadd.f32 %v1229_v3, %v1184_v56 }
 0x48c   :  { %v1257_v60 = vadd.f32 1.0, %v3659_v53 }
 0x48d   :  { %3660 = vrcp.f32 %v1256_v20  ;;  %v3026_v29 = vmul.f32 -1.442695, %v4899_v49  ;;  %v3027_v24 = vmul.f32 -1.442695, %v4901_v12  ;;  %vm1267_vm15 = vweird.f32 %v1256_v20 }
 0x48e   :  { %3662 = vrcp.f32 %v1257_v60  ;;  %v1273_v39 = vand.u32 2147483648, %v1256_v20  ;;  %v1271_v22 = vand.u32 2147483647, %v1256_v20  ;;  %v1288_v44 = vand.u32 2147483648, %v1257_v60 }
 0x48f   :  { %3664 = vpow2.f32 %v3026_v29  ;;  %vm1282_vm7 = vweird.f32 %v1257_v60  ;;  %v1286_v7 = vand.u32 2147483647, %v1257_v60 }
 0x490   :  { %v1203_v36 = vpop.f32.mrf.mxu2  ;;  %v1223_v28 = vpop.f32.mrf.mxu3  ;;  %3666 = vpow2.f32 %v3027_v24  ;;  %v1274_v6 = vor.u32 1.1754944e-38, %v1273_v39  ;;  %vm1272_vm10 = vcmp.eq.f32.partialorder %v1271_v22, 8.507059e+37  ;;  %v1289_v25 = vor.u32 1.1754944e-38, %v1288_v44 }
 0x491   :  { %v1204_v33 = vadd.f32 %v1203_v36, %v1101_v52  ;;  %v1224_v43 = vadd.f32 %v1223_v28, %v1101_v52  ;;  %vm1287_vm11 = vcmp.eq.f32.partialorder %v1286_v7, 8.507059e+37 }
 0x493   :  { %v3661_v50 = vpop.eup %3660  ;;  %v4911_v58 = vadd.f32 %v1230_v19, %v1204_v33  ;;  %v4913_v42 = vadd.f32 %v1231_v63, %v1224_v43 }
 0x494   :  { %v3663_v26 = vpop.eup %3662  ;;  %v1263_v2 = vmul.f32 %v3661_v50, %v1256_v20  ;;  %vm1268_vm8 = vweird.f32 %v3661_v50 }
 0x495   :  { %v1278_v23 = vmul.f32 %v3663_v26, %v1257_v60  ;;  %v3028_v54 = vmul.f32 -1.442695, %v4911_v58  ;;  %v3029_v10 = vmul.f32 -1.442695, %v4913_v42  ;;  %v3665_v38 = vpop.eup %3664  ;;  %vm1283_vm9 = vweird.f32 %v3663_v26  ;;  %vm1269_vm6 = vmor %vm1267_vm15, %vm1268_vm8 }
 0x496   :  { %v1264_v35 = vsub.f32 1.0, %v1263_v2  ;;  %v3667_v55 = vpop.eup %3666  ;;  %v1258_v57 = vadd.f32 1.0, %v3665_v38  ;;  %vm1284_vm5 = vmor %vm1282_vm7, %vm1283_vm9 }
 0x497   :  { %v1279_v61 = vsub.f32 1.0, %v1278_v23  ;;  %3668 = vpow2.f32 %v3028_v54  ;;  %v1259_v30 = vadd.f32 1.0, %v3667_v55 }
 0x498   :  { %v1265_v16 = vmul.f32 %v3661_v50, %v1264_v35  ;;  %3670 = vpow2.f32 %v3029_v10  ;;  %v1301_v19 = vand.u32 2147483647, %v1258_v57  ;;  %v1303_v28 = vand.u32 2147483648, %v1258_v57 }
 0x499   :  { %v1280_v52 = vmul.f32 %v3663_v26, %v1279_v61  ;;  %3672 = vrcp.f32 %v1258_v57  ;;  %v1316_v43 = vand.u32 2147483647, %v1259_v30  ;;  %v1318_v2 = vand.u32 2147483648, %v1259_v30 }
 0x49a   :  { %v1266_v13 = vadd.f32 %v3661_v50, %v1265_v16  ;;  %3674 = vrcp.f32 %v1259_v30  ;;  %vm1297_vm14 = vweird.f32 %v1258_v57  ;;  %vm1302_vm15 = vcmp.eq.f32.partialorder %v1301_v19, 8.507059e+37 }
 0x49b   :  { %v1281_v31 = vadd.f32 %v3663_v26, %v1280_v52  ;;  %vm1312_vm8 = vweird.f32 %v1259_v30  ;;  %v1319_v61 = vor.u32 1.1754944e-38, %v1318_v2 }
 0x49c   :  { %v1270_v21 = vsel %vm1269_vm6, %v3661_v50, %v1266_v13  ;;  %vm1317_vm6 = vcmp.eq.f32.partialorder %v1316_v43, 8.507059e+37 }
 0x49d   :  { %v3669_v32 = vpop.eup %3668  ;;  %v1275_v41 = vsel %vm1272_vm10, %v1274_v6, %v1270_v21  ;;  %v1285_v3 = vsel %vm1284_vm5, %v3663_v26, %v1281_v31 }
 0x49e   :  { %v3671_v0 = vpop.eup %3670  ;;  %v1260_v37 = vadd.f32 1.0, %v3669_v32  ;;  %v1352_v20 = vmul.f32 %v1275_v41, %v4887_v1  ;;  %v1290_v29 = vsel %vm1287_vm11, %v1289_v25, %v1285_v3 }
 0x49f   :  { %v3673_v56 = vpop.eup %3672  ;;  %v4918_v8 = vadd.f32 1.0, %v3671_v0  ;;  %v1353_v63 = vmul.f32 %v1290_v29, %v4889_v5  ;;  %v1304_v5 = vor.u32 1.1754944e-38, %v1303_v28 }
 0x4a0   :  { %v3675_v53 = vpop.eup %3674  ;;  %v1293_v24 = vmul.f32 %v3673_v56, %v1258_v57  ;;  %3676 = vrcp.f32 %v1260_v37  ;;  %v4924_v50 = vmul.f32 %v1352_v20, %v4470_v18  ;;  %vm1298_vm12 = vweird.f32 %v3673_v56 }
 0x4a1   :  { %v1308_v36 = vmul.f32 %v3675_v53, %v1259_v30  ;;  %3678 = vrcp.f32 %v4918_v8  ;;  %vm1313_vm13 = vweird.f32 %v3675_v53  ;;  %v4927_v10 = vmul.f32 %v1353_v63, %v4482_v34  ;;  %vm1299_vm7 = vmor %vm1297_vm14, %vm1298_vm12 }
 0x4a2   :  { %v1294_v60 = vsub.f32 1.0, %v1293_v24  ;;  %v1371_v18 = vmul.f32 %v4924_v50, %v4924_v50  ;;  %vm1314_vm9 = vmor %vm1312_vm8, %vm1313_vm13  ;;  %v1331_v52 = vand.u32 2147483647, %v1260_v37  ;;  %v1333_v30 = vand.u32 2147483648, %v1260_v37 }
 0x4a3   :  { %v1309_v33 = vsub.f32 1.0, %v1308_v36  ;;  %v1372_v31 = vmul.f32 %v4927_v10, %v4927_v10  ;;  %vm1327_vm5 = vweird.f32 %v1260_v37  ;;  %v1346_v25 = vand.u32 2147483647, %v4918_v8 }
 0x4a4   :  { %v1295_v26 = vmul.f32 %v3673_v56, %v1294_v60  ;;  %vm1332_vm11 = vcmp.eq.f32.partialorder %v1331_v52, 8.507059e+37  ;;  %v1364_v41 = vadd.f32 %v4927_v10, %v4924_v50  ;;  %v1334_v3 = vor.u32 1.1754944e-38, %v1333_v30 }
 0x4a5   :  { %v1310_v1 = vmul.f32 %v3675_v53, %v1309_v33  ;;  %v1377_v20 = vadd.f32 %v1372_v31, %v1371_v18  ;;  %vm1342_vm14 = vweird.f32 %v4918_v8  ;;  %vm1347_vm8 = vcmp.eq.f32.partialorder %v1346_v25, 8.507059e+37 }
 0x4a6   :  { %v3677_v23 = vpop.eup %3676  ;;  %v1296_v54 = vadd.f32 %v3673_v56, %v1295_v26  ;;  %v3759_v18 = vmov 3  }
 0x4a7   :  { %v1311_v35 = vadd.f32 %v3675_v53, %v1310_v1  ;;  %v1323_v38 = vmul.f32 %v3677_v23, %v1260_v37  ;;  %v3679_v55 = vpop.eup %3678  ;;  %vm1328_vm10 = vweird.f32 %v3677_v23  ;;  %3301 = vset.pattern.permute.xlu1 %v3759_v18 }
 0x4a8   :  { %v1300_v39 = vsel %vm1299_vm7, %v3673_v56, %v1296_v54  ;;  %v1338_v13 = vmul.f32 %v3679_v55, %v4918_v8  ;;  %vm1329_vm12 = vmor %vm1327_vm5, %vm1328_vm10  ;;  %vm1343_vm13 = vweird.f32 %v3679_v55  ;;  %vm6159_vm10 = vcmp.lt.s32.totalorder %v4178_v48, 17 }
 0x4a9   :  { %v1305_v16 = vsel %vm1302_vm15, %v1304_v5, %v1300_v39  ;;  %v1315_v22 = vsel %vm1314_vm9, %v3675_v53, %v1311_v35  ;;  %v1324_v57 = vsub.f32 1.0, %v1323_v38  ;;  %vm1344_vm15 = vmor %vm1342_vm14, %vm1343_vm13 }
 0x4aa   :  { %v1354_v44 = vmul.f32 %v1305_v16, %v4899_v49  ;;  %v1320_v34 = vsel %vm1317_vm6, %v1319_v61, %v1315_v22  ;;  %v1339_v32 = vsub.f32 1.0, %v1338_v13  ;;  %v1348_v49 = vand.u32 2147483648, %v4918_v8  ;;  %vm6160_vm5 = vmmov %vm6159_vm10 }
 0x4ab   :  { %v1355_v21 = vmul.f32 %v1320_v34, %v4901_v12  ;;  %v1325_v6 = vmul.f32 %v3677_v23, %v1324_v57 }
 0x4ac   :  { %v4937_v7 = vmul.f32 %v1354_v44, %v4512_v45  ;;  %v1340_v56 = vmul.f32 %v3679_v55, %v1339_v32  ;;  %v1349_v60 = vor.u32 1.1754944e-38, %v1348_v49 }
 0x4ad   :  { %v1326_v0 = vadd.f32 %v3677_v23, %v1325_v6  ;;  %v1361_v45 = vmul.f32 %v1355_v21, %v4520_v11  ;;  %v3760_v21 = vmov 4  }
 0x4ae   :  { %v1373_v12 = vmul.f32 %v4937_v7, %v4937_v7  ;;  %v1365_v53 = vadd.f32 %v1364_v41, %v4937_v7  ;;  %v1341_v24 = vadd.f32 %v3679_v55, %v1340_v56 }
 0x4af   :  { %v1330_v37 = vsel %vm1329_vm12, %v3677_v23, %v1326_v0  ;;  %v1374_v11 = vmul.f32 %v1361_v45, %v1361_v45  ;;  %vm6162_vm12 = vcmp.lt.s32.totalorder %v4178_v48, 18 }
 0x4b0   :  { %v1335_v29 = vsel %vm1332_vm11, %v1334_v3, %v1330_v37  ;;  %v1378_v19 = vadd.f32 %v1377_v20, %v1373_v12  ;;  %v1345_v28 = vsel %vm1344_vm15, %v3679_v55, %v1341_v24  ;;  %v1366_v43 = vadd.f32 %v1365_v53, %v1361_v45  ;;  %v4964_v12 = vld [vmem:[%s6123_s2] sm:$0xff]  ;;  %vm6161_vm11 = vmmov %vm6160_vm5 }
 0x4b1   :  { %v1356_v36 = vmul.f32 %v1335_v29, %v4911_v58  ;;  %v1350_v33 = vsel %vm1347_vm8, %v1349_v60, %v1345_v28  ;;  %v4988_v29 = vld [vmem:[%s6123_s2 + $0x20] sm:$0xff]  ;;  %vm6163_vm13 = vmmov %vm6162_vm12  ;;  %vm6165_vm15 = vcmp.lt.s32.totalorder %v4178_v48, 19 }
 0x4b2   :  { %v1357_v26 = vmul.f32 %v1350_v33, %v4913_v42  ;;  %v1379_v23 = vadd.f32 %v1378_v19, %v1374_v11  ;;  %vm6164_vm14 = vmmov %vm6162_vm12 }
 0x4b3   :  { %v1362_v63 = vmul.f32 %v1356_v36, %v4540_v46  ;;  %v4994_v36 = vld [vmem:[%s6123_s2 + $0x28] sm:$0xff]  ;;  %vm6166_vm8 = vmmov %vm6165_vm15 }
 0x4b4   :  { %v1363_v54 = vmul.f32 %v1357_v26, %v4546_v17 }
 0x4b5   :  { %v1367_v2 = vadd.f32 %v1366_v43, %v1362_v63  ;;  %v1375_v1 = vmul.f32 %v1362_v63, %v1362_v63 }
 0x4b6   :  { %v1376_v58 = vmul.f32 %v1363_v54, %v1363_v54 }
 0x4b7   :  { %v1380_v8 = vadd.f32 %v1379_v23, %v1375_v1  ;;  %v1368_v5 = vadd.f32 %v1367_v2, %v1363_v54 }
 0x4b9   :  { %1369 = vadd.xlane.f32.xlu0 %v1368_v5  ;;  %v1381_v35 = vadd.f32 %v1380_v8, %v1376_v58 }
 0x4bb   :  { %1382 = vadd.xlane.f32.xlu2 %v1381_v35 }
 0x52c   :  { %v1370_v38 = vpop.xlane.xlu0 %1369 }
 0x52d   :  { %v1384_v46 = vmul.f32 0.001953125, %v1370_v38 }
 0x52e   :  { %v1383_v39 = vpop.xlane.xlu2 %1382 }
 0x52f   :  { %v1386_v61 = vmul.f32 %v1384_v46, %v1384_v46  ;;  %v1385_v55 = vmul.f32 0.001953125, %v1383_v39 }
 0x531   :  { %v1387_v42 = vsub.f32 %v1385_v55, %v1386_v61 }
 0x533   :  { %v1388_v16 = vadd.f32 1e-05, %v1387_v42 }
 0x535   :  { %3680 = vrsqrt.f32 %v1388_v16  ;;  %vm1395_vm9 = vweird.f32 %v1388_v16 }
 0x53b   :  { %v3681_v22 = vpop.eup %3680 }
 0x53c   :  { %v1390_v57 = vmul.f32 %v3681_v22, %v1388_v16  ;;  %vm1396_vm7 = vweird.f32 %v3681_v22 }
 0x53d   :  { %vm1397_vm6 = vmor %vm1395_vm9, %vm1396_vm7  ;;  %vm6168_vm9 = vcmask 588800  }
 0x53e   :  { %v1391_v17 = vmul.f32 %v3681_v22, %v1390_v57  ;;  %vm6167_vm7 = vmmov %vm6166_vm8 }
 0x540   :  { %v1392_v52 = vmul.f32 0.5, %v1391_v17 }
 0x542   :  { %v1393_v44 = vsub.f32 1.5, %v1392_v52 }
 0x544   :  { %v1394_v34 = vmul.f32 %v3681_v22, %v1393_v44 }
 0x546   :  { %v1398_v30 = vsel %vm1397_vm6, %v3681_v22, %v1394_v34  ;;  %vm6169_vm6 = vmmov %vm6168_vm9 }
 0x547   :  { %v1399_v13 = vmul.f32 %v1398_v30, %v4560_v27 }
 0x549   :  { %v1400_v31 = vmul.f32 %v1399_v13, %v1384_v46 }
 0x54b   :  { %1402 = vrot.lane.b32.xlu1 %v1400_v31, %s3752_s14 }
 0x553   :  { %1408 = vperm.xlu1 %3301, %v1399_v13  }
 0x55b   :  { %3302 = vset.pattern.permute.xlu1 %v3760_v21 }
 0x5bd   :  { %v1403_v6 = vpop.permute.xlu1 %1402 }
 0x5be   :  { %v1405_v32 = vsub.f32 %v4560_v27, %v1403_v6  ;;  %v4970_v27 = vld [vmem:[%s6123_s2 + $0x8] sm:$0xff] }
 0x5c0   :  { %1419 = vperm.xlu1 %3302, %v1405_v32  }
 0x5c5   :  { %v1409_v25 = vpop.permute.xlu1 %1408 }
 0x5c6   :  { %v1411_v0 = vmul.f32 %v1409_v25, %v4924_v50  ;;  %v1412_v49 = vmul.f32 %v1409_v25, %v4927_v10  ;;  %v1413_v41 = vmul.f32 %v1409_v25, %v4937_v7  ;;  %v1414_v3 = vmul.f32 %v1409_v25, %v1361_v45  ;;  %v4976_v50 = vld [vmem:[%s6123_s2 + $0x10] sm:$0xff]  ;;  %v4982_v7 = vld [vmem:[%s6123_s2 + $0x18] sm:$0xff] }
 0x5c7   :  { %v1415_v53 = vmul.f32 %v1409_v25, %v1362_v63  ;;  %v1416_v20 = vmul.f32 %v1409_v25, %v1363_v54 }
 0x5c8   :  { %3526 = vset.pattern.permute.xlu1 %v3758_v9 }
 0x632   :  { %v1420_v56 = vpop.permute.xlu1 %1419 }
 0x633   :  { %v1422_v37 = vmul.f32 %v4964_v12, %v1420_v56  ;;  %v1423_v9 = vmul.f32 %v4970_v27, %v1420_v56  ;;  %v1424_v10 = vmul.f32 %v4976_v50, %v1420_v56  ;;  %v1425_v45 = vmul.f32 %v4982_v7, %v1420_v56 }
 0x634   :  { %v1426_v24 = vmul.f32 %v4988_v29, %v1420_v56  ;;  %v1427_v60 = vmul.f32 %v4994_v36, %v1420_v56 }
 0x635   :  { %v4997_v19 = vadd.f32 %v1422_v37, %v1411_v0  ;;  %v4999_v28 = vadd.f32 %v1423_v9, %v1412_v49  ;;  %v5001_v63 = vadd.f32 %v1424_v10, %v1413_v41  ;;  %v5003_v33 = vadd.f32 %v1425_v45, %v1414_v3 }
 0x636   :  { %v5005_v43 = vadd.f32 %v1426_v24, %v1415_v53  ;;  %v5007_v11 = vadd.f32 %v1427_v60, %v1416_v20 }
 0x637   :  { %v3303_v26 = vpack.i.bf16 %v5003_v33, %v5001_v63  ;;  %v3313_v2 = vpack.i.bf16 %v4999_v28, %v4997_v19  ;;  %v3368_v23 = vpack.i.bf16 %v5001_v63, %v4999_v28  ;;  %v3373_v54 = vpack.i.bf16 %v5003_v33, %v4997_v19 }
 0x638   :  { %v3318_v1 = vpack.i.bf16 %v5007_v11, %v5005_v43 }
 0x639   :  { %3304 = vrot.lane.b32.xlu1 %v3303_v26, %s3750_s1  ;;  %3314 = vrot.lane.b32.xlu0 %v3313_v2, %s3750_s1 }
 0x63a   :  { %3319 = vrot.lane.b32.xlu2 %v3318_v1, %s3750_s1 }
 0x641   :  { %3309 = vrot.lane.b32.xlu1 %v3303_v26, %s3751_s13  ;;  %3339 = vrot.lane.b32.xlu0 %v3303_v26, %s3748_s11 }
 0x642   :  { %3344 = vrot.lane.b32.xlu2 %v3313_v2, %s3749_s12 }
 0x649   :  { %3324 = vrot.lane.b32.xlu1 %v3303_v26, %s3749_s12  ;;  %3354 = vrot.lane.b32.xlu0 %v3313_v2, %s3748_s11 }
 0x64a   :  { %3359 = vrot.lane.b32.xlu2 %v3318_v1, %s3748_s11 }
 0x651   :  { %3329 = vrot.lane.b32.xlu1 %v3313_v2, %s3751_s13  ;;  %3369 = vrot.lane.b32.xlu0 %v3368_v23, %s3753_s15 }
 0x652   :  { %3374 = vrot.lane.b32.xlu2 %v3373_v54, %s3752_s14 }
 0x659   :  { %3334 = vrot.lane.b32.xlu1 %v3318_v1, %s3751_s13  ;;  %3379 = vrot.lane.b32.xlu0 %v3368_v23, %s3755_s0 }
 0x65a   :  { %3384 = vrot.lane.b32.xlu2 %v3373_v54, %s3753_s15 }
 0x661   :  { %3349 = vrot.lane.b32.xlu1 %v3318_v1, %s3749_s12  ;;  %3389 = vrot.lane.b32.xlu0 %v3368_v23, %s3754_s16 }
 0x662   :  { %3394 = vrot.lane.b32.xlu2 %v3373_v54, %s3755_s0 }
 0x669   :  { %3364 = vrot.lane.b32.xlu1 %v3368_v23, %s3752_s14  ;;  %3399 = vrot.lane.b32.xlu0 %v3373_v54, %s3754_s16 }
 0x66a   :  { %1445 = vrot.lane.b32.xlu2 %v5007_v11, %s3754_s16 }
 0x671   :  { %1517 = vrot.lane.b32.xlu1 %v5007_v11, %s3752_s14  ;;  %1491 = vrot.lane.b32.xlu0 %v5005_v43, %s3753_s15 }
 0x672   :  { %1467 = vrot.lane.b32.xlu2 %v5005_v43, %s3755_s0 }
 0x679   :  { %1493 = vrot.lane.b32.xlu1 %v5007_v11, %s3753_s15 }
 0x681   :  { %1469 = vrot.lane.b32.xlu1 %v5007_v11, %s3755_s0 }
 0x689   :  { %1515 = vrot.lane.b32.xlu1 %v5005_v43, %s3752_s14 }
 0x691   :  { %1443 = vrot.lane.b32.xlu1 %v5005_v43, %s3754_s16 }
 0x694   :  { %v5055_v8 = vpop.permute.xlu2 %3319 }
 0x695   :  { %v3321_v5 = vunpack.i.l.bf16 %v5055_v8 }
 0x69c   :  { %v5074_v52 = vpop.permute.xlu2 %3344 }
 0x69d   :  { %v3347_v9 = vunpack.i.h.bf16 %v5074_v52  ;;  %v3346_v10 = vunpack.i.l.bf16 %v5074_v52 }
 0x69f   :  { %v1577_v2 = vsel %vm402_vm2, %v3346_v10, %v3347_v9 }
 0x6a4   :  { %v5080_v49 = vpop.permute.xlu2 %3359 }
 0x6ab   :  { %v3305_v58 = vpop.permute.xlu1 %3304  ;;  %v5058_v35 = vpop.permute.xlu0 %3314 }
 0x6ac   :  { %v3307_v38 = vunpack.i.h.bf16 %v3305_v58  ;;  %v3306_v46 = vunpack.i.l.bf16 %v3305_v58  ;;  %v3317_v39 = vunpack.i.h.bf16 %v5058_v35  ;;  %v3316_v61 = vunpack.i.l.bf16 %v5058_v35  ;;  %v5103_v26 = vpop.permute.xlu2 %3374 }
 0x6ae   :  { %v1625_v55 = vsel %vm452_vm0, %v3316_v61, %v3317_v39  ;;  %v1624_v42 = vsel %vm452_vm0, %v3317_v39, %v3306_v46  ;;  %v1623_v16 = vsel %vm452_vm0, %v3306_v46, %v3307_v38  ;;  %v1622_v22 = vsel %vm452_vm0, %v3307_v38, %v3321_v5 }
 0x6af   :  { %1701 = vmatpush.msra.mxu0 %v1625_v55  ;;  %1721 = vmatpush.msra.mxu1 %v1624_v42  ;;  %v3761_v55 = vmov 5  }
 0x6b0   :  { %1741 = vmatpush.msrb.mxu2 %v1623_v16  ;;  %1761 = vmatpush.msrb.mxu3 %v1622_v22  ;;  %v3740_v16 = vld [vmem:[%s6124_s7] sm:$0xff] }
 0x6b1   :  { %3403 = vset.pattern.permute.xlu0 %v3761_v55 }
 0x6b2   :  { %1688 = vperm.xlu0 %3403, %v3740_v16  }
 0x6b3   :  { %v3310_v57 = vpop.permute.xlu1 %3309  ;;  %v3340_v17 = vpop.permute.xlu0 %3339 }
 0x6b4   :  { %v3312_v44 = vunpack.i.h.bf16 %v3310_v57  ;;  %v3311_v34 = vunpack.i.l.bf16 %v3310_v57  ;;  %v3342_v6 = vunpack.i.h.bf16 %v3340_v17  ;;  %v3341_v32 = vunpack.i.l.bf16 %v3340_v17  ;;  %v5127_v42 = vpop.permute.xlu2 %3384 }
 0x6b5   :  { %v3361_v57 = vunpack.i.l.bf16 %v5080_v49 }
 0x6b6   :  { %v1599_v30 = vsel %vm427_vm1, %v3311_v34, %v3312_v44  ;;  %v1551_v3 = vsel %vm377_vm3, %v3341_v32, %v3342_v6 }
 0x6b7   :  { %1742 = vmatpush.msrb.mxu2 %v1599_v30  ;;  %v3376_v30 = vunpack.i.l.bf16 %v5103_v26 }
 0x6ba   :  { %3404 = vset.pattern.permute.xlu0 %v3756_v59 }
 0x6bb   :  { %v3325_v13 = vpop.permute.xlu1 %3324  ;;  %v5078_v31 = vpop.permute.xlu0 %3354 }
 0x6bc   :  { %v3327_v25 = vunpack.i.h.bf16 %v3325_v13  ;;  %v3326_v0 = vunpack.i.l.bf16 %v3325_v13  ;;  %v3357_v20 = vunpack.i.h.bf16 %v5078_v31  ;;  %v3356_v24 = vunpack.i.l.bf16 %v5078_v31 }
 0x6be   :  { %v1575_v41 = vsel %vm402_vm2, %v3326_v0, %v3327_v25  ;;  %v1576_v1 = vsel %vm402_vm2, %v3347_v9, %v3326_v0  ;;  %v1553_v23 = vsel %vm377_vm3, %v3356_v24, %v3357_v20  ;;  %v1552_v54 = vsel %vm377_vm3, %v3357_v20, %v3341_v32  ;;  %v5148_v32 = vpop.permute.xlu2 %3394 }
 0x6bf   :  { %1743 = vmatpush.msrb.mxu2 %v1575_v41 }
 0x6c1   :  { %1744 = vmatpush.msrb.mxu2 %v1551_v3 }
 0x6c3   :  { %v5086_v56 = vpop.permute.xlu1 %3329  ;;  %v5088_v37 = vpop.permute.xlu0 %3369  ;;  %1745 = vmatpush.msrb.mxu2 %v5001_v63 }
 0x6c4   :  { %v3332_v45 = vunpack.i.h.bf16 %v5086_v56  ;;  %v3331_v53 = vunpack.i.l.bf16 %v5086_v56  ;;  %v3371_v0 = vunpack.i.l.bf16 %v5088_v37 }
 0x6c6   :  { %v1601_v60 = vsel %vm427_vm1, %v3331_v53, %v3332_v45  ;;  %v1600_v63 = vsel %vm427_vm1, %v3332_v45, %v3311_v34  ;;  %v3377_v34 = vunpack.i.h.bf16 %v5103_v26 }
 0x6c7   :  { %1702 = vmatpush.msra.mxu0 %v1601_v60  ;;  %1722 = vmatpush.msra.mxu1 %v1600_v63  ;;  %v3397_v63 = vunpack.i.h.bf16 %v5148_v32 }
 0x6c9   :  { %1703 = vmatpush.msra.mxu0 %v1577_v2  ;;  %1723 = vmatpush.msra.mxu1 %v1576_v1  ;;  %v3396_v2 = vunpack.i.l.bf16 %v5148_v32 }
 0x6cb   :  { %v5117_v58 = vpop.permute.xlu1 %3334  ;;  %v3380_v38 = vpop.permute.xlu0 %3379  ;;  %1704 = vmatpush.msra.mxu0 %v1553_v23  ;;  %1724 = vmatpush.msra.mxu1 %v1552_v54 }
 0x6cc   :  { %v3336_v46 = vunpack.i.l.bf16 %v5117_v58  ;;  %v3382_v9 = vunpack.i.h.bf16 %v3380_v38  ;;  %v3381_v59 = vunpack.i.l.bf16 %v3380_v38 }
 0x6cd   :  { %1705 = vmatpush.msra.mxu0 %v4997_v19  ;;  %1725 = vmatpush.msra.mxu1 %v4999_v28 }
 0x6ce   :  { %v1598_v39 = vsel %vm427_vm1, %v3312_v44, %v3336_v46  ;;  %v1550_v44 = vsel %vm377_vm3, %v3342_v6, %v3361_v57  ;;  %v3386_v6 = vunpack.i.l.bf16 %v5127_v42 }
 0x6cf   :  { %1762 = vmatpush.msrb.mxu3 %v1598_v39 }
 0x6d0   :  { %v1499_v23 = vsel %vm6159_vm10, %v3386_v6, %v3371_v0  ;;  %vm6170_vm10 = vmmov %vm6169_vm6 }
 0x6d3   :  { %v5132_v22 = vpop.permute.xlu1 %3349  ;;  %v3390_v19 = vpop.permute.xlu0 %3389 }
 0x6d4   :  { %v3351_v28 = vunpack.i.l.bf16 %v5132_v22  ;;  %v3392_v38 = vunpack.i.h.bf16 %v3390_v19  ;;  %v3391_v39 = vunpack.i.l.bf16 %v3390_v19  ;;  %v1473_v19 = vsel %vm6164_vm14, %v3382_v9, %v3397_v63  ;;  %vm6174_vm14 = vmmov %vm6160_vm5 }
 0x6d6   :  { %v1574_v17 = vsel %vm402_vm2, %v3327_v25, %v3351_v28  ;;  %v3372_v25 = vunpack.i.h.bf16 %v5088_v37  ;;  %v3387_v37 = vunpack.i.h.bf16 %v5127_v42 }
 0x6d7   :  { %1763 = vmatpush.msrb.mxu3 %v1574_v17 }
 0x6d8   :  { %v1498_v54 = vsel %vm6160_vm5, %v3371_v0, %v3372_v25  ;;  %v1497_v17 = vsel %vm6161_vm11, %v3372_v25, %v3387_v37  ;;  %vm6171_vm11 = vmmov %vm6162_vm12 }
 0x6d9   :  { %1764 = vmatpush.msrb.mxu3 %v1550_v44  ;;  %v1475_v44 = vsel %vm6162_vm12, %v3396_v2, %v3381_v59  ;;  %vm6172_vm12 = vmmov %vm6167_vm7 }
 0x6db   :  { %v3365_v13 = vpop.permute.xlu1 %3364  ;;  %1765 = vmatpush.msrb.mxu3 %v5003_v33  ;;  %v5153_v45 = vpop.permute.xlu0 %3399 }
 0x6dc   :  { %v3367_v41 = vunpack.i.h.bf16 %v3365_v13  ;;  %v3366_v3 = vunpack.i.l.bf16 %v3365_v13  ;;  %v3401_v1 = vunpack.i.l.bf16 %v5153_v45  ;;  %v3402_v16 = vunpack.i.h.bf16 %v5153_v45 }
 0x6dd   :  { %v1474_v13 = vsel %vm6163_vm13, %v3381_v59, %v3382_v9  ;;  %v3322_v59 = vunpack.i.h.bf16 %v5055_v8  ;;  %v1450_v9 = vsel %vm6166_vm8, %v3391_v39, %v3392_v38  ;;  %vm6173_vm13 = vmmov %vm6169_vm6 }
 0x6de   :  { %v1523_v20 = vsel %vm346_vm4, %v3376_v30, %v3366_v3  ;;  %v1522_v33 = vsel %vm346_vm4, %v3366_v3, %v3367_v41  ;;  %v1521_v60 = vsel %vm346_vm4, %v3367_v41, %v3377_v34  ;;  %v1451_v25 = vsel %vm6165_vm15, %v3401_v1, %v3391_v39  ;;  %v5191_v3 = vld [vmem:[%s6127_s6] sm:$0xff]  ;;  %v1446_v39 = vpop.permute.xlu2 %1445  ;;  %vm6175_vm15 = vmmov %vm6171_vm11 }
 0x6df   :  { %1726 = vmatpush.msra.mxu1 %v1523_v20  ;;  %1746 = vmatpush.msrb.mxu2 %v1522_v33  ;;  %v3337_v20 = vunpack.i.h.bf16 %v5117_v58  ;;  %v3352_v33 = vunpack.i.h.bf16 %v5132_v22  ;;  %v1621_v31 = vsel %vm452_vm0, %v3321_v5, %v3322_v59  ;;  %vm6176_vm8 = vmmov %vm6160_vm5 }
 0x6e0   :  { %1766 = vmatpush.msrb.mxu3 %v1521_v60  ;;  %v1626_v60 = vsel %vm452_vm0, %v3322_v59, %v3316_v61 }
 0x6e1   :  { %1727 = vmatpush.msra.mxu1 %v1499_v23  ;;  %1747 = vmatpush.msrb.mxu2 %v1498_v54  ;;  %v1602_v23 = vsel %vm427_vm1, %v3337_v20, %v3331_v53  ;;  %v3362_v54 = vunpack.i.h.bf16 %v5080_v49  ;;  %v1578_v35 = vsel %vm402_vm2, %v3352_v33, %v3346_v10  ;;  %v1452_v10 = vsel %vm6172_vm12, %v1446_v39, %v3401_v1 }
 0x6e2   :  { %1767 = vmatpush.msrb.mxu3 %v1497_v17 }
 0x6e3   :  { %v1518_v41 = vpop.permute.xlu1 %1517  ;;  %1728 = vmatpush.msra.mxu1 %v1475_v44  ;;  %1748 = vmatpush.msrb.mxu2 %v1474_v13  ;;  %v1554_v56 = vsel %vm377_vm3, %v3362_v54, %v3356_v24  ;;  %v1492_v8 = vpop.permute.xlu0 %1491  ;;  %v1549_v5 = vsel %vm377_vm3, %v3361_v57, %v3362_v54 }
 0x6e4   :  { %1768 = vmatpush.msrb.mxu3 %v1473_v19  ;;  %v1524_v0 = vsel %vm346_vm4, %v1518_v41, %v3376_v30  ;;  %v1449_v30 = vsel %vm6167_vm7, %v3392_v38, %v3402_v16  ;;  %v1496_v57 = vsel %vm6176_vm8, %v3387_v37, %v1492_v8 }
 0x6e5   :  { %1706 = vmatpush.msra.mxu0 %v1524_v0  ;;  %1729 = vmatpush.msra.mxu1 %v1451_v25 }
 0x6e6   :  { %1749 = vmatpush.msrb.mxu2 %v1450_v9  ;;  %1769 = vmatpush.msrb.mxu3 %v1449_v30 }
 0x6e7   :  { %3031 = vmatmul.msk.f32.vlgmr.msra.gmra.mxu1 %vm6168_vm9, %v5191_v3  ;;  %3032 = vmatmul.msk.f32.vlgmr.msrb.gmra.mxu2 %vm6169_vm6, %v5191_v3  ;;  %vm6177_vm9 = vmmov %vm6171_vm11 }
 0x6e8   :  { %3033 = vmatmul.msk.f32.vlgmr.msrb.gmra.mxu3 %vm6170_vm10, %v5191_v3  ;;  %1801 = vmatpush.msrb.mxu1 %v1626_v60  ;;  %vm6178_vm10 = vmmov %vm6167_vm7 }
 0x6ea   :  { %1802 = vmatpush.msrb.mxu1 %v1602_v23 }
 0x6eb   :  { %v1494_v38 = vpop.permute.xlu1 %1493 }
 0x6ec   :  { %1803 = vmatpush.msrb.mxu1 %v1578_v35  ;;  %v1500_v61 = vsel %vm6160_vm5, %v1494_v38, %v3386_v6  ;;  %v1573_v6 = vsel %vm402_vm2, %v3351_v28, %v3352_v33  ;;  %v1495_v58 = vsel %vm6174_vm14, %v1492_v8, %v1494_v38  ;;  %vm6179_vm5 = vmmov %vm6169_vm6 }
 0x6ed   :  { %1707 = vmatpush.msra.mxu0 %v1500_v61 }
 0x6ee   :  { %1804 = vmatpush.msrb.mxu1 %v1554_v56 }
 0x6f0   :  { %1805 = vmatpush.msrb.mxu1 %v5007_v11  ;;  %v1597_v11 = vsel %vm427_vm1, %v3336_v46, %v3337_v20  ;;  %v1468_v46 = vpop.permute.xlu2 %1467 }
 0x6f3   :  { %v1470_v53 = vpop.permute.xlu1 %1469 }
 0x6f4   :  { %v1476_v52 = vsel %vm6171_vm11, %v1470_v53, %v3396_v2  ;;  %v1471_v22 = vsel %vm6175_vm15, %v1468_v46, %v1470_v53 }
 0x6f5   :  { %1708 = vmatpush.msra.mxu0 %v1476_v52 }
 0x6f7   :  { %1709 = vmatpush.msra.mxu0 %v1452_v10 }
 0x6f8   :  { %3030 = vmatmul.msk.f32.vlgmr.msra.gmra.mxu0 %vm6173_vm13, %v5191_v3 }
 0x6f9   :  { %1781 = vmatpush.msrb.mxu0 %v1621_v31 }
 0x6fb   :  { %1782 = vmatpush.msrb.mxu0 %v1597_v11  ;;  %v1516_v24 = vpop.permute.xlu1 %1515 }
 0x6fc   :  { %v1519_v2 = vsel %vm346_vm4, %v1516_v24, %v1518_v41  ;;  %v1520_v49 = vsel %vm346_vm4, %v3377_v34, %v1516_v24 }
 0x6fd   :  { %1783 = vmatpush.msrb.mxu0 %v1573_v6  ;;  %1806 = vmatpush.msrb.mxu1 %v1519_v2 }
 0x6ff   :  { %1784 = vmatpush.msrb.mxu0 %v1549_v5  ;;  %1807 = vmatpush.msrb.mxu1 %v1495_v58 }
 0x701   :  { %1785 = vmatpush.msrb.mxu0 %v5005_v43  ;;  %1808 = vmatpush.msrb.mxu1 %v1471_v22  ;;  %v1472_v43 = vsel %vm6177_vm9, %v3397_v63, %v1468_v46 }
 0x703   :  { %1786 = vmatpush.msrb.mxu0 %v1520_v49  ;;  %v1444_v28 = vpop.permute.xlu1 %1443 }
 0x704   :  { %v1447_v1 = vsel %vm6167_vm7, %v1444_v28, %v1446_v39  ;;  %v1448_v26 = vsel %vm6178_vm10, %v3402_v16, %v1444_v28 }
 0x705   :  { %1787 = vmatpush.msrb.mxu0 %v1496_v57  ;;  %1809 = vmatpush.msrb.mxu1 %v1447_v1 }
 0x706   :  { %3035 = vmatmul.msk.f32.vlgmr.msrb.gmra.mxu1 %vm6169_vm6, %v5191_v3 }
 0x707   :  { %1788 = vmatpush.msrb.mxu0 %v1472_v43 }
 0x709   :  { %1789 = vmatpush.msrb.mxu0 %v1448_v26 }
 0x70a   :  { %3034 = vmatmul.msk.f32.vlgmr.msrb.gmra.mxu0 %vm6179_vm5, %v5191_v3 }
 0x724   :  { %v1689_v42 = vpop.permute.xlu0 %1688 }
 0x764   :  { %v1731_v34 = vpop.f32.mrf.mxu1 }
 0x765   :  { %v1732_v37 = vadd.f32 %v1731_v34, %v1689_v42 }
 0x767   :  { %v5280_v32 = vadd.f32 %v1732_v37, %v4439_v51 }
 0x769   :  { %v3038_v63 = vmul.f32 -1.442695, %v5280_v32 }
 0x76a   :  { %v1751_v17 = vpop.f32.mrf.mxu2 }
 0x76b   :  { %v1752_v44 = vadd.f32 %v1751_v17, %v1689_v42  ;;  %v1771_v13 = vpop.f32.mrf.mxu3  ;;  %3682 = vpow2.f32 %v3038_v63 }
 0x76c   :  { %v1772_v45 = vadd.f32 %v1771_v13, %v1689_v42 }
 0x76d   :  { %v5284_v41 = vadd.f32 %v1752_v44, %v4443_v62 }
 0x76e   :  { %v5287_v16 = vadd.f32 %v1772_v45, %v4445_v4 }
 0x76f   :  { %v3039_v19 = vmul.f32 -1.442695, %v5284_v41 }
 0x770   :  { %v3040_v0 = vmul.f32 -1.442695, %v5287_v16 }
 0x771   :  { %3684 = vpow2.f32 %v3039_v19  ;;  %v3683_v51 = vpop.eup %3682 }
 0x772   :  { %v1841_v25 = vadd.f32 1.0, %v3683_v51  ;;  %3686 = vpow2.f32 %v3040_v0 }
 0x774   :  { %3688 = vrcp.f32 %v1841_v25  ;;  %v1870_v58 = vand.u32 2147483647, %v1841_v25  ;;  %vm1866_vm12 = vweird.f32 %v1841_v25  ;;  %v1872_v28 = vand.u32 2147483648, %v1841_v25 }
 0x775   :  { %v1711_v3 = vpop.f32.mrf.mxu0 }
 0x776   :  { %v1712_v59 = vadd.f32 %v1711_v3, %v1689_v42  ;;  %vm5324_vm14 = vcmp.eq.f32.partialorder %v1870_v58, 8.507059e+37  ;;  %v1873_v13 = vor.u32 1.1754944e-38, %v1872_v28 }
 0x777   :  { %v3685_v20 = vpop.eup %3684 }
 0x778   :  { %v5292_v9 = vadd.f32 %v1712_v59, %v4437_v47  ;;  %v5294_v62 = vadd.f32 1.0, %v3685_v20  ;;  %v3687_v30 = vpop.eup %3686 }
 0x779   :  { %v5298_v33 = vadd.f32 1.0, %v3687_v30 }
 0x77a   :  { %v3037_v4 = vmul.f32 -1.442695, %v5292_v9  ;;  %3690 = vrcp.f32 %v5294_v62  ;;  %v3689_v60 = vpop.eup %3688  ;;  %vm1881_vm7 = vweird.f32 %v5294_v62  ;;  %v1887_v19 = vand.u32 2147483648, %v5294_v62 }
 0x77b   :  { %v1862_v23 = vmul.f32 %v3689_v60, %v1841_v25  ;;  %vm1867_vm11 = vweird.f32 %v3689_v60  ;;  %v1885_v3 = vand.u32 2147483647, %v5294_v62 }
 0x77c   :  { %3692 = vpow2.f32 %v3037_v4  ;;  %vm5318_vm13 = vmor %vm1866_vm12, %vm1867_vm11  ;;  %vm1896_vm12 = vweird.f32 %v5298_v33 }
 0x77d   :  { %3694 = vrcp.f32 %v5298_v33  ;;  %v1863_v61 = vsub.f32 1.0, %v1862_v23 }
 0x77f   :  { %v1864_v24 = vmul.f32 %v3689_v60, %v1863_v61  ;;  %v1900_v61 = vand.u32 2147483647, %v5298_v33 }
 0x780   :  { %v5301_v35 = vpop.eup %3690 }
 0x781   :  { %v1877_v10 = vmul.f32 %v5301_v35, %v5294_v62  ;;  %v1865_v5 = vadd.f32 %v3689_v60, %v1864_v24  ;;  %vm1882_vm8 = vweird.f32 %v5301_v35  ;;  %v1902_v62 = vand.u32 2147483648, %v5298_v33 }
 0x782   :  { %v3693_v47 = vpop.eup %3692  ;;  %vm5337_vm5 = vmor %vm1881_vm7, %vm1882_vm8 }
 0x783   :  { %v1811_v54 = vpop.f32.mrf.mxu1  ;;  %v1840_v56 = vadd.f32 1.0, %v3693_v47  ;;  %v5306_v39 = vpop.eup %3694  ;;  %v1878_v2 = vsub.f32 1.0, %v1877_v10  ;;  %v1869_v26 = vsel %vm5318_vm13, %v3689_v60, %v1865_v5  ;;  %v1888_v47 = vor.u32 1.1754944e-38, %v1887_v19 }
 0x784   :  { %v1812_v38 = vadd.f32 %v1811_v54, %v1689_v42  ;;  %v1892_v6 = vmul.f32 %v5306_v39, %v5298_v33  ;;  %v1874_v25 = vsel %vm5324_vm14, %v1873_v13, %v1869_v26  ;;  %vm1897_vm6 = vweird.f32 %v5306_v39 }
 0x785   :  { %3696 = vrcp.f32 %v1840_v56  ;;  %v1879_v57 = vmul.f32 %v5301_v35, %v1878_v2  ;;  %v1857_v34 = vand.u32 2147483648, %v1840_v56  ;;  %v1855_v44 = vand.u32 2147483647, %v1840_v56  ;;  %vm1898_vm14 = vmor %vm1896_vm12, %vm1897_vm6 }
 0x786   :  { %v5304_v53 = vadd.f32 %v1812_v38, %v4449_v15  ;;  %v1893_v22 = vsub.f32 1.0, %v1892_v6  ;;  %vm1851_vm9 = vweird.f32 %v1840_v56  ;;  %v1937_v38 = vmul.f32 %v1874_v25, %v5280_v32 }
 0x787   :  { %v1791_v52 = vpop.f32.mrf.mxu0  ;;  %v1880_v45 = vadd.f32 %v5301_v35, %v1879_v57  ;;  %v1858_v59 = vor.u32 1.1754944e-38, %v1857_v34  ;;  %vm1856_vm11 = vcmp.eq.f32.partialorder %v1855_v44, 8.507059e+37  ;;  %vm1886_vm13 = vcmp.eq.f32.partialorder %v1885_v3, 8.507059e+37 }
 0x788   :  { %v3042_v31 = vmul.f32 -1.442695, %v5304_v53  ;;  %v1792_v11 = vadd.f32 %v1791_v52, %v1689_v42  ;;  %v1894_v63 = vmul.f32 %v5306_v39, %v1893_v22  ;;  %v5354_v24 = vmul.f32 %v4970_v27, %v1937_v38 }
 0x789   :  { %v1884_v23 = vsel %vm5337_vm5, %v5301_v35, %v1880_v45 }
 0x78a   :  { %3698 = vpow2.f32 %v3042_v31  ;;  %v5314_v8 = vadd.f32 %v1792_v11, %v4447_v14  ;;  %v1895_v30 = vadd.f32 %v5306_v39, %v1894_v63  ;;  %v1889_v10 = vsel %vm1886_vm13, %v1888_v47, %v1884_v23 }
 0x78b   :  { %v3697_v15 = vpop.eup %3696  ;;  %v1903_v11 = vor.u32 1.1754944e-38, %v1902_v62  ;;  %v1938_v33 = vmul.f32 %v1889_v10, %v5284_v41  ;;  %v1956_v28 = vmul.f32 %v5354_v24, %v5354_v24 }
 0x78c   :  { %v3041_v46 = vmul.f32 -1.442695, %v5314_v8  ;;  %v1847_v49 = vmul.f32 %v3697_v15, %v1840_v56  ;;  %vm1852_vm15 = vweird.f32 %v3697_v15  ;;  %v1899_v35 = vsel %vm1898_vm14, %v5306_v39, %v1895_v30 }
 0x78d   :  { %vm1853_vm10 = vmor %vm1851_vm9, %vm1852_vm15  ;;  %vm1901_vm15 = vcmp.eq.f32.partialorder %v1900_v61, 8.507059e+37  ;;  %v5363_v57 = vmul.f32 %v4976_v50, %v1938_v33 }
 0x78e   :  { %3700 = vpow2.f32 %v3041_v46  ;;  %v1848_v14 = vsub.f32 1.0, %v1847_v49  ;;  %v1904_v2 = vsel %vm1901_vm15, %v1903_v11, %v1899_v35 }
 0x790   :  { %v3699_v1 = vpop.eup %3698  ;;  %v1849_v17 = vmul.f32 %v3697_v15, %v1848_v14 }
 0x791   :  { %v1845_v37 = vadd.f32 1.0, %v3699_v1  ;;  %v1939_v1 = vmul.f32 %v1904_v2, %v5287_v16 }
 0x792   :  { %v1850_v0 = vadd.f32 %v3697_v15, %v1849_v17 }
 0x793   :  { %3702 = vrcp.f32 %v1845_v37  ;;  %v1930_v46 = vand.u32 2147483647, %v1845_v37  ;;  %v1932_v22 = vand.u32 2147483648, %v1845_v37  ;;  %vm1926_vm7 = vweird.f32 %v1845_v37 }
 0x794   :  { %v3701_v51 = vpop.eup %3700  ;;  %v1854_v4 = vsel %vm1853_vm10, %v3697_v15, %v1850_v0  ;;  %v5371_v19 = vmul.f32 %v4982_v7, %v1939_v1  ;;  %v5386_v1 = vld [vmem:[%s6124_s7 + $0x8] sm:$0xff] }
 0x795   :  { %v1844_v60 = vadd.f32 1.0, %v3701_v51  ;;  %v1859_v54 = vsel %vm1856_vm11, %v1858_v59, %v1854_v4  ;;  %vm1931_vm6 = vcmp.eq.f32.partialorder %v1930_v46, 8.507059e+37  ;;  %v1933_v42 = vor.u32 1.1754944e-38, %v1932_v22 }
 0x796   :  { %v1936_v52 = vmul.f32 %v1859_v54, %v5292_v9  ;;  %v1957_v51 = vmul.f32 %v5363_v57, %v5363_v57  ;;  %v1958_v54 = vmul.f32 %v5371_v19, %v5371_v19 }
 0x797   :  { %3704 = vrcp.f32 %v1844_v60  ;;  %v1917_v34 = vand.u32 2147483648, %v1844_v60  ;;  %vm1911_vm5 = vweird.f32 %v1844_v60 }
 0x798   :  { %v5358_v15 = vmul.f32 %v4964_v12, %v1936_v52 }
 0x799   :  { %v3703_v56 = vpop.eup %3702  ;;  %v1918_v0 = vor.u32 1.1754944e-38, %v1917_v34 }
 0x79a   :  { %v1922_v31 = vmul.f32 %v3703_v56, %v1845_v37  ;;  %vm1927_vm8 = vweird.f32 %v3703_v56  ;;  %v1955_v14 = vmul.f32 %v5358_v15, %v5358_v15  ;;  %v1915_v37 = vand.u32 2147483647, %v1844_v60 }
 0x79b   :  { %vm1928_vm9 = vmor %vm1926_vm7, %vm1927_vm8  ;;  %v1948_v17 = vadd.f32 %v5354_v24, %v5358_v15  ;;  %vm6186_vm8 = vcmp.lt.s32.totalorder %v4178_v48, 17 }
 0x79c   :  { %v1923_v6 = vsub.f32 1.0, %v1922_v31  ;;  %v1961_v45 = vadd.f32 %v1956_v28, %v1955_v14  ;;  %vm1916_vm12 = vcmp.eq.f32.partialorder %v1915_v37, 8.507059e+37  ;;  %vm6187_vm7 = vmmov %vm6186_vm8 }
 0x79d   :  { %v3705_v5 = vpop.eup %3704  ;;  %v1949_v59 = vadd.f32 %v1948_v17, %v5363_v57 }
 0x79e   :  { %v1924_v58 = vmul.f32 %v3703_v56, %v1923_v6  ;;  %v1907_v49 = vmul.f32 %v3705_v5, %v1844_v60  ;;  %vm1912_vm10 = vweird.f32 %v3705_v5  ;;  %v1962_v4 = vadd.f32 %v1961_v45, %v1957_v51 }
 0x79f   :  { %vm1913_vm11 = vmor %vm1911_vm5, %vm1912_vm10  ;;  %v1950_v62 = vadd.f32 %v1949_v59, %v5371_v19  ;;  %vm6190_vm10 = vcmp.lt.s32.totalorder %v4178_v48, 19 }
 0x7a0   :  { %v1925_v39 = vadd.f32 %v3703_v56, %v1924_v58  ;;  %v1908_v43 = vsub.f32 1.0, %v1907_v49  ;;  %v1963_v61 = vadd.f32 %v1962_v4, %v1958_v54  ;;  %vm6191_vm5 = vmmov %vm6190_vm10 }
 0x7a2   :  { %v1929_v26 = vsel %vm1928_vm9, %v3703_v56, %v1925_v39  ;;  %v1909_v63 = vmul.f32 %v3705_v5, %v1908_v43  ;;  %vm6188_vm9 = vcmp.lt.s32.totalorder %v4178_v48, 18 }
 0x7a3   :  { %v1934_v44 = vsel %vm1931_vm6, %v1933_v42, %v1929_v26  ;;  %vm6189_vm6 = vmmov %vm6188_vm9 }
 0x7a4   :  { %v1910_v13 = vadd.f32 %v3705_v5, %v1909_v63  ;;  %v1941_v25 = vmul.f32 %v1934_v44, %v5304_v53 }
 0x7a6   :  { %v1914_v3 = vsel %vm1913_vm11, %v3705_v5, %v1910_v13  ;;  %v1947_v23 = vmul.f32 %v4994_v36, %v1941_v25  ;;  %vm6192_vm11 = vcmask 588800  }
 0x7a7   :  { %v1919_v20 = vsel %vm1916_vm12, %v1918_v0, %v1914_v3  ;;  %vm6193_vm12 = vmmov %vm6192_vm11 }
 0x7a8   :  { %v1940_v30 = vmul.f32 %v1919_v20, %v5314_v8  ;;  %v1960_v52 = vmul.f32 %v1947_v23, %v1947_v23 }
 0x7aa   :  { %v1946_v60 = vmul.f32 %v4988_v29, %v1940_v30 }
 0x7ac   :  { %v1951_v38 = vadd.f32 %v1950_v62, %v1946_v60  ;;  %v1959_v47 = vmul.f32 %v1946_v60, %v1946_v60 }
 0x7ae   :  { %v1952_v56 = vadd.f32 %v1951_v38, %v1947_v23  ;;  %v1964_v10 = vadd.f32 %v1963_v61, %v1959_v47 }
 0x7b0   :  { %1953 = vadd.xlane.f32.xlu2 %v1952_v56  ;;  %v1965_v35 = vadd.f32 %v1964_v10, %v1960_v52 }
 0x7b2   :  { %1966 = vadd.xlane.f32.xlu1 %v1965_v35 }
 0x823   :  { %v1954_v31 = vpop.xlane.xlu2 %1953 }
 0x824   :  { %v1968_v11 = vmul.f32 0.001953125, %v1954_v31 }
 0x825   :  { %v1967_v6 = vpop.xlane.xlu1 %1966 }
 0x826   :  { %v1970_v33 = vmul.f32 %v1968_v11, %v1968_v11  ;;  %v1969_v2 = vmul.f32 0.001953125, %v1967_v6 }
 0x828   :  { %v1971_v5 = vsub.f32 %v1969_v2, %v1970_v33 }
 0x82a   :  { %v1972_v58 = vadd.f32 1e-05, %v1971_v5 }
 0x82c   :  { %3706 = vrsqrt.f32 %v1972_v58  ;;  %vm1979_vm14 = vweird.f32 %v1972_v58 }
 0x832   :  { %v3707_v46 = vpop.eup %3706 }
 0x833   :  { %v1974_v22 = vmul.f32 %v3707_v46, %v1972_v58  ;;  %vm1980_vm13 = vweird.f32 %v3707_v46 }
 0x834   :  { %vm1981_vm15 = vmor %vm1979_vm14, %vm1980_vm13 }
 0x835   :  { %v1975_v49 = vmul.f32 %v3707_v46, %v1974_v22  ;;  %vm6194_vm13 = vmmov %vm6187_vm7 }
 0x836   :  { %vm6195_vm14 = vmmov %vm6187_vm7 }
 0x837   :  { %v1976_v39 = vmul.f32 0.5, %v1975_v49 }
 0x839   :  { %v1977_v28 = vsub.f32 1.5, %v1976_v39 }
 0x83b   :  { %v1978_v43 = vmul.f32 %v3707_v46, %v1977_v28 }
 0x83d   :  { %v1982_v14 = vsel %vm1981_vm15, %v3707_v46, %v1978_v43  ;;  %vm6196_vm15 = vmmov %vm6189_vm6 }
 0x83e   :  { %v1983_v26 = vmul.f32 %v5386_v1, %v1982_v14 }
 0x840   :  { %v1984_v42 = vmul.f32 %v1983_v26, %v1968_v11 }
 0x842   :  { %1986 = vrot.lane.b32.xlu0 %v1984_v42, %s3752_s14 }
 0x84a   :  { %1992 = vperm.xlu0 %3404, %v1983_v26  }
 0x852   :  { %3405 = vset.pattern.permute.xlu0 %v3757_v40 }
 0x8b4   :  { %v1987_v34 = vpop.permute.xlu0 %1986 }
 0x8b5   :  { %v1989_v63 = vsub.f32 %v5386_v1, %v1987_v34 }
 0x8b7   :  { %2003 = vperm.xlu0 %3405, %v1989_v63  }
 0x8bc   :  { %v1993_v37 = vpop.permute.xlu0 %1992 }
 0x8bd   :  { %v1995_v17 = vmul.f32 %v1993_v37, %v5358_v15  ;;  %v1996_v44 = vmul.f32 %v1993_v37, %v5354_v24  ;;  %v1997_v45 = vmul.f32 %v1993_v37, %v5363_v57  ;;  %v1999_v25 = vmul.f32 %v1993_v37, %v1946_v60 }
 0x8be   :  { %v1998_v4 = vmul.f32 %v1993_v37, %v5371_v19 }
 0x8bf   :  { %3629 = vset.pattern.permute.xlu0 %v3761_v55 }
 0x929   :  { %v2004_v13 = vpop.permute.xlu0 %2003 }
 0x92a   :  { %v2006_v0 = vmul.f32 %v4964_v12, %v2004_v13  ;;  %v2007_v51 = vmul.f32 %v4970_v27, %v2004_v13  ;;  %v2008_v40 = vmul.f32 %v4976_v50, %v2004_v13  ;;  %v2010_v3 = vmul.f32 %v4988_v29, %v2004_v13 }
 0x92b   :  { %v2011_v27 = vmul.f32 %v4994_v36, %v2004_v13  ;;  %v2000_v50 = vmul.f32 %v1993_v37, %v1947_v23  ;;  %v2009_v57 = vmul.f32 %v4982_v7, %v2004_v13 }
 0x92c   :  { %v5400_v59 = vadd.f32 %v2006_v0, %v1995_v17  ;;  %v5402_v55 = vadd.f32 %v2007_v51, %v1996_v44  ;;  %v5404_v20 = vadd.f32 %v2008_v40, %v1997_v45  ;;  %v5406_v15 = vadd.f32 %v2010_v3, %v1999_v25 }
 0x92d   :  { %v5419_v29 = vadd.f32 %v2011_v27, %v2000_v50  ;;  %v5428_v36 = vadd.f32 %v2009_v57, %v1998_v4 }
 0x92e   :  { %v3411_v24 = vpack.i.bf16 %v5402_v55, %v5400_v59  ;;  %v3416_v12 = vpack.i.bf16 %v5406_v15, %v5404_v20  ;;  %v3511_v7 = vpack.i.bf16 %v5404_v20, %v5406_v15 }
 0x92f   :  { %v3451_v30 = vpack.i.bf16 %v5419_v29, %v5400_v59  ;;  %v3466_v60 = vpack.i.bf16 %v5428_v36, %v5402_v55  ;;  %v3456_v23 = vpack.i.bf16 %v5428_v36, %v5419_v29 }
 0x930   :  { %3412 = vrot.lane.b32.xlu1 %v3411_v24, %s3751_s13  ;;  %3407 = vrot.lane.b32.xlu2 %v3411_v24, %s3750_s1 }
 0x931   :  { %3417 = vrot.lane.b32.xlu0 %v3416_v12, %s3750_s1 }
 0x938   :  { %3437 = vrot.lane.b32.xlu1 %v3416_v12, %s3749_s12  ;;  %3427 = vrot.lane.b32.xlu2 %v3416_v12, %s3751_s13 }
 0x939   :  { %3422 = vrot.lane.b32.xlu0 %v3411_v24, %s3749_s12 }
 0x940   :  { %3452 = vrot.lane.b32.xlu1 %v3451_v30, %s3752_s14  ;;  %3442 = vrot.lane.b32.xlu2 %v3416_v12, %s3748_s11 }
 0x941   :  { %3432 = vrot.lane.b32.xlu0 %v3411_v24, %s3748_s11 }
 0x948   :  { %3467 = vrot.lane.b32.xlu1 %v3466_v60, %s3752_s14  ;;  %3457 = vrot.lane.b32.xlu2 %v3456_v23, %s3751_s13 }
 0x949   :  { %3447 = vrot.lane.b32.xlu0 %v3456_v23, %s3750_s1 }
 0x950   :  { %3482 = vrot.lane.b32.xlu1 %v3466_v60, %s3753_s15  ;;  %3472 = vrot.lane.b32.xlu2 %v3456_v23, %s3749_s12 }
 0x951   :  { %3462 = vrot.lane.b32.xlu0 %v3451_v30, %s3753_s15 }
 0x958   :  { %3497 = vrot.lane.b32.xlu1 %v3466_v60, %s3755_s0  ;;  %3487 = vrot.lane.b32.xlu2 %v3456_v23, %s3748_s11 }
 0x959   :  { %3477 = vrot.lane.b32.xlu0 %v3451_v30, %s3755_s0 }
 0x960   :  { %3512 = vrot.lane.b32.xlu1 %v3511_v7, %s3753_s15  ;;  %3502 = vrot.lane.b32.xlu2 %v3466_v60, %s3754_s16 }
 0x961   :  { %3492 = vrot.lane.b32.xlu0 %v3451_v30, %s3754_s16 }
 0x968   :  { %3517 = vrot.lane.b32.xlu2 %v3511_v7, %s3755_s0  ;;  %2274 = vperm.xlu1 %3526, %v5386_v1  }
 0x969   :  { %3507 = vrot.lane.b32.xlu0 %v3511_v7, %s3752_s14 }
 0x970   :  { %3527 = vset.pattern.permute.xlu1 %v3759_v18 }
 0x971   :  { %3522 = vrot.lane.b32.xlu0 %v3511_v7, %s3754_s16 }
 0x98a   :  { %v5453_v19 = vpop.permute.xlu2 %3407 }
 0x98b   :  { %v3410_v62 = vunpack.i.h.bf16 %v5453_v19  ;;  %v3409_v54 = vunpack.i.l.bf16 %v5453_v19 }
 0x98d   :  { %v2210_v38 = vsel %vm452_vm0, %v3409_v54, %v3410_v62 }
 0x98e   :  { %2287 = vmatpush.msra.mxu2 %v2210_v38 }
 0x992   :  { %v5461_v47 = vpop.permute.xlu2 %3427 }
 0x993   :  { %v3429_v11 = vunpack.i.l.bf16 %v5461_v47 }
 0x99a   :  { %v5463_v61 = vpop.permute.xlu2 %3442 }
 0x99b   :  { %v3444_v42 = vunpack.i.l.bf16 %v5463_v61  ;;  %v3445_v7 = vunpack.i.h.bf16 %v5463_v61 }
 0x9a2   :  { %v5465_v56 = vpop.permute.xlu1 %3412  ;;  %v5481_v2 = vpop.permute.xlu2 %3457 }
 0x9a3   :  { %v5467_v18 = vpop.permute.xlu0 %3417  ;;  %v3415_v52 = vunpack.i.h.bf16 %v5465_v56  ;;  %v3414_v10 = vunpack.i.l.bf16 %v5465_v56  ;;  %v3460_v3 = vunpack.i.h.bf16 %v5481_v2 }
 0x9a4   :  { %v3419_v35 = vunpack.i.l.bf16 %v5467_v18  ;;  %v3420_v25 = vunpack.i.h.bf16 %v5467_v18 }
 0x9a5   :  { %v2186_v31 = vsel %vm427_vm1, %v3414_v10, %v3415_v52  ;;  %v2185_v33 = vsel %vm427_vm1, %v3415_v52, %v3429_v11  ;;  %v2184_v60 = vsel %vm427_vm1, %v3429_v11, %v3460_v3 }
 0x9a6   :  { %2288 = vmatpush.msra.mxu2 %v2186_v31  ;;  %v2209_v6 = vsel %vm452_vm0, %v3410_v62, %v3419_v35 }
 0x9a7   :  { %2307 = vmatpush.msra.mxu3 %v2209_v6 }
 0x9a9   :  { %2308 = vmatpush.msra.mxu3 %v2185_v33 }
 0x9aa   :  { %v5483_v5 = vpop.permute.xlu1 %3437  ;;  %v5498_v14 = vpop.permute.xlu2 %3472 }
 0x9ab   :  { %v5485_v58 = vpop.permute.xlu0 %3422  ;;  %v3439_v46 = vunpack.i.l.bf16 %v5483_v5  ;;  %v3440_v27 = vunpack.i.h.bf16 %v5483_v5  ;;  %v3475_v50 = vunpack.i.h.bf16 %v5498_v14 }
 0x9ac   :  { %v3425_v22 = vunpack.i.h.bf16 %v5485_v58  ;;  %v3424_v49 = vunpack.i.l.bf16 %v5485_v58 }
 0x9ad   :  { %v2160_v38 = vsel %vm402_vm2, %v3439_v46, %v3475_v50  ;;  %v2159_v52 = vsel %vm402_vm2, %v3475_v50, %v3440_v27 }
 0x9ae   :  { %v2162_v39 = vsel %vm402_vm2, %v3424_v49, %v3425_v22  ;;  %v2161_v28 = vsel %vm402_vm2, %v3425_v22, %v3439_v46 }
 0x9af   :  { %2289 = vmatpush.msra.mxu2 %v2162_v39  ;;  %2309 = vmatpush.msra.mxu3 %v2161_v28 }
 0x9b2   :  { %v5496_v43 = vpop.permute.xlu1 %3452  ;;  %v5528_v24 = vpop.permute.xlu2 %3487 }
 0x9b3   :  { %v5500_v26 = vpop.permute.xlu0 %3432  ;;  %v3455_v37 = vunpack.i.h.bf16 %v5496_v43  ;;  %v3454_v17 = vunpack.i.l.bf16 %v5496_v43  ;;  %v3490_v4 = vunpack.i.h.bf16 %v5528_v24 }
 0x9b4   :  { %v3435_v34 = vunpack.i.h.bf16 %v5500_v26  ;;  %v3434_v63 = vunpack.i.l.bf16 %v5500_v26 }
 0x9b5   :  { %v2109_v0 = vsel %vm346_vm4, %v3455_v37, %v3454_v17  ;;  %v2136_v33 = vsel %vm377_vm3, %v3444_v42, %v3490_v4  ;;  %v2135_v46 = vsel %vm377_vm3, %v3490_v4, %v3445_v7 }
 0x9b6   :  { %v2138_v44 = vsel %vm377_vm3, %v3434_v63, %v3435_v34  ;;  %v2137_v13 = vsel %vm377_vm3, %v3435_v34, %v3444_v42 }
 0x9b7   :  { %2290 = vmatpush.msra.mxu2 %v2138_v44  ;;  %2310 = vmatpush.msra.mxu3 %v2137_v13 }
 0x9b9   :  { %2291 = vmatpush.msra.mxu2 %v5400_v59  ;;  %2311 = vmatpush.msra.mxu3 %v5402_v55  ;;  %v3430_v55 = vunpack.i.h.bf16 %v5461_v47 }
 0x9ba   :  { %v5515_v45 = vpop.permute.xlu1 %3467 }
 0x9bb   :  { %v5521_v51 = vpop.permute.xlu0 %3447  ;;  %v3469_v40 = vunpack.i.l.bf16 %v5515_v45  ;;  %2292 = vmatpush.msra.mxu2 %v2109_v0  ;;  %v2183_v23 = vsel %vm427_vm1, %v3460_v3, %v3430_v55 }
 0x9bc   :  { %v3450_v59 = vunpack.i.h.bf16 %v5521_v51  ;;  %v3449_v3 = vunpack.i.l.bf16 %v5521_v51 }
 0x9bd   :  { %v2108_v12 = vsel %vm346_vm4, %v3454_v17, %v3469_v40 }
 0x9be   :  { %2312 = vmatpush.msra.mxu3 %v2108_v12  ;;  %v2208_v57 = vsel %vm452_vm0, %v3419_v35, %v3450_v59  ;;  %v2207_v30 = vsel %vm452_vm0, %v3450_v59, %v3420_v25 }
 0x9bf   :  { %2327 = vmatpush.msra.mxu0 %v2208_v57  ;;  %2347 = vmatpush.msra.mxu1 %v2207_v30  ;;  %v5605_v57 = vld [vmem:[%s6125_s5 + $0x8] sm:$0xff]  ;;  %v3459_v30 = vunpack.i.l.bf16 %v5481_v2  ;;  %v2206_v2 = vsel %vm452_vm0, %v3420_v25, %v3449_v3 }
 0x9c1   :  { %2328 = vmatpush.msra.mxu0 %v2184_v60  ;;  %2348 = vmatpush.msra.mxu1 %v2183_v23  ;;  %v3474_v60 = vunpack.i.l.bf16 %v5498_v14  ;;  %v2211_v23 = vsel %vm452_vm0, %v3449_v3, %v3409_v54  ;;  %v2187_v18 = vsel %vm427_vm1, %v3459_v30, %v3414_v10  ;;  %v3470_v54 = vunpack.i.h.bf16 %v5515_v45 }
 0x9c2   :  { %v5550_v62 = vpop.permute.xlu1 %3482 }
 0x9c3   :  { %v5558_v35 = vpop.permute.xlu0 %3462  ;;  %v3484_v31 = vunpack.i.l.bf16 %v5550_v62  ;;  %2329 = vmatpush.msra.mxu0 %v2160_v38  ;;  %2349 = vmatpush.msra.mxu1 %v2159_v52  ;;  %v3489_v38 = vunpack.i.l.bf16 %v5528_v24  ;;  %v2182_v52 = vsel %vm427_vm1, %v3430_v55, %v3459_v30  ;;  %v2158_v24 = vsel %vm402_vm2, %v3440_v27, %v3474_v60 }
 0x9c4   :  { %v3465_v11 = vunpack.i.h.bf16 %v5558_v35  ;;  %v3464_v6 = vunpack.i.l.bf16 %v5558_v35  ;;  %v2163_v47 = vsel %vm402_vm2, %v3474_v60, %v3424_v49  ;;  %v3485_v61 = vunpack.i.h.bf16 %v5550_v62 }
 0x9c5   :  { %2330 = vmatpush.msra.mxu0 %v2136_v33  ;;  %2350 = vmatpush.msra.mxu1 %v2135_v46  ;;  %v2134_v10 = vsel %vm377_vm3, %v3445_v7, %v3489_v38  ;;  %v2139_v5 = vsel %vm377_vm3, %v3489_v38, %v3434_v63 }
 0x9c6   :  { %v2085_v22 = vsel %vm6186_vm8, %v3465_v11, %v3464_v6  ;;  %v2084_v39 = vsel %vm6187_vm7, %v3464_v6, %v3484_v31  ;;  %vm6197_vm8 = vmmov %vm6189_vm6 }
 0x9c7   :  { %2293 = vmatpush.msra.mxu2 %v2085_v22  ;;  %2313 = vmatpush.msra.mxu3 %v2084_v39 }
 0x9c8   :  { %2331 = vmatpush.msra.mxu0 %v5404_v20  ;;  %2351 = vmatpush.msra.mxu1 %v5428_v36  ;;  %v5594_v36 = vpop.permute.xlu2 %3502 }
 0x9c9   :  { %v3504_v59 = vunpack.i.l.bf16 %v5594_v36 }
 0x9ca   :  { %v5579_v28 = vpop.permute.xlu1 %3497 }
 0x9cb   :  { %v5581_v42 = vpop.permute.xlu0 %3477  ;;  %v3499_v34 = vunpack.i.l.bf16 %v5579_v28  ;;  %v3500_v27 = vunpack.i.h.bf16 %v5579_v28 }
 0x9cc   :  { %v3480_v17 = vunpack.i.h.bf16 %v5581_v42  ;;  %v3479_v44 = vunpack.i.l.bf16 %v5581_v42 }
 0x9ce   :  { %v2061_v13 = vsel %vm6188_vm9, %v3480_v17, %v3479_v44  ;;  %v2060_v20 = vsel %vm6189_vm6, %v3479_v44, %v3499_v34  ;;  %vm6198_vm9 = vmmov %vm6187_vm7 }
 0x9cf   :  { %2294 = vmatpush.msra.mxu2 %v2061_v13  ;;  %2314 = vmatpush.msra.mxu3 %v2060_v20  ;;  %v3050_v20 = vld [vmem:[%s6126_s8 + $0x30] sm:$0xff] }
 0x9d0   :  { %v3518_v55 = vpop.permute.xlu2 %3517 }
 0x9d1   :  { %v3520_v26 = vunpack.i.h.bf16 %v3518_v55  ;;  %v3519_v33 = vunpack.i.l.bf16 %v3518_v55 }
 0x9d2   :  { %v3513_v14 = vpop.permute.xlu1 %3512 }
 0x9d3   :  { %v5596_v0 = vpop.permute.xlu0 %3492  ;;  %v3515_v56 = vunpack.i.h.bf16 %v3513_v14  ;;  %v3514_v7 = vunpack.i.l.bf16 %v3513_v14  ;;  %v2058_v46 = vsel %vm6197_vm8, %v3520_v26, %v3500_v27  ;;  %v2057_v28 = vsel %vm6189_vm6, %v3500_v27, %v3519_v33 }
 0x9d4   :  { %v3495_v12 = vunpack.i.h.bf16 %v5596_v0  ;;  %v3494_v50 = vunpack.i.l.bf16 %v5596_v0  ;;  %v3051_v0 = vld [vmem:[%s6126_s8 + $0x38] sm:$0xff] }
 0x9d5   :  { %v2083_v63 = vsel %vm6194_vm13, %v3484_v31, %v3515_v56  ;;  %v2082_v45 = vsel %vm6195_vm14, %v3515_v56, %v3485_v61  ;;  %v2059_v31 = vsel %vm6196_vm15, %v3499_v34, %v3520_v26  ;;  %v2081_v43 = vsel %vm6187_vm7, %v3485_v61, %v3514_v7  ;;  %vm6202_vm13 = vmmov %vm6191_vm5 }
 0x9d6   :  { %v2037_v4 = vsel %vm6190_vm10, %v3495_v12, %v3494_v50  ;;  %v2036_v51 = vsel %vm6191_vm5, %v3494_v50, %v3504_v59  ;;  %vm6199_vm10 = vmmov %vm6189_vm6  ;;  %vm6203_vm14 = vcmask 588800  }
 0x9d7   :  { %2295 = vmatpush.msra.mxu2 %v2037_v4  ;;  %2315 = vmatpush.msra.mxu3 %v2036_v51  ;;  %v2056_v34 = vsel %vm6199_vm10, %v3519_v33, %v3480_v17  ;;  %vm6204_vm15 = vmmov %vm6203_vm14  ;;  %v3052_v51 = vld [vmem:[%s6126_s8 + $0x40] sm:$0xff] }
 0x9d8   :  { %3044 = vmatmul.msk.f32.vlgmr.msra.gmra.mxu2 %vm6192_vm11, %v5605_v57  ;;  %3045 = vmatmul.msk.f32.vlgmr.msra.gmra.mxu3 %vm6193_vm12, %v5605_v57  ;;  %vm6200_vm11 = vmmov %vm6191_vm5 }
 0x9d9   :  { %2367 = vmatpush.msrb.mxu2 %v2206_v2  ;;  %2387 = vmatpush.msrb.mxu3 %v2211_v23  ;;  %vm6201_vm12 = vmmov %vm6191_vm5  ;;  %v3053_v2 = vld [vmem:[%s6126_s8 + $0x48] sm:$0xff] }
 0x9da   :  { %vm6205_vm8 = vmmov %vm6203_vm14  ;;  %v2275_v17 = vpop.permute.xlu1 %2274 }
 0x9db   :  { %2368 = vmatpush.msrb.mxu2 %v2182_v52  ;;  %2388 = vmatpush.msrb.mxu3 %v2187_v18  ;;  %v3508_v19 = vpop.permute.xlu0 %3507  ;;  %vm6206_vm7 = vmmov %vm6205_vm8 }
 0x9dc   :  { %v3510_v25 = vunpack.i.h.bf16 %v3508_v19  ;;  %v3509_v6 = vunpack.i.l.bf16 %v3508_v19 }
 0x9dd   :  { %2369 = vmatpush.msrb.mxu2 %v2158_v24  ;;  %2389 = vmatpush.msrb.mxu3 %v2163_v47 }
 0x9de   :  { %v2107_v58 = vsel %vm346_vm4, %v3469_v40, %v3510_v25  ;;  %v2106_v49 = vsel %vm346_vm4, %v3510_v25, %v3470_v54  ;;  %v2105_v40 = vsel %vm346_vm4, %v3470_v54, %v3509_v6 }
 0x9df   :  { %2370 = vmatpush.msrb.mxu2 %v2134_v10  ;;  %2390 = vmatpush.msrb.mxu3 %v2139_v5  ;;  %v3054_v10 = vld [vmem:[%s6126_s8 + $0x50] sm:$0xff] }
 0x9e0   :  { %2332 = vmatpush.msra.mxu0 %v2107_v58  ;;  %2352 = vmatpush.msra.mxu1 %v2106_v49 }
 0x9e1   :  { %2371 = vmatpush.msrb.mxu2 %v5406_v15  ;;  %2391 = vmatpush.msrb.mxu3 %v5419_v29  ;;  %v2104_v15 = vsel %vm346_vm4, %v3509_v6, %v3455_v37  ;;  %v3505_v29 = vunpack.i.h.bf16 %v5594_v36  ;;  %v2080_v37 = vsel %vm6198_vm9, %v3514_v7, %v3465_v11  ;;  %v3055_v6 = vld [vmem:[%s6126_s8 + $0x58] sm:$0xff] }
 0x9e2   :  { %2333 = vmatpush.msra.mxu0 %v2083_v63  ;;  %2353 = vmatpush.msra.mxu1 %v2082_v45 }
 0x9e3   :  { %2372 = vmatpush.msrb.mxu2 %v2105_v40  ;;  %2392 = vmatpush.msrb.mxu3 %v2104_v15  ;;  %v3523_v62 = vpop.permute.xlu0 %3522 }
 0x9e4   :  { %v3525_v22 = vunpack.i.h.bf16 %v3523_v62  ;;  %v3524_v39 = vunpack.i.l.bf16 %v3523_v62  ;;  %2334 = vmatpush.msra.mxu0 %v2059_v31  ;;  %2354 = vmatpush.msra.mxu1 %v2058_v46 }
 0x9e5   :  { %2373 = vmatpush.msrb.mxu2 %v2081_v43  ;;  %2393 = vmatpush.msrb.mxu3 %v2080_v37 }
 0x9e6   :  { %v2035_v44 = vsel %vm6191_vm5, %v3504_v59, %v3525_v22  ;;  %v2034_v35 = vsel %vm6200_vm11, %v3525_v22, %v3505_v29  ;;  %v2033_v11 = vsel %vm6201_vm12, %v3505_v29, %v3524_v39  ;;  %v2032_v42 = vsel %vm6202_vm13, %v3524_v39, %v3495_v12 }
 0x9e7   :  { %2374 = vmatpush.msrb.mxu2 %v2057_v28  ;;  %2394 = vmatpush.msrb.mxu3 %v2056_v34 }
 0x9e8   :  { %2335 = vmatpush.msra.mxu0 %v2035_v44  ;;  %2355 = vmatpush.msra.mxu1 %v2034_v35 }
 0x9e9   :  { %3046 = vmatmul.msk.f32.vlgmr.msra.gmra.mxu0 %vm6203_vm14, %v5605_v57  ;;  %3047 = vmatmul.msk.f32.vlgmr.msra.gmra.mxu1 %vm6204_vm15, %v5605_v57 }
 0x9ea   :  { %2375 = vmatpush.msrb.mxu2 %v2033_v11  ;;  %2395 = vmatpush.msrb.mxu3 %v2032_v42 }
 0x9eb   :  { %3048 = vmatmul.msk.f32.vlgmr.msrb.gmra.mxu2 %vm6205_vm8, %v5605_v57  ;;  %3049 = vmatmul.msk.f32.vlgmr.msrb.gmra.mxu3 %vm6206_vm7, %v5605_v57 }
 0xa5b   :  { %v2297_v13 = vpop.f32.mrf.mxu2  ;;  %v2317_v36 = vpop.f32.mrf.mxu3 }
 0xa5c   :  { %v2298_v3 = vadd.f32 %v2297_v13, %v2275_v17  ;;  %v2318_v59 = vadd.f32 %v2317_v36, %v2275_v17 }
 0xa5e   :  { %v5722_v12 = vadd.f32 %v3050_v20, %v2298_v3  ;;  %v5724_v50 = vadd.f32 %v3051_v0, %v2318_v59 }
 0xa60   :  { %v3056_v30 = vmul.f32 -1.442695, %v5722_v12  ;;  %v3057_v57 = vmul.f32 -1.442695, %v5724_v50 }
 0xa62   :  { %3708 = vpow2.f32 %v3056_v30 }
 0xa63   :  { %3710 = vpow2.f32 %v3057_v57 }
 0xa66   :  { %v2337_v4 = vpop.f32.mrf.mxu0  ;;  %v2357_v60 = vpop.f32.mrf.mxu1 }
 0xa67   :  { %v2338_v23 = vadd.f32 %v2337_v4, %v2275_v17  ;;  %v2358_v38 = vadd.f32 %v2357_v60, %v2275_v17 }
 0xa68   :  { %v3709_v14 = vpop.eup %3708 }
 0xa69   :  { %v3711_v52 = vpop.eup %3710  ;;  %v2431_v18 = vadd.f32 1.0, %v3709_v14  ;;  %v5734_v19 = vadd.f32 %v3052_v51, %v2338_v23  ;;  %v5736_v54 = vadd.f32 %v3053_v2, %v2358_v38 }
 0xa6a   :  { %v2432_v25 = vadd.f32 1.0, %v3711_v52 }
 0xa6b   :  { %3712 = vrcp.f32 %v2431_v18  ;;  %v3058_v24 = vmul.f32 -1.442695, %v5734_v19  ;;  %v3059_v47 = vmul.f32 -1.442695, %v5736_v54  ;;  %vm2442_vm9 = vweird.f32 %v2431_v18 }
 0xa6c   :  { %3714 = vrcp.f32 %v2432_v25  ;;  %v2448_v33 = vand.u32 2147483648, %v2431_v18  ;;  %v2446_v39 = vand.u32 2147483647, %v2431_v18  ;;  %v2463_v37 = vand.u32 2147483648, %v2432_v25 }
 0xa6d   :  { %3716 = vpow2.f32 %v3058_v24  ;;  %vm2457_vm10 = vweird.f32 %v2432_v25  ;;  %v2461_v42 = vand.u32 2147483647, %v2432_v25  ;;  %v5764_v24 = vld [vmem:[%s6123_s2] sm:$0xff] }
 0xa6e   :  { %v2377_v56 = vpop.f32.mrf.mxu2  ;;  %v2397_v55 = vpop.f32.mrf.mxu3  ;;  %3718 = vpow2.f32 %v3059_v47  ;;  %v2449_v11 = vor.u32 1.1754944e-38, %v2448_v33  ;;  %vm2447_vm12 = vcmp.eq.f32.partialorder %v2446_v39, 8.507059e+37  ;;  %v2464_v13 = vor.u32 1.1754944e-38, %v2463_v37 }
 0xa6f   :  { %v2378_v5 = vadd.f32 %v2377_v56, %v2275_v17  ;;  %v2398_v58 = vadd.f32 %v2397_v55, %v2275_v17  ;;  %vm2462_vm14 = vcmp.eq.f32.partialorder %v2461_v42, 8.507059e+37 }
 0xa71   :  { %v3713_v49 = vpop.eup %3712  ;;  %v5746_v61 = vadd.f32 %v3054_v10, %v2378_v5  ;;  %v5748_v27 = vadd.f32 %v3055_v6, %v2398_v58 }
 0xa72   :  { %v3715_v7 = vpop.eup %3714  ;;  %v2438_v26 = vmul.f32 %v3713_v49, %v2431_v18  ;;  %vm2443_vm6 = vweird.f32 %v3713_v49 }
 0xa73   :  { %v2453_v63 = vmul.f32 %v3715_v7, %v2432_v25  ;;  %v3060_v45 = vmul.f32 -1.442695, %v5746_v61  ;;  %v3061_v40 = vmul.f32 -1.442695, %v5748_v27  ;;  %v3717_v29 = vpop.eup %3716  ;;  %vm2458_vm5 = vweird.f32 %v3715_v7  ;;  %vm2444_vm11 = vmor %vm2442_vm9, %vm2443_vm6 }
 0xa74   :  { %v2439_v15 = vsub.f32 1.0, %v2438_v26  ;;  %v3719_v31 = vpop.eup %3718  ;;  %v2433_v22 = vadd.f32 1.0, %v3717_v29  ;;  %vm2459_vm13 = vmor %vm2457_vm10, %vm2458_vm5 }
 0xa75   :  { %v2454_v62 = vsub.f32 1.0, %v2453_v63  ;;  %3720 = vpow2.f32 %v3060_v45  ;;  %v2434_v28 = vadd.f32 1.0, %v3719_v31 }
 0xa76   :  { %v2440_v46 = vmul.f32 %v3713_v49, %v2439_v15  ;;  %3722 = vpow2.f32 %v3061_v40  ;;  %v2476_v38 = vand.u32 2147483647, %v2433_v22  ;;  %v2478_v14 = vand.u32 2147483648, %v2433_v22 }
 0xa77   :  { %v2455_v43 = vmul.f32 %v3715_v7, %v2454_v62  ;;  %3724 = vrcp.f32 %v2433_v22  ;;  %v2491_v25 = vand.u32 2147483647, %v2434_v28  ;;  %v2493_v56 = vand.u32 2147483648, %v2434_v28 }
 0xa78   :  { %v2441_v34 = vadd.f32 %v3713_v49, %v2440_v46  ;;  %3726 = vrcp.f32 %v2434_v28  ;;  %vm2472_vm7 = vweird.f32 %v2433_v22  ;;  %vm2477_vm9 = vcmp.eq.f32.partialorder %v2476_v38, 8.507059e+37 }
 0xa79   :  { %v2456_v44 = vadd.f32 %v3715_v7, %v2455_v43  ;;  %vm2487_vm6 = vweird.f32 %v2434_v28  ;;  %v2479_v58 = vor.u32 1.1754944e-38, %v2478_v14  ;;  %v2494_v45 = vor.u32 1.1754944e-38, %v2493_v56  ;;  %v3745_v14 = vld [vmem:[%s6123_s2 + $0x20] sm:$0xff] }
 0xa7a   :  { %v2445_v35 = vsel %vm2444_vm11, %v3713_v49, %v2441_v34  ;;  %vm2492_vm11 = vcmp.eq.f32.partialorder %v2491_v25, 8.507059e+37  ;;  %v5790_v34 = vld [vmem:[%s6123_s2 + $0x10] sm:$0xff] }
 0xa7b   :  { %v3721_v17 = vpop.eup %3720  ;;  %v2450_v36 = vsel %vm2447_vm12, %v2449_v11, %v2445_v35  ;;  %v2460_v0 = vsel %vm2459_vm13, %v3715_v7, %v2456_v44 }
 0xa7c   :  { %v3723_v20 = vpop.eup %3722  ;;  %v5753_v3 = vadd.f32 1.0, %v3721_v17  ;;  %v2527_v4 = vmul.f32 %v2450_v36, %v5722_v12  ;;  %v2465_v51 = vsel %vm2462_vm14, %v2464_v13, %v2460_v0  ;;  %v5805_v36 = vld [vmem:[%s6123_s2 + $0x18] sm:$0xff] }
 0xa7d   :  { %v3725_v59 = vpop.eup %3724  ;;  %v5755_v30 = vadd.f32 1.0, %v3723_v20  ;;  %v2528_v52 = vmul.f32 %v2465_v51, %v5724_v50  ;;  %v5772_v50 = vld [vmem:[%s6123_s2 + $0x8] sm:$0xff] }
 0xa7e   :  { %v3727_v57 = vpop.eup %3726  ;;  %v2468_v60 = vmul.f32 %v3725_v59, %v2433_v22  ;;  %3728 = vrcp.f32 %v5753_v3  ;;  %v5767_v12 = vmul.f32 %v5764_v24, %v2527_v4  ;;  %vm2473_vm15 = vweird.f32 %v3725_v59 }
 0xa7f   :  { %v2483_v2 = vmul.f32 %v3727_v57, %v2434_v28  ;;  %3730 = vrcp.f32 %v5755_v30  ;;  %vm2488_vm8 = vweird.f32 %v3727_v57  ;;  %v5775_v5 = vmul.f32 %v5772_v50, %v2528_v52  ;;  %vm2474_vm10 = vmor %vm2472_vm7, %vm2473_vm15 }
 0xa80   :  { %v2469_v23 = vsub.f32 1.0, %v2468_v60  ;;  %v2546_v26 = vmul.f32 %v5767_v12, %v5767_v12  ;;  %vm2489_vm5 = vmor %vm2487_vm6, %vm2488_vm8  ;;  %v2506_v62 = vand.u32 2147483647, %v5753_v3  ;;  %v2508_v22 = vand.u32 2147483648, %v5753_v3 }
 0xa81   :  { %v2484_v18 = vsub.f32 1.0, %v2483_v2  ;;  %v2547_v43 = vmul.f32 %v5775_v5, %v5775_v5  ;;  %vm2502_vm13 = vweird.f32 %v5753_v3  ;;  %v2521_v35 = vand.u32 2147483647, %v5755_v30 }
 0xa82   :  { %v2470_v47 = vmul.f32 %v3725_v59, %v2469_v23  ;;  %vm2507_vm14 = vcmp.eq.f32.partialorder %v2506_v62, 8.507059e+37  ;;  %v2523_v42 = vand.u32 2147483648, %v5755_v30  ;;  %v2509_v17 = vor.u32 1.1754944e-38, %v2508_v22 }
 0xa83   :  { %v2485_v10 = vmul.f32 %v3727_v57, %v2484_v18  ;;  %vm2517_vm7 = vweird.f32 %v5755_v30  ;;  %vm2522_vm6 = vcmp.eq.f32.partialorder %v2521_v35, 8.507059e+37 }
 0xa84   :  { %v3729_v55 = vpop.eup %3728  ;;  %v2471_v6 = vadd.f32 %v3725_v59, %v2470_v47  ;;  %v2524_v2 = vor.u32 1.1754944e-38, %v2523_v42 }
 0xa85   :  { %v2486_v49 = vadd.f32 %v3727_v57, %v2485_v10  ;;  %v2498_v7 = vmul.f32 %v3729_v55, %v5753_v3  ;;  %v3731_v40 = vpop.eup %3730  ;;  %vm2503_vm12 = vweird.f32 %v3729_v55 }
 0xa86   :  { %v2475_v63 = vsel %vm2474_vm10, %v3725_v59, %v2471_v6  ;;  %v2513_v39 = vmul.f32 %v3731_v40, %v5755_v30  ;;  %vm2504_vm15 = vmor %vm2502_vm13, %vm2503_vm12  ;;  %vm2518_vm8 = vweird.f32 %v3731_v40  ;;  %vm6207_vm12 = vcmp.lt.s32.totalorder %v4178_v48, 17 }
 0xa87   :  { %v2480_v15 = vsel %vm2477_vm9, %v2479_v58, %v2475_v63  ;;  %v2490_v29 = vsel %vm2489_vm5, %v3727_v57, %v2486_v49  ;;  %v2499_v33 = vsub.f32 1.0, %v2498_v7  ;;  %v2552_v57 = vadd.f32 %v2547_v43, %v2546_v26  ;;  %vm2519_vm9 = vmor %vm2517_vm7, %vm2518_vm8 }
 0xa88   :  { %v2529_v31 = vmul.f32 %v2480_v15, %v5734_v19  ;;  %v2495_v46 = vsel %vm2492_vm11, %v2494_v45, %v2490_v29  ;;  %v2514_v19 = vsub.f32 1.0, %v2513_v39  ;;  %vm6208_vm13 = vcmp.lt.s32.totalorder %v4178_v48, 18  ;;  %vm6211_vm8 = vmmov %vm6207_vm12 }
 0xa89   :  { %v2530_v37 = vmul.f32 %v2495_v46, %v5736_v54  ;;  %v2500_v28 = vmul.f32 %v3729_v55, %v2499_v33  ;;  %v2539_v54 = vadd.f32 %v5775_v5, %v5767_v12  ;;  %vm6212_vm7 = vmmov %vm6211_vm8 }
 0xa8a   :  { %v5793_v44 = vmul.f32 %v5790_v34, %v2529_v31  ;;  %v2515_v13 = vmul.f32 %v3731_v40, %v2514_v19 }
 0xa8b   :  { %v2501_v11 = vadd.f32 %v3729_v55, %v2500_v28  ;;  %v2536_v0 = vmul.f32 %v5805_v36, %v2530_v37 }
 0xa8c   :  { %v2548_v20 = vmul.f32 %v5793_v44, %v5793_v44  ;;  %v2540_v59 = vadd.f32 %v2539_v54, %v5793_v44  ;;  %v2516_v51 = vadd.f32 %v3731_v40, %v2515_v13 }
 0xa8d   :  { %v2505_v3 = vsel %vm2504_vm15, %v3729_v55, %v2501_v11  ;;  %v2549_v47 = vmul.f32 %v2536_v0, %v2536_v0  ;;  %vm6210_vm15 = vcmask 588800  }
 0xa8e   :  { %v2510_v4 = vsel %vm2507_vm14, %v2509_v17, %v2505_v3  ;;  %v2553_v23 = vadd.f32 %v2552_v57, %v2548_v20  ;;  %v2520_v38 = vsel %vm2519_vm9, %v3731_v40, %v2516_v51  ;;  %v2541_v25 = vadd.f32 %v2540_v59, %v2536_v0  ;;  %vm6213_vm9 = vmmov %vm6212_vm7 }
 0xa8f   :  { %v2531_v60 = vmul.f32 %v2510_v4, %v5746_v61  ;;  %v2525_v18 = vsel %vm2522_vm6, %v2524_v2, %v2520_v38  ;;  %v3746_v61 = vld [vmem:[%s6123_s2 + $0x28] sm:$0xff]  ;;  %vm6209_vm14 = vcmp.lt.s32.totalorder %v4178_v48, 19  ;;  %vm6214_vm6 = vmmov %vm6208_vm13 }
 0xa90   :  { %v2532_v56 = vmul.f32 %v2525_v18, %v5748_v27  ;;  %v2554_v30 = vadd.f32 %v2553_v23, %v2549_v47 }
 0xa91   :  { %v2537_v52 = vmul.f32 %v3745_v14, %v2531_v60 }
 0xa92   :  { %v2538_v6 = vmul.f32 %v3746_v61, %v2532_v56 }
 0xa93   :  { %v2542_v10 = vadd.f32 %v2541_v25, %v2537_v52  ;;  %v2550_v55 = vmul.f32 %v2537_v52, %v2537_v52 }
 0xa94   :  { %v2551_v7 = vmul.f32 %v2538_v6, %v2538_v6 }
 0xa95   :  { %v2555_v58 = vadd.f32 %v2554_v30, %v2550_v55  ;;  %v2543_v49 = vadd.f32 %v2542_v10, %v2538_v6 }
 0xa97   :  { %2544 = vadd.xlane.f32.xlu2 %v2543_v49  ;;  %v2556_v26 = vadd.f32 %v2555_v58, %v2551_v7 }
 0xa99   :  { %2557 = vadd.xlane.f32.xlu0 %v2556_v26 }
 0xb0a   :  { %v2545_v63 = vpop.xlane.xlu2 %2544 }
 0xb0b   :  { %v2559_v45 = vmul.f32 0.001953125, %v2545_v63 }
 0xb0c   :  { %v2558_v40 = vpop.xlane.xlu0 %2557 }
 0xb0d   :  { %v2561_v15 = vmul.f32 %v2559_v45, %v2559_v45  ;;  %v2560_v29 = vmul.f32 0.001953125, %v2558_v40 }
 0xb0f   :  { %v2562_v27 = vsub.f32 %v2560_v29, %v2561_v15 }
 0xb11   :  { %v2563_v33 = vadd.f32 1e-05, %v2562_v27 }
 0xb13   :  { %3732 = vrsqrt.f32 %v2563_v33  ;;  %vm2570_vm5 = vweird.f32 %v2563_v33 }
 0xb19   :  { %v3733_v62 = vpop.eup %3732 }
 0xb1a   :  { %v2565_v31 = vmul.f32 %v3733_v62, %v2563_v33  ;;  %vm2571_vm10 = vweird.f32 %v3733_v62 }
 0xb1b   :  { %vm2572_vm11 = vmor %vm2570_vm5, %vm2571_vm10 }
 0xb1c   :  { %v2566_v46 = vmul.f32 %v3733_v62, %v2565_v31  ;;  %vm6215_vm10 = vmmov %vm6214_vm6 }
 0xb1d   :  { %vm6216_vm5 = vmmov %vm6214_vm6 }
 0xb1e   :  { %v2567_v22 = vmul.f32 0.5, %v2566_v46 }
 0xb20   :  { %v2568_v39 = vsub.f32 1.5, %v2567_v22 }
 0xb22   :  { %v2569_v43 = vmul.f32 %v3733_v62, %v2568_v39 }
 0xb24   :  { %v2573_v37 = vsel %vm2572_vm11, %v3733_v62, %v2569_v43  ;;  %vm6217_vm11 = vmmov %vm6209_vm14 }
 0xb25   :  { %v2574_v28 = vmul.f32 %v5386_v1, %v2573_v37 }
 0xb27   :  { %v2575_v19 = vmul.f32 %v2574_v28, %v2559_v45 }
 0xb29   :  { %2577 = vrot.lane.b32.xlu1 %v2575_v19, %s3752_s14 }
 0xb31   :  { %2583 = vperm.xlu1 %3527, %v2574_v28  }
 0xb39   :  { %3528 = vset.pattern.permute.xlu1 %v3760_v21 }
 0xb9b   :  { %v2578_v35 = vpop.permute.xlu1 %2577 }
 0xb9c   :  { %v2580_v11 = vsub.f32 %v5386_v1, %v2578_v35 }
 0xb9e   :  { %2594 = vperm.xlu1 %3528, %v2580_v11  }
 0xba3   :  { %v2584_v42 = vpop.permute.xlu1 %2583 }
 0xba4   :  { %v2586_v54 = vmul.f32 %v2584_v42, %v5767_v12  ;;  %v2587_v17 = vmul.f32 %v2584_v42, %v5775_v5  ;;  %v2588_v13 = vmul.f32 %v2584_v42, %v5793_v44  ;;  %v2589_v20 = vmul.f32 %v2584_v42, %v2536_v0 }
 0xc10   :  { %v2595_v3 = vpop.permute.xlu1 %2594 }
 0xc11   :  { %v2597_v59 = vmul.f32 %v5764_v24, %v2595_v3  ;;  %v2598_v57 = vmul.f32 %v5772_v50, %v2595_v3  ;;  %v2599_v4 = vmul.f32 %v5790_v34, %v2595_v3  ;;  %v2600_v21 = vmul.f32 %v5805_v36, %v2595_v3 }
 0xc12   :  { %v2601_v5 = vmul.f32 %v3745_v14, %v2595_v3  ;;  %v2602_v44 = vmul.f32 %v3746_v61, %v2595_v3  ;;  %v2590_v50 = vmul.f32 %v2584_v42, %v2537_v52  ;;  %v2591_v34 = vmul.f32 %v2584_v42, %v2538_v6  ;;  %v3747_v14 = vld [vmem:[%s6124_s7 + $0x8] sm:$0xff] }
 0xc13   :  { %v5829_v51 = vadd.f32 %v2597_v59, %v2586_v54  ;;  %v5831_v1 = vadd.f32 %v2598_v57, %v2587_v17  ;;  %v5833_v60 = vadd.f32 %v2599_v4, %v2588_v13  ;;  %v5835_v12 = vadd.f32 %v2600_v21, %v2589_v20 }
 0xc14   :  { %v5844_v36 = vadd.f32 %v2601_v5, %v2590_v50  ;;  %v5846_v2 = vadd.f32 %v2602_v44, %v2591_v34 }
 0xc15   :  { %v3544_v0 = vpack.i.bf16 %v5835_v12, %v5833_v60  ;;  %v3539_v24 = vpack.i.bf16 %v5831_v1, %v5829_v51 }
 0xc16   :  { %v3564_v23 = vpack.i.bf16 %v5846_v2, %v5844_v36  ;;  %v3594_v38 = vpack.i.bf16 %v5833_v60, %v5846_v2 }
 0xc17   :  { %3545 = vrot.lane.b32.xlu0 %v3544_v0, %s3751_s13  ;;  %3540 = vrot.lane.b32.xlu2 %v3539_v24, %s3751_s13 }
 0xc18   :  { %3530 = vrot.lane.b32.xlu1 %v3539_v24, %s3750_s1 }
 0xc1f   :  { %3565 = vrot.lane.b32.xlu0 %v3564_v23, %s3751_s13  ;;  %3570 = vrot.lane.b32.xlu2 %v3539_v24, %s3748_s11 }
 0xc20   :  { %3535 = vrot.lane.b32.xlu1 %v3544_v0, %s3750_s1 }
 0xc27   :  { %3580 = vrot.lane.b32.xlu0 %v3564_v23, %s3749_s12  ;;  %3585 = vrot.lane.b32.xlu2 %v3564_v23, %s3748_s11 }
 0xc28   :  { %3550 = vrot.lane.b32.xlu1 %v3564_v23, %s3750_s1 }
 0xc2f   :  { %3595 = vrot.lane.b32.xlu0 %v3594_v38, %s3752_s14  ;;  %3600 = vrot.lane.b32.xlu2 %v3539_v24, %s3753_s15 }
 0xc30   :  { %3555 = vrot.lane.b32.xlu1 %v3539_v24, %s3749_s12 }
 0xc37   :  { %2689 = vrot.lane.b32.xlu0 %v5835_v12, %s3752_s14  ;;  %3610 = vrot.lane.b32.xlu2 %v3539_v24, %s3755_s0 }
 0xc38   :  { %3560 = vrot.lane.b32.xlu1 %v3544_v0, %s3749_s12 }
 0xc3f   :  { %2665 = vrot.lane.b32.xlu0 %v5835_v12, %s3753_s15  ;;  %3620 = vrot.lane.b32.xlu2 %v3539_v24, %s3754_s16 }
 0xc40   :  { %3575 = vrot.lane.b32.xlu1 %v3544_v0, %s3748_s11 }
 0xc47   :  { %2641 = vrot.lane.b32.xlu0 %v5835_v12, %s3755_s0  ;;  %2617 = vrot.lane.b32.xlu2 %v5835_v12, %s3754_s16 }
 0xc48   :  { %3590 = vrot.lane.b32.xlu1 %v3539_v24, %s3752_s14 }
 0xc4f   :  { %2667 = vrot.lane.b32.xlu0 %v5844_v36, %s3753_s15  ;;  %2643 = vrot.lane.b32.xlu2 %v5844_v36, %s3755_s0 }
 0xc50   :  { %3605 = vrot.lane.b32.xlu1 %v3594_v38, %s3753_s15 }
 0xc57   :  { %2864 = vperm.xlu0 %3629, %v3747_v14  }
 0xc58   :  { %3615 = vrot.lane.b32.xlu1 %v3594_v38, %s3755_s0 }
 0xc60   :  { %3625 = vrot.lane.b32.xlu1 %v3594_v38, %s3754_s16 }
 0xc68   :  { %2691 = vrot.lane.b32.xlu1 %v5844_v36, %s3752_s14 }
 0xc70   :  { %2619 = vrot.lane.b32.xlu1 %v5844_v36, %s3754_s16 }
 0xc71   :  { %v5888_v52 = vpop.permute.xlu2 %3540 }
 0xc72   :  { %v3543_v25 = vunpack.i.h.bf16 %v5888_v52  ;;  %v3542_v47 = vunpack.i.l.bf16 %v5888_v52 }
 0xc74   :  { %v2777_v61 = vsel %vm427_vm1, %v3542_v47, %v3543_v25 }
 0xc79   :  { %v5904_v63 = vpop.permute.xlu2 %3570 }
 0xc7a   :  { %v3573_v37 = vunpack.i.h.bf16 %v5904_v63  ;;  %v3572_v28 = vunpack.i.l.bf16 %v5904_v63 }
 0xc7c   :  { %v2729_v54 = vsel %vm377_vm3, %v3572_v28, %v3573_v37 }
 0xc81   :  { %v5924_v22 = vpop.permute.xlu2 %3585 }
 0xc82   :  { %v3587_v0 = vunpack.i.l.bf16 %v5924_v22 }
 0xc89   :  { %v3546_v30 = vpop.permute.xlu0 %3545  ;;  %v5946_v17 = vpop.permute.xlu2 %3600 }
 0xc8a   :  { %v5890_v18 = vpop.permute.xlu1 %3530  ;;  %v3548_v58 = vunpack.i.h.bf16 %v3546_v30  ;;  %v3547_v49 = vunpack.i.l.bf16 %v3546_v30 }
 0xc8b   :  { %v3533_v56 = vunpack.i.h.bf16 %v5890_v18  ;;  %v3532_v10 = vunpack.i.l.bf16 %v5890_v18 }
 0xc8c   :  { %v2776_v15 = vsel %vm427_vm1, %v3543_v25, %v3547_v49  ;;  %v2775_v29 = vsel %vm427_vm1, %v3547_v49, %v3548_v58 }
 0xc8d   :  { %v2801_v55 = vsel %vm452_vm0, %v3532_v10, %v3533_v56 }
 0xc8e   :  { %2877 = vmatpush.msrb.mxu0 %v2801_v55 }
 0xc90   :  { %2878 = vmatpush.msrb.mxu0 %v2777_v61  ;;  %v3602_v61 = vunpack.i.l.bf16 %v5946_v17 }
 0xc91   :  { %v5914_v27 = vpop.permute.xlu0 %3565 }
 0xc92   :  { %v3536_v6 = vpop.permute.xlu1 %3535  ;;  %v3567_v62 = vunpack.i.l.bf16 %v5914_v27 }
 0xc93   :  { %v3538_v7 = vunpack.i.h.bf16 %v3536_v6  ;;  %v3537_v26 = vunpack.i.l.bf16 %v3536_v6 }
 0xc94   :  { %v2774_v39 = vsel %vm427_vm1, %v3548_v58, %v3567_v62 }
 0xc95   :  { %v2800_v45 = vsel %vm452_vm0, %v3533_v56, %v3537_v26  ;;  %v2799_v40 = vsel %vm452_vm0, %v3537_v26, %v3538_v7  ;;  %v3603_v56 = vunpack.i.h.bf16 %v5946_v17 }
 0xc96   :  { %2897 = vmatpush.msrb.mxu1 %v2800_v45  ;;  %2917 = vmatpush.msra.mxu2 %v2799_v40 }
 0xc98   :  { %2898 = vmatpush.msrb.mxu1 %v2776_v15  ;;  %2918 = vmatpush.msra.mxu2 %v2775_v29  ;;  %v2675_v29 = vsel %vm6207_vm12, %v3602_v61, %v3603_v56  ;;  %vm6218_vm12 = vmmov %vm6217_vm11 }
 0xc99   :  { %v5934_v19 = vpop.permute.xlu0 %3580 }
 0xc9a   :  { %v5916_v33 = vpop.permute.xlu1 %3550  ;;  %v3582_v20 = vunpack.i.l.bf16 %v5934_v19 }
 0xc9b   :  { %v3552_v31 = vunpack.i.l.bf16 %v5916_v33 }
 0xc9d   :  { %v2798_v46 = vsel %vm452_vm0, %v3538_v7, %v3552_v31 }
 0xc9e   :  { %2937 = vmatpush.msra.mxu3 %v2798_v46  ;;  %v3553_v46 = vunpack.i.h.bf16 %v5916_v33 }
 0xca0   :  { %2938 = vmatpush.msra.mxu3 %v2774_v39 }
 0xca1   :  { %v5950_v57 = vpop.permute.xlu0 %3595 }
 0xca2   :  { %v5930_v43 = vpop.permute.xlu1 %3555  ;;  %v3598_v25 = vunpack.i.h.bf16 %v5950_v57  ;;  %v3597_v6 = vunpack.i.l.bf16 %v5950_v57 }
 0xca3   :  { %v3558_v35 = vunpack.i.h.bf16 %v5930_v43  ;;  %v3557_v11 = vunpack.i.l.bf16 %v5930_v43 }
 0xca5   :  { %v2753_v42 = vsel %vm402_vm2, %v3557_v11, %v3558_v35 }
 0xca6   :  { %2879 = vmatpush.msrb.mxu0 %v2753_v42  ;;  %v6003_v42 = vld [vmem:[%s6127_s6 + $0x8] sm:$0xff] }
 0xca8   :  { %2880 = vmatpush.msrb.mxu0 %v2729_v54  ;;  %v3568_v54 = vunpack.i.h.bf16 %v5914_v27 }
 0xca9   :  { %v5971_v14 = vpop.permute.xlu0 %2689 }
 0xcaa   :  { %v3561_v13 = vpop.permute.xlu1 %3560  ;;  %2881 = vmatpush.msrb.mxu0 %v5829_v51  ;;  %v5960_v51 = vpop.permute.xlu2 %3610  ;;  %v2697_v30 = vsel %vm346_vm4, %v3598_v25, %v5971_v14  ;;  %v2778_v18 = vsel %vm427_vm1, %v3568_v54, %v3542_v47 }
 0xcab   :  { %v3563_v3 = vunpack.i.h.bf16 %v3561_v13  ;;  %v3562_v59 = vunpack.i.l.bf16 %v3561_v13 }
 0xcad   :  { %v2752_v4 = vsel %vm402_vm2, %v3558_v35, %v3562_v59  ;;  %v2751_v21 = vsel %vm402_vm2, %v3562_v59, %v3563_v3  ;;  %v2750_v5 = vsel %vm402_vm2, %v3563_v3, %v3582_v20  ;;  %v2802_v59 = vsel %vm452_vm0, %v3553_v46, %v3532_v10 }
 0xcae   :  { %2899 = vmatpush.msrb.mxu1 %v2752_v4  ;;  %2919 = vmatpush.msra.mxu2 %v2751_v21 }
 0xcaf   :  { %2939 = vmatpush.msra.mxu3 %v2750_v5 }
 0xcb2   :  { %v3576_v44 = vpop.permute.xlu1 %3575  ;;  %v3621_v7 = vpop.permute.xlu2 %3620 }
 0xcb3   :  { %v3578_v24 = vunpack.i.h.bf16 %v3576_v44  ;;  %v3577_v50 = vunpack.i.l.bf16 %v3576_v44  ;;  %v3623_v40 = vunpack.i.h.bf16 %v3621_v7  ;;  %v3622_v15 = vunpack.i.l.bf16 %v3621_v7 }
 0xcb4   :  { %v3583_v44 = vunpack.i.h.bf16 %v5934_v19 }
 0xcb5   :  { %v2728_v34 = vsel %vm377_vm3, %v3573_v37, %v3577_v50  ;;  %v2727_v23 = vsel %vm377_vm3, %v3577_v50, %v3578_v24  ;;  %v2726_v38 = vsel %vm377_vm3, %v3578_v24, %v3587_v0  ;;  %v5998_v37 = vpop.permute.xlu0 %2665  ;;  %v2627_v3 = vsel %vm6209_vm14, %v3622_v15, %v3623_v40  ;;  %vm6220_vm14 = vmmov %vm6210_vm15 }
 0xcb6   :  { %2900 = vmatpush.msrb.mxu1 %v2728_v34  ;;  %2920 = vmatpush.msra.mxu2 %v2727_v23  ;;  %v2754_v10 = vsel %vm402_vm2, %v3583_v44, %v3557_v11  ;;  %v2749_v33 = vsel %vm402_vm2, %v3582_v20, %v3583_v44  ;;  %vm6225_vm2 = vmmov %vm6217_vm11 }
 0xcb7   :  { %2940 = vmatpush.msra.mxu3 %v2726_v38 }
 0xcb8   :  { %2901 = vmatpush.msrb.mxu1 %v5831_v1  ;;  %2921 = vmatpush.msra.mxu2 %v5833_v60  ;;  %v3613_v1 = vunpack.i.h.bf16 %v5960_v51  ;;  %v3612_v60 = vunpack.i.l.bf16 %v5960_v51  ;;  %v3588_v51 = vunpack.i.h.bf16 %v5924_v22 }
 0xcb9   :  { %2941 = vmatpush.msra.mxu3 %v5835_v12 }
 0xcba   :  { %v3591_v55 = vpop.permute.xlu1 %3590  ;;  %v2651_v39 = vsel %vm6208_vm13, %v3612_v60, %v3613_v1  ;;  %v2730_v23 = vsel %vm377_vm3, %v3588_v51, %v3572_v28  ;;  %v2618_v28 = vpop.permute.xlu2 %2617  ;;  %vm6219_vm13 = vmmov %vm6217_vm11 }
 0xcbb   :  { %v3593_v58 = vunpack.i.h.bf16 %v3591_v55  ;;  %v3592_v49 = vunpack.i.l.bf16 %v3591_v55  ;;  %2942 = vmatpush.msra.mxu3 %v2697_v30 }
 0xcbd   :  { %v2700_v12 = vsel %vm346_vm4, %v3597_v6, %v3592_v49  ;;  %v2699_v26 = vsel %vm346_vm4, %v3592_v49, %v3593_v58  ;;  %v2698_v45 = vsel %vm346_vm4, %v3593_v58, %v3598_v25  ;;  %v2642_v38 = vpop.permute.xlu0 %2641 }
 0xcbe   :  { %2882 = vmatpush.msrb.mxu0 %v2700_v12  ;;  %2902 = vmatpush.msrb.mxu1 %v2699_v26 }
 0xcbf   :  { %2922 = vmatpush.msra.mxu2 %v2698_v45 }
 0xcc0   :  { %2903 = vmatpush.msrb.mxu1 %v2675_v29 }
 0xcc2   :  { %v3606_v35 = vpop.permute.xlu1 %3605  ;;  %2904 = vmatpush.msrb.mxu1 %v2651_v39 }
 0xcc3   :  { %v3608_v17 = vunpack.i.h.bf16 %v3606_v35  ;;  %v3607_v13 = vunpack.i.l.bf16 %v3606_v35 }
 0xcc4   :  { %2905 = vmatpush.msrb.mxu1 %v2627_v3 }
 0xcc5   :  { %3064 = vmatmul.msk.f32.vlgmr.msrb.gmra.mxu1 %vm6210_vm15, %v6003_v42  ;;  %v2676_v4 = vsel %vm6211_vm8, %v3607_v13, %v3602_v61  ;;  %v2674_v21 = vsel %vm6212_vm7, %v3603_v56, %v3608_v17  ;;  %v2673_v5 = vsel %vm6213_vm9, %v3608_v17, %v5998_v37  ;;  %vm6221_vm15 = vmmov %vm6220_vm14  ;;  %v2773_v61 = vsel %vm427_vm1, %v3567_v62, %v3568_v54 }
 0xcc6   :  { %2977 = vmatpush.msra.mxu1 %v2802_v59  ;;  %2883 = vmatpush.msrb.mxu0 %v2676_v4  ;;  %vm6222_vm8 = vmmov %vm6220_vm14  ;;  %v2725_v62 = vsel %vm377_vm3, %v3587_v0, %v3588_v51 }
 0xcc7   :  { %2923 = vmatpush.msra.mxu2 %v2674_v21  ;;  %2943 = vmatpush.msra.mxu3 %v2673_v5  ;;  %vm6224_vm1 = vmmov %vm6216_vm5 }
 0xcc8   :  { %2978 = vmatpush.msra.mxu1 %v2778_v18  ;;  %vm6228_vm9 = vmmov %vm6224_vm1 }
 0xcca   :  { %2979 = vmatpush.msra.mxu1 %v2754_v10  ;;  %v3616_v24 = vpop.permute.xlu1 %3615 }
 0xccb   :  { %v3618_v50 = vunpack.i.h.bf16 %v3616_v24  ;;  %v3617_v34 = vunpack.i.l.bf16 %v3616_v24 }
 0xccc   :  { %2980 = vmatpush.msra.mxu1 %v2730_v23 }
 0xccd   :  { %v2652_v52 = vsel %vm6214_vm6, %v3617_v34, %v3612_v60  ;;  %v2650_v47 = vsel %vm6215_vm10, %v3613_v1, %v3618_v50  ;;  %v2649_v43 = vsel %vm6216_vm5, %v3618_v50, %v2642_v38  ;;  %v2668_v1 = vpop.permute.xlu0 %2667 }
 0xcce   :  { %2981 = vmatpush.msra.mxu1 %v5846_v2  ;;  %2884 = vmatpush.msrb.mxu0 %v2652_v52  ;;  %v2797_v2 = vsel %vm452_vm0, %v3552_v31, %v3553_v46  ;;  %vm6223_vm0 = vmmov %vm6212_vm7  ;;  %v2644_v31 = vpop.permute.xlu2 %2643 }
 0xccf   :  { %2924 = vmatpush.msra.mxu2 %v2650_v47  ;;  %2944 = vmatpush.msra.mxu3 %v2649_v43  ;;  %v2671_v27 = vsel %vm6223_vm0, %v2668_v1, %v3607_v13  ;;  %v2647_v57 = vsel %vm6224_vm1, %v2644_v31, %v3617_v34  ;;  %vm6226_vm3 = vmmov %vm6223_vm0 }
 0xcd0   :  { %v2672_v0 = vsel %vm6226_vm3, %v5998_v37, %v2668_v1  ;;  %vm6227_vm7 = vmmov %vm6222_vm8 }
 0xcd1   :  { %vm6230_vm6 = vmmov %vm6227_vm7 }
 0xcd2   :  { %v3626_v63 = vpop.permute.xlu1 %3625 }
 0xcd3   :  { %v3628_v11 = vunpack.i.h.bf16 %v3626_v63  ;;  %v3627_v25 = vunpack.i.l.bf16 %v3626_v63 }
 0xcd5   :  { %v2628_v56 = vsel %vm6217_vm11, %v3627_v25, %v3622_v15  ;;  %v2626_v55 = vsel %vm6218_vm12, %v3623_v40, %v3628_v11  ;;  %v2625_v30 = vsel %vm6219_vm13, %v3628_v11, %v2618_v28 }
 0xcd6   :  { %2885 = vmatpush.msrb.mxu0 %v2628_v56  ;;  %2925 = vmatpush.msra.mxu2 %v2626_v55 }
 0xcd7   :  { %2945 = vmatpush.msra.mxu3 %v2625_v30  ;;  %3063 = vmatmul.msk.f32.vlgmr.msrb.gmra.mxu0 %vm6220_vm14, %v6003_v42 }
 0xcd8   :  { %3065 = vmatmul.msk.f32.vlgmr.msra.gmra.mxu2 %vm6221_vm15, %v6003_v42  ;;  %3066 = vmatmul.msk.f32.vlgmr.msra.gmra.mxu3 %vm6222_vm8, %v6003_v42 }
 0xcd9   :  { %2957 = vmatpush.msra.mxu0 %v2797_v2 }
 0xcda   :  { %v2692_v58 = vpop.permute.xlu1 %2691 }
 0xcdb   :  { %2958 = vmatpush.msra.mxu0 %v2773_v61  ;;  %v2695_v49 = vsel %vm346_vm4, %v2692_v58, %v3597_v6  ;;  %v2696_v19 = vsel %vm346_vm4, %v5971_v14, %v2692_v58  ;;  %vm6229_vm4 = vmmov %vm6225_vm2  ;;  %v2865_v6 = vpop.permute.xlu0 %2864 }
 0xcdc   :  { %2982 = vmatpush.msra.mxu1 %v2695_v49 }
 0xcdd   :  { %2959 = vmatpush.msra.mxu0 %v2749_v33 }
 0xcde   :  { %2983 = vmatpush.msra.mxu1 %v2671_v27 }
 0xcdf   :  { %2960 = vmatpush.msra.mxu0 %v2725_v62 }
 0xce0   :  { %2984 = vmatpush.msra.mxu1 %v2647_v57 }
 0xce1   :  { %2961 = vmatpush.msra.mxu0 %v5844_v36  ;;  %v2648_v36 = vsel %vm6228_vm9, %v2642_v38, %v2644_v31 }
 0xce2   :  { %v2620_v20 = vpop.permute.xlu1 %2619 }
 0xce3   :  { %2962 = vmatpush.msra.mxu0 %v2696_v19  ;;  %v2623_v22 = vsel %vm6225_vm2, %v2620_v20, %v3627_v25  ;;  %v2624_v14 = vsel %vm6229_vm4, %v2618_v28, %v2620_v20 }
 0xce4   :  { %2985 = vmatpush.msra.mxu1 %v2623_v22 }
 0xce5   :  { %2963 = vmatpush.msra.mxu0 %v2672_v0  ;;  %3068 = vmatmul.msk.f32.vlgmr.msra.gmra.mxu1 %vm6227_vm7, %v6003_v42 }
 0xce7   :  { %2964 = vmatpush.msra.mxu0 %v2648_v36 }
 0xce9   :  { %2965 = vmatpush.msra.mxu0 %v2624_v14 }
 0xcea   :  { %3067 = vmatmul.msk.f32.vlgmr.msra.gmra.mxu0 %vm6230_vm6, %v6003_v42 }
 0xd42   :  { %v2907_v7 = vpop.f32.mrf.mxu1 }
 0xd43   :  { %v2908_v60 = vadd.f32 %v2907_v7, %v2865_v6 }
 0xd45   :  { %v2991_v12 = vadd.f32 %v2908_v60, %v5280_v32 }
 0xd47   :  { %2997 = vst [vmem:[%s6128_s9 + $0x8] sm:$0xff] %v2991_v12 }
 0xd54   :  { %v2887_v26 = vpop.f32.mrf.mxu0 }
 0xd55   :  { %v2888_v45 = vadd.f32 %v2887_v26, %v2865_v6 }
 0xd57   :  { %v2990_v40 = vadd.f32 %v2888_v45, %v5292_v9 }
 0xd59   :  { %2996 = vst [vmem:[%s6128_s9] sm:$0xff] %v2990_v40 }
 0xd5b   :  { %v2927_v48 = vpop.f32.mrf.mxu2  ;;  %v2947_v15 = vpop.f32.mrf.mxu3 }
 0xd5c   :  { %v2928_v29 = vadd.f32 %v2927_v48, %v2865_v6  ;;  %v2948_v46 = vadd.f32 %v2947_v15, %v2865_v6 }
 0xd5e   :  { %v2992_v39 = vadd.f32 %v2928_v29, %v5284_v41  ;;  %v2993_v32 = vadd.f32 %v2948_v46, %v5287_v16 }
 0xd60   :  { %2998 = vst [vmem:[%s6128_s9 + $0x10] sm:$0xff] %v2992_v39 }
 0xd61   :  { %2999 = vst [vmem:[%s6128_s9 + $0x18] sm:$0xff] %v2993_v32 }
 0xd62   :  { %v2987_v9 = vpop.f32.mrf.mxu1 }
 0xd63   :  { %v2988_v37 = vadd.f32 %v2987_v9, %v2865_v6 }
 0xd65   :  { %v2995_v35 = vadd.f32 %v2988_v37, %v5304_v53 }
 0xd67   :  { %3001 = vst [vmem:[%s6128_s9 + $0x28] sm:$0xff] %v2995_v35  ;;  %v2967_v42 = vpop.f32.mrf.mxu0 }
 0xd68   :  { %v2968_v41 = vadd.f32 %v2967_v42, %v2865_v6 }
 0xd6a   :  { %v2994_v16 = vadd.f32 %v2968_v41, %v5314_v8 }
 0xd6c   :  { %3000 = vst [vmem:[%s6128_s9 + $0x20] sm:$0xff] %v2994_v16 }

</bundles_post_ra>
